<compile_context>
chip_gen: v6e
topology: v6e:2x2x1
jax: 0.10.0
libtpu: 0.0.40
codegen_flags: <defaults>
</compile_context>

<pallas_src>
import jax
import jax.numpy as jnp
import numpy as np
from jax import lax
from jax.experimental import pallas as pl
from jax.experimental.pallas import tpu as pltpu


def _pooler_kernel(x_ref, bias_ref, w_ref, o_ref, m_ref, l_ref, acc_ref):
    # x_ref:    (Tblk, Bblk, C)  encoder_out tile, native dtype, original layout
    # bias_ref: (Bblk, Tblk)     f32 additive bias (proj bias; -inf where padded)
    # w_ref:    (C, 1)           projection weight column, in x's dtype
    # o_ref:    (Bblk, C)        pooled output block (written on the last T tile)
    # m_ref:    (Bblk, 1) f32    running max      (online softmax state)
    # l_ref:    (Bblk, 1) f32    running denominator
    # acc_ref:  (Bblk, C) f32    running weighted sum
    t = pl.program_id(1)
    nt = pl.num_programs(1)
    tb, bb, c = x_ref.shape

    @pl.when(t == 0)
    def _init():
        m_ref[...] = jnp.full_like(m_ref, -jnp.inf)
        l_ref[...] = jnp.zeros_like(l_ref)
        acc_ref[...] = jnp.zeros_like(acc_ref)

    x = x_ref[...]                                     # (Tblk, Bblk, C), native dtype

    # --- attention logits on the MXU ---------------------------------------
    # Merge the leading (t, b) dims (layout-free: Bblk is a sublane multiple or
    # the full batch) and run a matvec (Tblk*Bblk, C) @ (C, 1) -> f32.
    s = lax.dot_general(x.reshape(tb * bb, c), w_ref[...],
                        dimension_numbers=(((1,), (0,)), ((), ())),
                        preferred_element_type=jnp.float32)        # (Tblk*Bblk, 1)
    # Tiny relayout (Tblk*Bblk f32 scalars) into a lane-dense (Bblk, Tblk) tile,
    # then fold in the linear bias / -inf padding mask.
    s = s.reshape(tb, bb).T + bias_ref[...]                        # (Bblk, Tblk)

    # --- online softmax across the T grid axis ------------------------------
    m_prev = m_ref[...]                                            # (Bblk, 1)
    m_new = jnp.maximum(m_prev, jnp.max(s, axis=-1, keepdims=True))
    # Clamp so tiles that are entirely padded (all -inf) never generate NaN in
    # the running state; rows padded over the whole sequence still finalize to
    # 0/0 = NaN, matching the PyTorch reference.
    m_safe = jnp.maximum(m_new, jnp.float32(-1e30))
    alpha = jnp.exp(jnp.maximum(m_prev, jnp.float32(-1e30)) - m_safe)  # (Bblk, 1)
    p = jnp.exp(s - m_safe)                            # (Bblk, Tblk); exactly 0 where padded

    l_ref[...] = alpha * l_ref[...] + jnp.sum(p, axis=-1, keepdims=True)
    m_ref[...] = m_new

    # --- weighted sum over this T tile in the native (t, b, c) layout -------
    # VPU broadcast-multiply accumulated over the leading t axis (no relayout
    # of the big tile; only p -- ~1 vreg of data -- is transposed).  f32 math
    # to match PyTorch's encoder_out.float() reduction.
    p_tb = p.T[:, :, None]                             # (Tblk, Bblk, 1), tiny
    ws = jnp.sum(p_tb * x.astype(jnp.float32), axis=0)             # (Bblk, C) f32
    acc_ref[...] = alpha * acc_ref[...] + ws

    @pl.when(t == nt - 1)
    def _finalize():
        o_ref[...] = (acc_ref[...] / l_ref[...]).astype(o_ref.dtype)


def _round_up(x, m):
    return -(-x // m) * m


def _pick_b_block(B, C, itemsize):
    """Batch tile: 8 rows (one sublane group) by default; grow it when the
    per-t-row strided-DMA chunk (Bblk*C*itemsize) would be tiny, but keep >= 2
    batch tiles when the batch allows so v7x can shard the 'parallel' axis
    across its two TensorCores."""
    if B < 8:
        return B                      # single batch tile == full (small) batch
    bb = 8
    while bb < 32 and bb * C * itemsize < 2048 and B >= 4 * bb:
        bb *= 2
    return bb


def _pick_t_block(T, bb, C, itemsize, t_block=None, target_bytes=4 << 20):
    """T tile + padded T.  Multi-tile T blocks must be multiples of 128 so the
    (Bblk, Tblk) bias block stays lane-aligned; a single tile may equal (padded)
    T.  Target ~4 MiB encoder blocks."""
    if t_block is not None:
        T_pad = _round_up(T, t_block)
        assert t_block % 128 == 0 or t_block == T_pad, t_block
        return t_block, T_pad
    row_bytes = bb * C * itemsize
    t_target = max(1, target_bytes // row_bytes)
    if T <= t_target:
        return T, T                   # single T tile, no padding needed
    t_cap = max(128, (t_target // 128) * 128)
    for d in range(t_cap, 0, -128):   # prefer a multiple-of-128 divisor of T
        if T % d == 0:
            return d, T
    # No aligned divisor: pad T up to a multiple of the capped tile.
    # TODO(synk): this costs one HBM copy of encoder_out for awkward T.
    return t_cap, _round_up(T, t_cap)


def self_attn_pooler(encoder_out, padding_mask, weight, bias, *, t_block=None):
    """encoder_out: (T, B, C); padding_mask: (T, B) bool or None; weight: (1, C)
    (nn.Linear(C, 1).weight); bias: (1,). Returns (B, C) in encoder_out.dtype.
    Rows that are fully padded return NaN, matching the PyTorch module."""
    T, B, C = encoder_out.shape
    dtype = encoder_out.dtype
    itemsize = jnp.dtype(dtype).itemsize

    bb = _pick_b_block(B, C, itemsize)
    B_pad = _round_up(B, bb)
    t_blk, T_pad = _pick_t_block(T, bb, C, itemsize, t_block)

    # Fold the linear bias and the -inf padding mask into one tiny (B, T) f32
    # additive term, lane-dense; padded rows / time steps get -inf so they
    # contribute exp(-inf) = 0.
    bias0 = bias.astype(jnp.float32)[0]
    if padding_mask is None:
        mask_bt = jnp.zeros((B, T), dtype=bool)
    else:
        mask_bt = jnp.transpose(padding_mask, (1, 0))
    add_bias = jnp.where(mask_bt, jnp.float32(-jnp.inf), bias0).astype(jnp.float32)
    if B_pad != B or T_pad != T:
        add_bias = jnp.pad(add_bias, ((0, B_pad - B), (0, T_pad - T)),
                           constant_values=-jnp.inf)

    x = encoder_out
    if B_pad != B or T_pad != T:
        # TODO(synk): only hit for awkward T/B shapes; costs one HBM copy.
        x = jnp.pad(x, ((0, T_pad - T), (0, B_pad - B), (0, 0)))

    # Projection weight as a (C, 1) column in x's dtype so the score matmul
    # runs natively (bf16 x bf16 on v6e/v7x) without upcasting the big tile.
    w_col = weight.reshape(C, 1).astype(dtype)

    grid = (B_pad // bb, T_pad // t_blk)

    # VMEM budget derived from the real footprint: double-buffered encoder
    # block + bias blocks + resident weight + f32 scratch + possible f32
    # temporaries for the broadcast-multiply reduction, plus headroom.
    x_blk_bytes = t_blk * bb * C * itemsize
    bias_blk_bytes = bb * t_blk * 4
    f32_tile_bytes = t_blk * bb * C * 4
    scratch_bytes = bb * C * 4 + 2 * 8 * 128 * 4
    vmem_bytes = (2 * x_blk_bytes + 2 * bias_blk_bytes + 2 * C * 4
                  + 2 * f32_tile_bytes + scratch_bytes + (4 << 20))
    vmem_limit = int(min(max(vmem_bytes, 16 << 20), 48 << 20))

    out = pl.pallas_call(
        _pooler_kernel,
        out_shape=jax.ShapeDtypeStruct((B_pad, C), dtype),
        grid_spec=pltpu.PrefetchScalarGridSpec(
            num_scalar_prefetch=0,
            grid=grid,
            in_specs=[
                # encoder_out in its original (T, B, C) layout
                pl.BlockSpec((t_blk, bb, C), lambda b, t: (t, b, 0)),
                # additive bias / -inf mask, lane-dense (Bblk, Tblk)
                pl.BlockSpec((bb, t_blk), lambda b, t: (b, t)),
                # projection weight column, resident across the grid
                pl.BlockSpec((C, 1), lambda b, t: (0, 0)),
            ],
            out_specs=pl.BlockSpec((bb, C), lambda b, t: (b, 0)),
            scratch_shapes=[
                pltpu.VMEM((bb, 1), jnp.float32),   # running max
                pltpu.VMEM((bb, 1), jnp.float32),   # running denom
                pltpu.VMEM((bb, C), jnp.float32),   # running weighted sum
            ],
        ),
        compiler_params=pltpu.CompilerParams(
            # TODO(synk): for B <= 8 there is a single batch tile, so one v7x
            # TensorCore idles; splitting T across cores needs a combine pass.
            dimension_semantics=("parallel", "arbitrary"),
            vmem_limit_bytes=vmem_limit,
        ),
    )(x, add_bias, w_col)
    if B_pad != B:
        out = out[:B]
    return out


def _reference(encoder_out, padding_mask, weight, bias):
    dtype = encoder_out.dtype
    x = encoder_out.astype(jnp.float32)
    scores = jnp.einsum('tbc,c->tb', x, weight.astype(jnp.float32)[0])
    scores = scores + bias.astype(jnp.float32)[0]
    if padding_mask is not None:
        scores = jnp.where(padding_mask, -jnp.inf, scores)
    w = jax.nn.softmax(scores, axis=0)
    out = jnp.einsum('tb,tbc->bc', w, x)
    return out.astype(dtype)


if __name__ == "__main__":
    key = jax.random.PRNGKey(0)

    def run_case(T, B, C, t_block, lengths, dtype=jnp.float32,
                 left_pad_col=None, rtol=2e-5, atol=2e-5):
        ks = jax.random.split(jax.random.fold_in(key, T * 1000 + B * 7 + C), 3)
        x = jax.random.normal(ks[0], (T, B, C), dtype=jnp.float32).astype(dtype)
        w = jax.random.normal(ks[1], (1, C), dtype=jnp.float32) * 0.1
        b = jax.random.normal(ks[2], (1,), dtype=jnp.float32) * 0.1
        lengths = jnp.asarray(lengths, dtype=jnp.int32)
        mask = jnp.arange(T, dtype=jnp.int32)[:, None] >= lengths[None, :]  # (T, B)
        if left_pad_col is not None:
            col, n_pad = left_pad_col
            mask = mask.at[:, col].set(jnp.arange(T) < n_pad)   # left-padded row
        out = self_attn_pooler(x, mask, w, b, t_block=t_block)
        out = jax.block_until_ready(out)
        ref = _reference(x, mask, w, b)
        assert out.shape == (B, C) and out.dtype == x.dtype
        np.testing.assert_allclose(np.asarray(out, dtype=np.float32),
                                   np.asarray(ref, dtype=np.float32),
                                   rtol=rtol, atol=atol)

    # Two T tiles (online-softmax carry), two batch tiles of 8; batch element 5
    # is left-padded so its first T tile is fully masked.
    run_case(256, 16, 128, 128,
             lengths=[256, 200, 128, 64, 3, 256, 17, 250,
                      256, 1, 255, 130, 64, 99, 12, 256],
             left_pad_col=(5, 160))
    # Single T tile, default tiling, two batch tiles.
    run_case(64, 16, 256, None,
             lengths=[64, 1, 17, 64, 32, 8, 60, 64, 5, 64, 40, 2, 64, 33, 9, 64])
    # Awkward T / small B: exercises T padding (-inf padded steps) + Bblk < 8.
    run_case(200, 5, 128, 128, lengths=[200, 37, 64, 3, 128])
    # bf16 encoder_out: scores on the MXU in bf16, weighted sum in f32.
    run_case(256, 16, 128, 128,
             lengths=[256, 200, 128, 64, 3, 256, 17, 250,
                      256, 1, 255, 130, 64, 99, 12, 256],
             dtype=jnp.bfloat16, rtol=0.1, atol=0.1)

    print("KERNEL_OK")
</pallas_src>

<mosaic_0001>
module attributes {stable_mosaic.version = 11 : i64} {
  func.func @_pooler_kernel(%arg0: i32, %arg1: i32, %arg2: memref<128x8x128xf32, #tpu.memory_space<vmem>>, %arg3: memref<8x128xf32, #tpu.memory_space<vmem>>, %arg4: memref<128x1xf32, #tpu.memory_space<vmem>>, %arg5: memref<8x128xf32, #tpu.memory_space<vmem>>, %arg6: memref<8x1xf32, #tpu.memory_space<vmem>>, %arg7: memref<8x1xf32, #tpu.memory_space<vmem>>, %arg8: memref<8x128xf32, #tpu.memory_space<vmem>>) attributes {dimension_semantics = [#tpu.dimension_semantics<parallel>, #tpu.dimension_semantics<arbitrary>], iteration_bounds = array<i64: 2, 2>, scalar_prefetch = 0 : i64, scratch_operands = 3 : i64, tpu.core_type = #tpu.core_type<tc>, window_params = [{transform_indices = @transform_0, window_bounds = array<i64: 128, 8, 128>}, {transform_indices = @transform_1, window_bounds = array<i64: 8, 128>}, {pipeline_mode = #tpu.pipeline_mode<synchronous>, transform_indices = @transform_2, window_bounds = array<i64: 128, 1>}, {transform_indices = @transform_3, window_bounds = array<i64: 8, 128>}]} {
    %c0_i32 = arith.constant 0 : i32
    %0 = arith.cmpi eq, %arg1, %c0_i32 : i32
    %1 = arith.extui %0 : i1 to i32
    %c0_i32_0 = arith.constant 0 : i32
    %2 = arith.cmpi ne, %1, %c0_i32_0 : i32
    scf.if %2 {
      %cst_25 = arith.constant 0xFF800000 : f32
      %44 = vector.broadcast %cst_25 : f32 to vector<8x1xf32>
      %c0_26 = arith.constant 0 : index
      %c0_27 = arith.constant 0 : index
      %45 = vector.load %arg6[%c0_26, %c0_27] : memref<8x1xf32, #tpu.memory_space<vmem>>, vector<8x1xf32>
      tpu.vector_store %arg6[%c0_26, %c0_27], %44 {strides = array<i32>} : memref<8x1xf32, #tpu.memory_space<vmem>>, vector<8x1xf32>,
      %cst_28 = arith.constant 0.000000e+00 : f32
      %46 = vector.broadcast %cst_28 : f32 to vector<8x1xf32>
      %c0_29 = arith.constant 0 : index
      %c0_30 = arith.constant 0 : index
      %47 = vector.load %arg7[%c0_29, %c0_30] : memref<8x1xf32, #tpu.memory_space<vmem>>, vector<8x1xf32>
      tpu.vector_store %arg7[%c0_29, %c0_30], %46 {strides = array<i32>} : memref<8x1xf32, #tpu.memory_space<vmem>>, vector<8x1xf32>,
      %cst_31 = arith.constant 0.000000e+00 : f32
      %48 = vector.broadcast %cst_31 : f32 to vector<8x128xf32>
      %c0_32 = arith.constant 0 : index
      %c0_33 = arith.constant 0 : index
      %49 = vector.load %arg8[%c0_32, %c0_33] : memref<8x128xf32, #tpu.memory_space<vmem>>, vector<8x128xf32>
      tpu.vector_store %arg8[%c0_32, %c0_33], %48 {strides = array<i32>} : memref<8x128xf32, #tpu.memory_space<vmem>>, vector<8x128xf32>,
    } else {
    }
    %c0 = arith.constant 0 : index
    %c0_1 = arith.constant 0 : index
    %c0_2 = arith.constant 0 : index
    %3 = vector.load %arg2[%c0, %c0_1, %c0_2] : memref<128x8x128xf32, #tpu.memory_space<vmem>>, vector<128x8x128xf32>
    %4 = vector.shape_cast %3 : vector<128x8x128xf32> to vector<1024x128xf32>
    %c0_3 = arith.constant 0 : index
    %c0_4 = arith.constant 0 : index
    %5 = vector.load %arg4[%c0_3, %c0_4] : memref<128x1xf32, #tpu.memory_space<vmem>>, vector<128x1xf32>
    %cst = arith.constant dense<0.000000e+00> : vector<1024x1xf32>
    %6 = tpu.matmul %4, %5, %cst {dimension_numbers = #tpu.dot_dimension_numbers<[1], [0], [0], [1], [0, 0, 1, 1], [], []>} : vector<1024x128xf32>, vector<128x1xf32>, vector<1024x1xf32> -> vector<1024x1xf32>
    %7 = vector.shape_cast %6 : vector<1024x1xf32> to vector<128x8xf32>
    %8 = tpu.transpose %7, [1, 0] : vector<128x8xf32> -> vector<8x128xf32>
    %c0_5 = arith.constant 0 : index
    %c0_6 = arith.constant 0 : index
    %9 = vector.load %arg3[%c0_5, %c0_6] : memref<8x128xf32, #tpu.memory_space<vmem>>, vector<8x128xf32>
    %10 = arith.addf %8, %9 : vector<8x128xf32>
    %c0_7 = arith.constant 0 : index
    %c0_8 = arith.constant 0 : index
    %11 = vector.load %arg6[%c0_7, %c0_8] : memref<8x1xf32, #tpu.memory_space<vmem>>, vector<8x1xf32>
    %cst_9 = arith.constant dense<0xFF800000> : vector<8xf32>
    %12 = vector.multi_reduction <maximumf>, %10, %cst_9 [1] : vector<8x128xf32> to vector<8xf32>
    %13 = vector.shape_cast %12 : vector<8xf32> to vector<8x1xf32>
    %14 = arith.maximumf %11, %13 : vector<8x1xf32>
    %cst_10 = arith.constant -1.000000e+30 : f32
    %15 = vector.broadcast %cst_10 : f32 to vector<8x1xf32>
    %16 = arith.maximumf %14, %15 : vector<8x1xf32>
    %cst_11 = arith.constant -1.000000e+30 : f32
    %17 = vector.broadcast %cst_11 : f32 to vector<8x1xf32>
    %18 = arith.maximumf %11, %17 : vector<8x1xf32>
    %19 = arith.subf %18, %16 : vector<8x1xf32>
    %20 = math.exp %19 : vector<8x1xf32>
    %21 = vector.broadcast %16 : vector<8x1xf32> to vector<8x128xf32>
    %22 = arith.subf %10, %21 : vector<8x128xf32>
    %23 = math.exp %22 : vector<8x128xf32>
    %c0_12 = arith.constant 0 : index
    %c0_13 = arith.constant 0 : index
    %24 = vector.load %arg7[%c0_12, %c0_13] : memref<8x1xf32, #tpu.memory_space<vmem>>, vector<8x1xf32>
    %25 = arith.mulf %20, %24 : vector<8x1xf32>
    %cst_14 = arith.constant dense<0.000000e+00> : vector<8xf32>
    %26 = vector.multi_reduction <add>, %23, %cst_14 [1] : vector<8x128xf32> to vector<8xf32>
    %27 = vector.shape_cast %26 : vector<8xf32> to vector<8x1xf32>
    %28 = arith.addf %25, %27 : vector<8x1xf32>
    %c0_15 = arith.constant 0 : index
    %c0_16 = arith.constant 0 : index
    %29 = vector.load %arg7[%c0_15, %c0_16] : memref<8x1xf32, #tpu.memory_space<vmem>>, vector<8x1xf32>
    tpu.vector_store %arg7[%c0_15, %c0_16], %28 {strides = array<i32>} : memref<8x1xf32, #tpu.memory_space<vmem>>, vector<8x1xf32>,
    %c0_17 = arith.constant 0 : index
    %c0_18 = arith.constant 0 : index
    %30 = vector.load %arg6[%c0_17, %c0_18] : memref<8x1xf32, #tpu.memory_space<vmem>>, vector<8x1xf32>
    tpu.vector_store %arg6[%c0_17, %c0_18], %14 {strides = array<i32>} : memref<8x1xf32, #tpu.memory_space<vmem>>, vector<8x1xf32>,
    %31 = tpu.transpose %23, [1, 0] : vector<8x128xf32> -> vector<128x8xf32>
    %32 = vector.shape_cast %31 : vector<128x8xf32> to vector<128x8x1xf32>
    %33 = vector.broadcast %32 : vector<128x8x1xf32> to vector<128x8x128xf32>
    %34 = arith.mulf %33, %3 : vector<128x8x128xf32>
    %cst_19 = arith.constant dense<0.000000e+00> : vector<8x128xf32>
    %35 = vector.multi_reduction <add>, %34, %cst_19 [0] : vector<128x8x128xf32> to vector<8x128xf32>
    %c0_20 = arith.constant 0 : index
    %c0_21 = arith.constant 0 : index
    %36 = vector.load %arg8[%c0_20, %c0_21] : memref<8x128xf32, #tpu.memory_space<vmem>>, vector<8x128xf32>
    %37 = vector.broadcast %20 : vector<8x1xf32> to vector<8x128xf32>
    %38 = arith.mulf %37, %36 : vector<8x128xf32>
    %39 = arith.addf %38, %35 : vector<8x128xf32>
    %c0_22 = arith.constant 0 : index
    %c0_23 = arith.constant 0 : index
    %40 = vector.load %arg8[%c0_22, %c0_23] : memref<8x128xf32, #tpu.memory_space<vmem>>, vector<8x128xf32>
    tpu.vector_store %arg8[%c0_22, %c0_23], %39 {strides = array<i32>} : memref<8x128xf32, #tpu.memory_space<vmem>>, vector<8x128xf32>,
    %c1_i32 = arith.constant 1 : i32
    %41 = arith.cmpi eq, %arg1, %c1_i32 : i32
    %42 = arith.extui %41 : i1 to i32
    %c0_i32_24 = arith.constant 0 : i32
    %43 = arith.cmpi ne, %42, %c0_i32_24 : i32
    scf.if %43 {
      %c0_25 = arith.constant 0 : index
      %c0_26 = arith.constant 0 : index
      %44 = vector.load %arg8[%c0_25, %c0_26] : memref<8x128xf32, #tpu.memory_space<vmem>>, vector<8x128xf32>
      %c0_27 = arith.constant 0 : index
      %c0_28 = arith.constant 0 : index
      %45 = vector.load %arg7[%c0_27, %c0_28] : memref<8x1xf32, #tpu.memory_space<vmem>>, vector<8x1xf32>
      %46 = vector.broadcast %45 : vector<8x1xf32> to vector<8x128xf32>
      %47 = arith.divf %44, %46 : vector<8x128xf32>
      %c0_29 = arith.constant 0 : index
      %c0_30 = arith.constant 0 : index
      %48 = vector.load %arg5[%c0_29, %c0_30] : memref<8x128xf32, #tpu.memory_space<vmem>>, vector<8x128xf32>
      tpu.vector_store %arg5[%c0_29, %c0_30], %47 {strides = array<i32>} : memref<8x128xf32, #tpu.memory_space<vmem>>, vector<8x128xf32>,
    } else {
    }
    return
  }
  func.func @transform_0(%arg0: i32, %arg1: i32) -> (i32, i32, i32) {
    %c0_i32 = arith.constant 0 : i32
    %c0_i32_0 = arith.constant 0 : i32
    return %arg1, %arg0, %c0_i32 : i32, i32, i32
  }
  func.func @transform_1(%arg0: i32, %arg1: i32) -> (i32, i32) {
    %c0_i32 = arith.constant 0 : i32
    return %arg0, %arg1 : i32, i32
  }
  func.func @transform_2(%arg0: i32, %arg1: i32) -> (i32, i32) {
    %c0_i32 = arith.constant 0 : i32
    %c0_i32_0 = arith.constant 0 : i32
    %c0_i32_1 = arith.constant 0 : i32
    return %c0_i32, %c0_i32_0 : i32, i32
  }
  func.func @transform_3(%arg0: i32, %arg1: i32) -> (i32, i32) {
    %c0_i32 = arith.constant 0 : i32
    %c0_i32_0 = arith.constant 0 : i32
    return %arg0, %c0_i32 : i32, i32
  }
}

</mosaic_0001>

<bundles_post_ra>
// kernel: tpu_custom_call.1
= control target key start
LH: loop header
LB: loop body
LE: loop exit
PB: predicated region body
PF: predicated region fallthrough
CT: control target
= control target key end

     0   :  { %s5935_s0 = inlined_call_operand.hbm [shape: f32[256,16,128], index: 0, kind: input, shape index: {}]   ;;  %s5936_s1 = inlined_call_operand.hbm [shape: f32[16,256], index: 1, kind: input, shape index: {}]   ;;  %s5937_s2 = inlined_call_operand.vmem [shape: f32[128,1], index: 2, kind: input, shape index: {}]   ;;  %s5938_s3 = inlined_call_operand.hbm [shape: f32[16,128], index: 3, kind: output, shape index: {}]  }
   0x1   :  { %5948 = sst [smem:[#allocation23_spill]] %s5935_s0 }
   0x2   :  { %5949 = sst [smem:[#allocation24_spill]] %s5938_s3 }
   0x3   :  { %8 = vsyncpa [#allocation6], 0 }
   0x4   :  { %10 = vsyncpa [#allocation6 + $0x1], 0 }
   0x5   :  { %11 = vsyncpa [#allocation9], 0 }
   0x6   :  { %13 = vsyncpa [#allocation9 + $0x1], 0 }
   0x7   :  { %14 = vsyncpa [#allocation7], 0 }
   0x8   :  { %16 = vsyncpa [#allocation7 + $0x1], 0  ;;  %s4538_s12 = smov 0   ;;  %s4540_s13 = smov 0  }
   0x9   :  { %s4542_s14 = smov 0   ;;  %s4544_s15 = smov 0  }
   0xa   :  { %s4546_s16 = smov 0   ;;  %s4548_s17 = smov 0  }
   0xb   :  { %s4550_s18 = smov 0   ;;  %s4552_s19 = smov 0  }
   0xc   :  { %s4554_s20 = smov 0   ;;  %s4556_s21 = smov 0  }
   0xd   :  { %s4558_s22 = smov 0  }
   0xe LB: > { %5950 = sst [smem:[#allocation14_spill]] %s4466_s12  ;;  %s3652_s23 = sadd.s32 4294967295, %s4506_s22   ;;  %s4506_s22 = sphi %s4558_s22, %s22_s22   ;;  %s4502_s21 = sphi %s4556_s21, %s5983_s21   ;;  %s4498_s20 = sphi %s4554_s20, %s5982_s20   ;;  %s4494_s19 = sphi %s4552_s19, %s5981_s19   ;;  %s4490_s18 = sphi %s4550_s18, %s5980_s18   ;;  %s4486_s17 = sphi %s4548_s17, %s5973_s17   ;;  %s4482_s16 = sphi %s4546_s16, %s5979_s16   ;;  %s4478_s15 = sphi %s4544_s15, %s5978_s15   ;;  %s4474_s14 = sphi %s4542_s14, %s5971_s14   ;;  %s4470_s13 = sphi %s4540_s13, %s5977_s13   ;;  %s4466_s12 = sphi %s4538_s12, %s5976_s12  }
   0xf   : > { %5951 = sst [smem:[#allocation15_spill]] %s4474_s14  ;;  %s3653_s24 = sadd.s32 4294967294, %s4506_s22  }
  0x10   : > { %5952 = sst [smem:[#allocation16_spill]] %s4486_s17  ;;  %s31_s25 = sadd.s32 1, %s4498_s20 }
  0x11   : > { %s34_s26 = sadd.s32 1, %s4502_s21  ;;  %p32_p0 = scmp.ge.s32.totalorder %s31_s25, 2 }
  0x12   : > { %s43_s27 = sadd.s32 1, %s4486_s17  ;;  %p50_p1 = scmp.ne.s32.totalorder %s4486_s17, %s4482_s16 }
  0x13   : > { %p51_p2 = scmp.eq.s32.totalorder %s4506_s22, 0  ;;  %s5985_s25 = smov (%p32_p0, %s31_s25), 0 }
  0x14   : > { %5953 = sst [smem:[#allocation17_spill]] %s5985_s25  ;;  %s5987_s26 = smov (!%p32_p0, %s34_s26), %s4502_s21 }
  0x15   : > { %s38_s28 = ssub.s32 %s4498_s20, %s5985_s25  ;;  %p4604_p3 = por %p51_p2, %p50_p1 }
  0x16   : > { %p36_p4 = scmp.ge.s32.totalorder %s5987_s26, 2  ;;  %p56_p5 = scmp.ne.s32.totalorder %s4482_s16, %s4478_s15 }
  0x17   : > { %p57_p6 = scmp.eq.s32.totalorder %s3652_s23, 0  ;;  %s118_s30 = sadd.s32 1, %s4474_s14 }
  0x18   : > { %s5989_s26 = smov (%p36_p4, %s5987_s26), 0  ;;  %p128_p8 = scmp.ne.s32.totalorder %s4474_s14, %s4470_s13 }
  0x19   : > { %5955 = sst [smem:[#allocation18_spill]] %s5989_s26  ;;  %p4612_p7 = por %p57_p6, %p56_p5 }
  0x1a   : > { %s39_s5 = ssub.s32 %s4502_s21, %s5989_s26  ;;  %p129_p9 = scmp.eq.s32.totalorder %s3652_s23, 3 }
  0x1b   : > { %s40_s6 = sor.u32 %s39_s5, %s38_s28  ;;  %p116_p10 = scmp.eq.s32.totalorder %s39_s5, 0 }
  0x1c   : > { %p41_p11 = scmp.eq.s32.totalorder %s40_s6, 0  ;;  %p4620_p12 = por %p129_p9, %p128_p8 }
  0x1d   : > { %s4625_s8 = scalar_select %p116_p10, %s4474_s14, %s118_s30  }
  0x1e   : > { %s4628_s9 = scalar_select %p41_p11, %s4486_s17, %s43_s27  }
  0x1f   : > { %5958 = sst [smem:[#allocation19_spill]] %s4625_s8  ;;  %p134_p13 = scmp.ne.s32.totalorder %s4470_s13, %s4466_s12 }
  0x20   : > { %5959 = sst [smem:[#allocation20_spill]] %s4628_s9  ;;  %p135_p0 = scmp.eq.s32.totalorder %s3653_s24, 3 }
  0x21   : > { %p4091_p1 = scmp.lt.s32.totalorder %s4506_s22, 4  ;;  %s4638_s11 = sand.u32 1, %s4486_s17  }
  0x22   : > { %p4633_p2 = por %p135_p0, %p134_p13  ;;  %s3656_s15 = sshll.u32 %s4638_s11, 10 }
  0x23   : > { %s3673_s23 = sshll.u32 %s4498_s20, 8  ;;  %s162_s5 = scalar_lea.vmem [#allocation5], %s3656_s15 }
  0x24   : > { %s5960_s10 = scalar_select %p4633_p2, 1, 0 }
  0x25   : > { %s168_s28 = sadd.s32 %s4502_s21, %s3673_s23  ;;  %s171_s6 = sshll.u32 %s162_s5, 4  ;;  %s172_s6 = int_to_ptr.vmem [resolvable:$true] %s171_s6 }
  0x26   : > { %5961 = sst [smem:[#allocation21_spill]] %s5960_s10  ;;  %s3659_s30 = sshll.u32 %s168_s28, 7 }
  0x27   : > { %s5962_s0 = sld [smem:[#allocation23_spill]]  ;;  %p4648_p4 = pnand %p4091_p1, %p4604_p3 }
  0x28   : > { %s159_s9 = scalar_lea.sflag [#allocation6], %s4638_s11  ;;  %s4339_s17 = scalar_lea.vmem %s172_s6, 16384 }
  0x29   : > { %p4328_p5 = pneg %p4648_p4  ;;  %p4340_p6 = scmp.ne.s32.totalorder %s172_s6, %s4339_s17 }
  0x2a   : > { %s4508_s15 = smov [#allocation5]  }
  0x2b   : > { %p4342_p8 = pnand %p4340_p6, %p4328_p5  ;;  %s4344_s23 = sshll.u32 %s4508_s15, 4  ;;  %s4345_s23 = int_to_ptr.vmem [resolvable:$false] %s4344_s23 }
  0x2c   : > { %s4346_s26 = scalar_lea.vmem %s4345_s23, 32768  ;;  %p4347_p10 = scmp.lt.s32.totalorder %s172_s6, %s4345_s23 }
  0x2d   : > { %s170_s24 = scalar_lea.hbm %s5962_s0, %s3659_s30  ;;  %p4343_p9 = pneg %p4342_p8 }
  0x2e   : > { %p4348_p3 = scmp.lt.s32.totalorder %s4346_s26, %s4339_s17 }
  0x30   : > { %p4349_p11 = por %p4348_p3, %p4347_p10 }
  0x32   : > { %p4350_p13 = pnand %p4349_p11, %p4343_p9 }
  0x34   : > { %4353 = shalt.err (!%p4350_p13)
}
  0x35   : > { %s4509_s29 = smov 256   ;;  %s4510_s28 = smov 128  }
  0x36   : > { %s4511_s5 = smov 8   ;;  %p3663_p0 = scmp.ge.s32.totalorder %s4506_s22, 1 }
  0x37   : > { %4083 = dma.hbm_to_vmem [thread:$0]  (!%p4648_p4), %s170_s24, 16384, %s172_s6, %s159_s9, %s4509_s29, %s4510_s28, %s4511_s5  }
  0x38   : > { %p199_p1 = scmp.lt.s32.totalorder %s4506_s22, 5  ;;  %s3660_s30 = sshll.u32 %s4638_s11, 3 }
  0x39   : > { %s3661_s27 = sshll.u32 %s4502_s21, 1  ;;  %s185_s15 = scalar_lea.vmem [#allocation8], %s3660_s30 }
  0x3a   : > { %p4663_p6 = pnand %p3663_p0, %p199_p1  ;;  %s194_s23 = sshll.u32 %s185_s15, 4  ;;  %s195_s23 = int_to_ptr.vmem [resolvable:$true] %s194_s23 }
  0x3b   : > { %s190_s26 = sadd.s32 %s4498_s20, %s3661_s27  ;;  %s182_s12 = scalar_lea.sflag [#allocation9], %s4638_s11 }
  0x3c   : > { %s3662_s0 = sshll.u32 %s190_s26, 7  ;;  %s4367_s3 = scalar_lea.vmem %s195_s23, 128 }
  0x3d   : > { %s192_s10 = scalar_lea.hbm %s5936_s1, %s3662_s0  ;;  %p4368_p8 = scmp.ne.s32.totalorder %s195_s23, %s4367_s3 }
  0x3e   : > { %s4512_s9 = smov [#allocation8]  }
  0x3f   : > { %p4370_p9 = pnand %p4368_p8, %p4328_p5  ;;  %s4372_s6 = sshll.u32 %s4512_s9, 4  ;;  %s4373_s6 = int_to_ptr.vmem [resolvable:$false] %s4372_s6 }
  0x40   : > { %s4374_s24 = scalar_lea.vmem %s4373_s6, 256  ;;  %p4375_p3 = scmp.lt.s32.totalorder %s195_s23, %s4373_s6 }
  0x41   : > { %p4371_p10 = pneg %p4370_p9  ;;  %p4376_p11 = scmp.lt.s32.totalorder %s4374_s24, %s4367_s3 }
  0x43   : > { %p4377_p13 = por %p4376_p11, %p4375_p3 }
  0x45   : > { %p4378_p0 = pnand %p4377_p13, %p4371_p10 }
  0x47   : > { %4381 = shalt.err (!%p4378_p0)
}
  0x48   : > { %4086 = dma.hbm_to_vmem [thread:$0]  (!%p4648_p4), %s192_s10, 128, %s195_s23, %s182_s12  }
  0x49   : > { %203 = sbr.rel (%p4663_p6) target bundleno = 1773 (0x6ed), region = 32 }
  0x4e   : > { %s205_s0 = sand.u32 1, %s4482_s16  }
  0x4f   : > { %s3664_s14 = sshll.u32 %s205_s0, 10  ;;  %s206_s8 = scalar_lea.sflag [#allocation6], %s205_s0 }
  0x50   : > { %s4681_s11 = scalar_lea.vmem [#allocation5], %s3664_s14 }
  0x51   : > { %4453 = dma.done.wait (%p4612_p7), %s206_s8, 16384  }
  0x52   : > { %4455 = vsyncadd (%p4612_p7), %s206_s8, 4294950912  ;;  %s3665_s3 = sshll.u32 %s205_s0, 3  ;;  %s215_s29 = scalar_lea.sflag [#allocation9], %s205_s0 }
  0x53   : > { %s4687_s25 = scalar_lea.vmem [#allocation8], %s3665_s3 }
  0x54   : > { %4457 = dma.done.wait (%p4612_p7), %s215_s29, 128  }
  0x55   : > { %4459 = vsyncadd (%p4612_p7), %s215_s29, 4294967168  ;;  %s243_s12 = sand.u32 1, %s4470_s13   ;;  %p3667_p4 = scmp.ne.s32.totalorder %s4490_s18, 0 }
  0x56   : > { %s4696_s10 = sshll.u32 %s243_s12, 3 }
  0x57   : > { %s245_s28 = scalar_lea.vmem [#allocation10], %s4696_s10  ;;  %250 = sbr.rel (%p3667_p4) target bundleno = 95 (0x5f), region = 44 }
  0x5c   : > { %vm251_vm0 = vcmask 7168   ;;  %v4513_v0 = vmov -inf   ;;  %v4514_v1 = vmov 0.0  }
  0x5d   : > { %252 = vst.msk [vmem:[#allocation2] sm:$0xff] %vm251_vm0, %v4513_v0  ;;  %253 = vst.msk [vmem:[#allocation3] sm:$0xff] %vm251_vm0, %v4514_v1 }
  0x5e   : > { %254 = vst [vmem:[#allocation4] sm:$0xff] %v4514_v1 }
  0x5f PF: > { %v398_v2 = vld [vmem:[%s5937_s2 + $0x78] sm:$0xff]  ;;  %v397_v3 = vld [vmem:[%s5937_s2 + $0x70] sm:$0xff]  ;;  %v396_v4 = vld [vmem:[%s5937_s2 + $0x68] sm:$0xff]  ;;  %v4515_v28 = vmov 0   ;;  %vm2130_vm1 = vcmask 1041409   ;;  %vm2132_vm2 = vcmask 1042434  }
  0x60   : > { %3818 = vmatprep.subr.mxu0 %v398_v2  ;;  %4042 = vmatprep.subr.mxu1 %v398_v2  ;;  %v395_v5 = vld [vmem:[%s5937_s2 + $0x60] sm:$0xff]  ;;  %v394_v6 = vld [vmem:[%s5937_s2 + $0x58] sm:$0xff]  ;;  %v393_v7 = vld [vmem:[%s5937_s2 + $0x50] sm:$0xff]  ;;  %vm2134_vm3 = vcmask 1043459   ;;  %vm2136_vm4 = vcmask 1044484   ;;  %vm2138_vm5 = vcmask 1045509  }
  0x61   : > { %3819 = vmatpush3.msra.mxu0 %v398_v2  ;;  %4058 = vmatpush3.msra.mxu1 %v398_v2  ;;  %v392_v8 = vld [vmem:[%s5937_s2 + $0x48] sm:$0xff]  ;;  %v391_v9 = vld [vmem:[%s5937_s2 + $0x40] sm:$0xff]  ;;  %v390_v10 = vld [vmem:[%s5937_s2 + $0x38] sm:$0xff]  ;;  %vm2140_vm6 = vcmask 1046534   ;;  %vm2142_vm7 = vcmask 1047559   ;;  %vm2321_vm8 = vcmask 7168  }
  0x62   : > { %3820 = vmatprep.subr.mxu0 %v397_v3  ;;  %4043 = vmatprep.subr.mxu1 %v397_v3  ;;  %v389_v11 = vld [vmem:[%s5937_s2 + $0x30] sm:$0xff]  ;;  %v388_v12 = vld [vmem:[%s5937_s2 + $0x28] sm:$0xff]  ;;  %v387_v13 = vld [vmem:[%s5937_s2 + $0x20] sm:$0xff]  ;;  %p3668_p7 = scmp.ne.s32.totalorder %s4490_s18, 1 }
  0x63   : > { %3821 = vmatpush3.msra.mxu0 %v397_v3  ;;  %4059 = vmatpush3.msra.mxu1 %v397_v3  ;;  %v386_v14 = vld [vmem:[%s5937_s2 + $0x18] sm:$0xff]  ;;  %v385_v15 = vld [vmem:[%s5937_s2 + $0x10] sm:$0xff]  ;;  %v384_v16 = vld [vmem:[%s5937_s2 + $0x8] sm:$0xff] }
  0x64   : > { %3822 = vmatprep.subr.mxu0 %v396_v4  ;;  %4044 = vmatprep.subr.mxu1 %v396_v4  ;;  %v383_v17 = vld [vmem:[%s5937_s2] sm:$0xff]  ;;  %v255_v18 = vld [vmem:[%s4681_s11] sm:$0xff]  ;;  %v257_v22 = vld [vmem:[%s4681_s11 + $0x10] sm:$0xff] }
  0x65   : > { %3823 = vmatpush3.msra.mxu0 %v396_v4  ;;  %4060 = vmatpush3.msra.mxu1 %v396_v4  ;;  %v319_v19 = vld [vmem:[%s4681_s11 + $0x200] sm:$0xff]  ;;  %v256_v20 = vld [vmem:[%s4681_s11 + $0x8] sm:$0xff]  ;;  %v321_v23 = vld [vmem:[%s4681_s11 + $0x210] sm:$0xff] }
  0x66   : > { %3824 = vmatprep.subr.mxu0 %v395_v5  ;;  %4045 = vmatprep.subr.mxu1 %v395_v5  ;;  %v320_v21 = vld [vmem:[%s4681_s11 + $0x208] sm:$0xff]  ;;  %v258_v24 = vld [vmem:[%s4681_s11 + $0x18] sm:$0xff]  ;;  %v259_v26 = vld [vmem:[%s4681_s11 + $0x20] sm:$0xff] }
  0x67   : > { %3825 = vmatpush3.msra.mxu0 %v395_v5  ;;  %4061 = vmatpush3.msra.mxu1 %v395_v5  ;;  %v322_v25 = vld [vmem:[%s4681_s11 + $0x218] sm:$0xff]  ;;  %v323_v27 = vld [vmem:[%s4681_s11 + $0x220] sm:$0xff]  ;;  %v260_v29 = vld [vmem:[%s4681_s11 + $0x28] sm:$0xff] }
  0x68   : > { %3826 = vmatprep.subr.mxu0 %v394_v6  ;;  %4046 = vmatprep.subr.mxu1 %v394_v6  ;;  %v324_v30 = vld [vmem:[%s4681_s11 + $0x228] sm:$0xff]  ;;  %v261_v31 = vld [vmem:[%s4681_s11 + $0x30] sm:$0xff]  ;;  %v262_v33 = vld [vmem:[%s4681_s11 + $0x38] sm:$0xff] }
  0x69   : > { %3827 = vmatpush3.msra.mxu0 %v394_v6  ;;  %4062 = vmatpush3.msra.mxu1 %v394_v6  ;;  %v325_v32 = vld [vmem:[%s4681_s11 + $0x230] sm:$0xff]  ;;  %v326_v34 = vld [vmem:[%s4681_s11 + $0x238] sm:$0xff]  ;;  %v263_v35 = vld [vmem:[%s4681_s11 + $0x40] sm:$0xff] }
  0x6a   : > { %3828 = vmatprep.subr.mxu0 %v393_v7  ;;  %4047 = vmatprep.subr.mxu1 %v393_v7  ;;  %v327_v36 = vld [vmem:[%s4681_s11 + $0x240] sm:$0xff]  ;;  %v264_v37 = vld [vmem:[%s4681_s11 + $0x48] sm:$0xff]  ;;  %v265_v39 = vld [vmem:[%s4681_s11 + $0x50] sm:$0xff] }
  0x6b   : > { %3829 = vmatpush3.msra.mxu0 %v393_v7  ;;  %4063 = vmatpush3.msra.mxu1 %v393_v7  ;;  %v328_v38 = vld [vmem:[%s4681_s11 + $0x248] sm:$0xff]  ;;  %v329_v40 = vld [vmem:[%s4681_s11 + $0x250] sm:$0xff]  ;;  %v266_v41 = vld [vmem:[%s4681_s11 + $0x58] sm:$0xff] }
  0x6c   : > { %3830 = vmatprep.subr.mxu0 %v392_v8  ;;  %4048 = vmatprep.subr.mxu1 %v392_v8  ;;  %v330_v42 = vld [vmem:[%s4681_s11 + $0x258] sm:$0xff]  ;;  %v267_v43 = vld [vmem:[%s4681_s11 + $0x60] sm:$0xff]  ;;  %v268_v45 = vld [vmem:[%s4681_s11 + $0x68] sm:$0xff] }
  0x6d   : > { %3831 = vmatpush3.msra.mxu0 %v392_v8  ;;  %4064 = vmatpush3.msra.mxu1 %v392_v8  ;;  %v331_v44 = vld [vmem:[%s4681_s11 + $0x260] sm:$0xff]  ;;  %v332_v46 = vld [vmem:[%s4681_s11 + $0x268] sm:$0xff]  ;;  %v269_v47 = vld [vmem:[%s4681_s11 + $0x70] sm:$0xff] }
  0x6e   : > { %3832 = vmatprep.subr.mxu0 %v391_v9  ;;  %4049 = vmatprep.subr.mxu1 %v391_v9  ;;  %v333_v48 = vld [vmem:[%s4681_s11 + $0x270] sm:$0xff]  ;;  %v270_v49 = vld [vmem:[%s4681_s11 + $0x78] sm:$0xff]  ;;  %v271_v51 = vld [vmem:[%s4681_s11 + $0x80] sm:$0xff] }
  0x6f   : > { %3833 = vmatpush3.msra.mxu0 %v391_v9  ;;  %4065 = vmatpush3.msra.mxu1 %v391_v9  ;;  %v334_v50 = vld [vmem:[%s4681_s11 + $0x278] sm:$0xff]  ;;  %v335_v52 = vld [vmem:[%s4681_s11 + $0x280] sm:$0xff]  ;;  %v272_v53 = vld [vmem:[%s4681_s11 + $0x88] sm:$0xff] }
  0x70   : > { %3834 = vmatprep.subr.mxu0 %v390_v10  ;;  %4050 = vmatprep.subr.mxu1 %v390_v10  ;;  %v336_v54 = vld [vmem:[%s4681_s11 + $0x288] sm:$0xff]  ;;  %v273_v55 = vld [vmem:[%s4681_s11 + $0x90] sm:$0xff]  ;;  %v274_v57 = vld [vmem:[%s4681_s11 + $0x98] sm:$0xff] }
  0x71   : > { %3835 = vmatpush3.msra.mxu0 %v390_v10  ;;  %4066 = vmatpush3.msra.mxu1 %v390_v10  ;;  %v337_v56 = vld [vmem:[%s4681_s11 + $0x290] sm:$0xff]  ;;  %v338_v58 = vld [vmem:[%s4681_s11 + $0x298] sm:$0xff]  ;;  %v339_v59 = vld [vmem:[%s4681_s11 + $0x2a0] sm:$0xff] }
  0x72   : > { %3836 = vmatprep.subr.mxu0 %v389_v11  ;;  %4051 = vmatprep.subr.mxu1 %v389_v11  ;;  %v275_v60 = vld [vmem:[%s4681_s11 + $0xa0] sm:$0xff]  ;;  %v340_v61 = vld [vmem:[%s4681_s11 + $0x2a8] sm:$0xff]  ;;  %v277_v63 = vld [vmem:[%s4681_s11 + $0xb0] sm:$0xff] }
  0x73   : > { %3837 = vmatpush3.msra.mxu0 %v389_v11  ;;  %4067 = vmatpush3.msra.mxu1 %v389_v11  ;;  %v276_v62 = vld [vmem:[%s4681_s11 + $0xa8] sm:$0xff]  ;;  %v341_v0 = vld [vmem:[%s4681_s11 + $0x2b0] sm:$0xff]  ;;  %v278_v1 = vld [vmem:[%s4681_s11 + $0xb8] sm:$0xff] }
  0x74   : > { %3838 = vmatprep.subr.mxu0 %v388_v12  ;;  %4052 = vmatprep.subr.mxu1 %v388_v12  ;;  %v342_v2 = vld [vmem:[%s4681_s11 + $0x2b8] sm:$0xff]  ;;  %v279_v3 = vld [vmem:[%s4681_s11 + $0xc0] sm:$0xff]  ;;  %v280_v5 = vld [vmem:[%s4681_s11 + $0xc8] sm:$0xff] }
  0x75   : > { %3839 = vmatpush3.msra.mxu0 %v388_v12  ;;  %4068 = vmatpush3.msra.mxu1 %v388_v12  ;;  %v343_v4 = vld [vmem:[%s4681_s11 + $0x2c0] sm:$0xff]  ;;  %v344_v6 = vld [vmem:[%s4681_s11 + $0x2c8] sm:$0xff]  ;;  %v281_v7 = vld [vmem:[%s4681_s11 + $0xd0] sm:$0xff] }
  0x76   : > { %3840 = vmatprep.subr.mxu0 %v387_v13  ;;  %4053 = vmatprep.subr.mxu1 %v387_v13  ;;  %v345_v8 = vld [vmem:[%s4681_s11 + $0x2d0] sm:$0xff]  ;;  %v282_v9 = vld [vmem:[%s4681_s11 + $0xd8] sm:$0xff]  ;;  %v347_v11 = vld [vmem:[%s4681_s11 + $0x2e0] sm:$0xff] }
  0x77   : > { %3841 = vmatpush3.msra.mxu0 %v387_v13  ;;  %4069 = vmatpush3.msra.mxu1 %v387_v13  ;;  %v346_v10 = vld [vmem:[%s4681_s11 + $0x2d8] sm:$0xff]  ;;  %v283_v12 = vld [vmem:[%s4681_s11 + $0xe0] sm:$0xff]  ;;  %v348_v13 = vld [vmem:[%s4681_s11 + $0x2e8] sm:$0xff] }
  0x78   : > { %3842 = vmatprep.subr.mxu0 %v386_v14  ;;  %4054 = vmatprep.subr.mxu1 %v386_v14 }
  0x79   : > { %3843 = vmatpush3.msra.mxu0 %v386_v14  ;;  %4070 = vmatpush3.msra.mxu1 %v386_v14  ;;  %v284_v14 = vld [vmem:[%s4681_s11 + $0xe8] sm:$0xff] }
  0x7a   : > { %3844 = vmatprep.subr.mxu0 %v385_v15  ;;  %4055 = vmatprep.subr.mxu1 %v385_v15 }
  0x7b   : > { %3845 = vmatpush3.msra.mxu0 %v385_v15  ;;  %4071 = vmatpush3.msra.mxu1 %v385_v15  ;;  %v285_v15 = vld [vmem:[%s4681_s11 + $0xf0] sm:$0xff] }
  0x7c   : > { %3846 = vmatprep.subr.mxu0 %v384_v16  ;;  %4056 = vmatprep.subr.mxu1 %v384_v16 }
  0x7d   : > { %3847 = vmatpush3.msra.mxu0 %v384_v16  ;;  %4072 = vmatpush3.msra.mxu1 %v384_v16  ;;  %v349_v16 = vld [vmem:[%s4681_s11 + $0x2f0] sm:$0xff] }
  0x7e   : > { %3848 = vmatprep.subr.mxu0 %v383_v17  ;;  %4057 = vmatprep.subr.mxu1 %v383_v17 }
  0x7f   : > { %3849 = vmatpush3.msra.mxu0 %v383_v17  ;;  %4073 = vmatpush3.msra.mxu1 %v383_v17  ;;  %v286_v17 = vld [vmem:[%s4681_s11 + $0xf8] sm:$0xff] }
  0x80   : > { %3850 = vmatprep.mubr.f32.mxu0 %v255_v18  ;;  %3946 = vmatprep.mubr.f32.mxu1 %v319_v19  ;;  %v350_v18 = vld [vmem:[%s4681_s11 + $0x2f8] sm:$0xff]  ;;  %v287_v19 = vld [vmem:[%s4681_s11 + $0x100] sm:$0xff] }
  0x81   : > { %3851 = vmatmul.mubr.f32.vlgmr.msra.gmra.mxu0 %v256_v20  ;;  %3947 = vmatmul.mubr.f32.vlgmr.msra.gmra.mxu1 %v320_v21  ;;  %v351_v20 = vld [vmem:[%s4681_s11 + $0x300] sm:$0xff]  ;;  %v288_v21 = vld [vmem:[%s4681_s11 + $0x108] sm:$0xff] }
  0x82   : > { %3853 = vmatprep.mubr.f32.mxu0 %v257_v22  ;;  %3949 = vmatprep.mubr.f32.mxu1 %v321_v23  ;;  %v352_v22 = vld [vmem:[%s4681_s11 + $0x308] sm:$0xff]  ;;  %v289_v23 = vld [vmem:[%s4681_s11 + $0x110] sm:$0xff] }
  0x83   : > { %4190 = vset.pattern.permute.xlu1 %v4515_v28  ;;  %4189 = vset.pattern.permute.xlu0 %v4515_v28  ;;  %v291_v28 = vld [vmem:[%s4681_s11 + $0x120] sm:$0xff] }
  0x85   : > { %3854 = vmatmul.mubr.f32.gmra.mxu0 %v258_v24  ;;  %3950 = vmatmul.mubr.f32.gmra.mxu1 %v322_v25  ;;  %v353_v24 = vld [vmem:[%s4681_s11 + $0x310] sm:$0xff]  ;;  %v290_v25 = vld [vmem:[%s4681_s11 + $0x118] sm:$0xff] }
  0x86   : > { %3856 = vmatprep.mubr.f32.mxu0 %v259_v26  ;;  %3952 = vmatprep.mubr.f32.mxu1 %v323_v27  ;;  %v354_v26 = vld [vmem:[%s4681_s11 + $0x318] sm:$0xff]  ;;  %v355_v27 = vld [vmem:[%s4681_s11 + $0x320] sm:$0xff] }
  0x89   : > { %3857 = vmatmul.mubr.f32.gmra.mxu0 %v260_v29  ;;  %3953 = vmatmul.mubr.f32.gmra.mxu1 %v324_v30  ;;  %v356_v29 = vld [vmem:[%s4681_s11 + $0x328] sm:$0xff] }
  0x8a   : > { %3859 = vmatprep.mubr.f32.mxu0 %v261_v31  ;;  %3955 = vmatprep.mubr.f32.mxu1 %v325_v32  ;;  %v292_v30 = vld [vmem:[%s4681_s11 + $0x128] sm:$0xff]  ;;  %v293_v31 = vld [vmem:[%s4681_s11 + $0x130] sm:$0xff] }
  0x8b   : > { %v357_v32 = vld [vmem:[%s4681_s11 + $0x330] sm:$0xff] }
  0x8d   : > { %3860 = vmatmul.mubr.f32.gmra.mxu0 %v262_v33  ;;  %3956 = vmatmul.mubr.f32.gmra.mxu1 %v326_v34  ;;  %v294_v33 = vld [vmem:[%s4681_s11 + $0x138] sm:$0xff] }
  0x8e   : > { %3862 = vmatprep.mubr.f32.mxu0 %v263_v35  ;;  %3958 = vmatprep.mubr.f32.mxu1 %v327_v36  ;;  %v358_v34 = vld [vmem:[%s4681_s11 + $0x338] sm:$0xff]  ;;  %v295_v35 = vld [vmem:[%s4681_s11 + $0x140] sm:$0xff] }
  0x8f   : > { %v359_v36 = vld [vmem:[%s4681_s11 + $0x340] sm:$0xff] }
  0x91   : > { %3863 = vmatmul.mubr.f32.gmra.mxu0 %v264_v37  ;;  %3959 = vmatmul.mubr.f32.gmra.mxu1 %v328_v38  ;;  %v296_v37 = vld [vmem:[%s4681_s11 + $0x148] sm:$0xff] }
  0x92   : > { %3865 = vmatprep.mubr.f32.mxu0 %v265_v39  ;;  %3961 = vmatprep.mubr.f32.mxu1 %v329_v40  ;;  %v360_v38 = vld [vmem:[%s4681_s11 + $0x348] sm:$0xff]  ;;  %v297_v39 = vld [vmem:[%s4681_s11 + $0x150] sm:$0xff] }
  0x93   : > { %v361_v40 = vld [vmem:[%s4681_s11 + $0x350] sm:$0xff] }
  0x95   : > { %3866 = vmatmul.mubr.f32.gmra.mxu0 %v266_v41  ;;  %3962 = vmatmul.mubr.f32.gmra.mxu1 %v330_v42  ;;  %v298_v41 = vld [vmem:[%s4681_s11 + $0x158] sm:$0xff] }
  0x96   : > { %3868 = vmatprep.mubr.f32.mxu0 %v267_v43  ;;  %3964 = vmatprep.mubr.f32.mxu1 %v331_v44  ;;  %v362_v42 = vld [vmem:[%s4681_s11 + $0x358] sm:$0xff]  ;;  %v363_v43 = vld [vmem:[%s4681_s11 + $0x360] sm:$0xff] }
  0x97   : > { %v299_v44 = vld [vmem:[%s4681_s11 + $0x160] sm:$0xff] }
  0x99   : > { %3869 = vmatmul.mubr.f32.gmra.mxu0 %v268_v45  ;;  %3965 = vmatmul.mubr.f32.gmra.mxu1 %v332_v46  ;;  %v364_v45 = vld [vmem:[%s4681_s11 + $0x368] sm:$0xff] }
  0x9a   : > { %3871 = vmatprep.mubr.f32.mxu0 %v269_v47  ;;  %3967 = vmatprep.mubr.f32.mxu1 %v333_v48  ;;  %v300_v46 = vld [vmem:[%s4681_s11 + $0x168] sm:$0xff]  ;;  %v301_v47 = vld [vmem:[%s4681_s11 + $0x170] sm:$0xff] }
  0x9b   : > { %v365_v48 = vld [vmem:[%s4681_s11 + $0x370] sm:$0xff] }
  0x9d   : > { %3872 = vmatmul.mubr.f32.gmra.mxu0 %v270_v49  ;;  %3968 = vmatmul.mubr.f32.gmra.mxu1 %v334_v50  ;;  %v302_v49 = vld [vmem:[%s4681_s11 + $0x178] sm:$0xff] }
  0x9e   : > { %3874 = vmatprep.mubr.f32.mxu0 %v271_v51  ;;  %3970 = vmatprep.mubr.f32.mxu1 %v335_v52  ;;  %v366_v50 = vld [vmem:[%s4681_s11 + $0x378] sm:$0xff]  ;;  %v303_v51 = vld [vmem:[%s4681_s11 + $0x180] sm:$0xff] }
  0x9f   : > { %v367_v52 = vld [vmem:[%s4681_s11 + $0x380] sm:$0xff] }
  0xa1   : > { %3875 = vmatmul.mubr.f32.gmra.mxu0 %v272_v53  ;;  %3971 = vmatmul.mubr.f32.gmra.mxu1 %v336_v54  ;;  %v304_v53 = vld [vmem:[%s4681_s11 + $0x188] sm:$0xff] }
  0xa2   : > { %3877 = vmatprep.mubr.f32.mxu0 %v273_v55  ;;  %3973 = vmatprep.mubr.f32.mxu1 %v337_v56  ;;  %v368_v54 = vld [vmem:[%s4681_s11 + $0x388] sm:$0xff]  ;;  %v305_v55 = vld [vmem:[%s4681_s11 + $0x190] sm:$0xff] }
  0xa3   : > { %v369_v56 = vld [vmem:[%s4681_s11 + $0x390] sm:$0xff] }
  0xa5   : > { %3878 = vmatmul.mubr.f32.gmra.mxu0 %v274_v57  ;;  %3974 = vmatmul.mubr.f32.gmra.mxu1 %v338_v58  ;;  %v306_v57 = vld [vmem:[%s4681_s11 + $0x198] sm:$0xff] }
  0xa6   : > { %3976 = vmatprep.mubr.f32.mxu1 %v339_v59  ;;  %3880 = vmatprep.mubr.f32.mxu0 %v275_v60  ;;  %v370_v58 = vld [vmem:[%s4681_s11 + $0x398] sm:$0xff]  ;;  %v371_v59 = vld [vmem:[%s4681_s11 + $0x3a0] sm:$0xff] }
  0xa7   : > { %v307_v60 = vld [vmem:[%s4681_s11 + $0x1a0] sm:$0xff] }
  0xa9   : > { %3977 = vmatmul.mubr.f32.gmra.mxu1 %v340_v61  ;;  %3881 = vmatmul.mubr.f32.gmra.mxu0 %v276_v62  ;;  %v372_v61 = vld [vmem:[%s4681_s11 + $0x3a8] sm:$0xff] }
  0xaa   : > { %3883 = vmatprep.mubr.f32.mxu0 %v277_v63  ;;  %3979 = vmatprep.mubr.f32.mxu1 %v341_v0  ;;  %v308_v62 = vld [vmem:[%s4681_s11 + $0x1a8] sm:$0xff]  ;;  %v309_v63 = vld [vmem:[%s4681_s11 + $0x1b0] sm:$0xff] }
  0xab   : > { %v373_v0 = vld [vmem:[%s4681_s11 + $0x3b0] sm:$0xff] }
  0xad   : > { %3884 = vmatmul.mubr.f32.gmra.mxu0 %v278_v1  ;;  %3980 = vmatmul.mubr.f32.gmra.mxu1 %v342_v2  ;;  %v310_v1 = vld [vmem:[%s4681_s11 + $0x1b8] sm:$0xff] }
  0xae   : > { %3886 = vmatprep.mubr.f32.mxu0 %v279_v3  ;;  %3982 = vmatprep.mubr.f32.mxu1 %v343_v4  ;;  %v374_v2 = vld [vmem:[%s4681_s11 + $0x3b8] sm:$0xff]  ;;  %v311_v3 = vld [vmem:[%s4681_s11 + $0x1c0] sm:$0xff] }
  0xaf   : > { %v375_v4 = vld [vmem:[%s4681_s11 + $0x3c0] sm:$0xff] }
  0xb1   : > { %3887 = vmatmul.mubr.f32.gmra.mxu0 %v280_v5  ;;  %3983 = vmatmul.mubr.f32.gmra.mxu1 %v344_v6  ;;  %v312_v5 = vld [vmem:[%s4681_s11 + $0x1c8] sm:$0xff] }
  0xb2   : > { %3889 = vmatprep.mubr.f32.mxu0 %v281_v7  ;;  %3985 = vmatprep.mubr.f32.mxu1 %v345_v8  ;;  %v376_v6 = vld [vmem:[%s4681_s11 + $0x3c8] sm:$0xff]  ;;  %v313_v7 = vld [vmem:[%s4681_s11 + $0x1d0] sm:$0xff] }
  0xb3   : > { %v377_v8 = vld [vmem:[%s4681_s11 + $0x3d0] sm:$0xff] }
  0xb5   : > { %3890 = vmatmul.mubr.f32.gmra.mxu0 %v282_v9  ;;  %3986 = vmatmul.mubr.f32.gmra.mxu1 %v346_v10  ;;  %v314_v9 = vld [vmem:[%s4681_s11 + $0x1d8] sm:$0xff] }
  0xb6   : > { %3988 = vmatprep.mubr.f32.mxu1 %v347_v11  ;;  %3892 = vmatprep.mubr.f32.mxu0 %v283_v12  ;;  %v378_v10 = vld [vmem:[%s4681_s11 + $0x3d8] sm:$0xff]  ;;  %v315_v11 = vld [vmem:[%s4681_s11 + $0x1e0] sm:$0xff] }
  0xb7   : > { %v379_v12 = vld [vmem:[%s4681_s11 + $0x3e0] sm:$0xff] }
  0xb9   : > { %3989 = vmatmul.mubr.f32.gmra.mxu1 %v348_v13  ;;  %3893 = vmatmul.mubr.f32.gmra.mxu0 %v284_v14  ;;  %v316_v13 = vld [vmem:[%s4681_s11 + $0x1e8] sm:$0xff] }
  0xba   : > { %3895 = vmatprep.mubr.f32.mxu0 %v285_v15  ;;  %3991 = vmatprep.mubr.f32.mxu1 %v349_v16  ;;  %v380_v14 = vld [vmem:[%s4681_s11 + $0x3e8] sm:$0xff]  ;;  %v317_v15 = vld [vmem:[%s4681_s11 + $0x1f0] sm:$0xff] }
  0xbb   : > { %v381_v16 = vld [vmem:[%s4681_s11 + $0x3f0] sm:$0xff] }
  0xbd   : > { %3896 = vmatmul.mubr.f32.gmra.mxu0 %v286_v17  ;;  %3992 = vmatmul.mubr.f32.gmra.mxu1 %v350_v18  ;;  %v318_v17 = vld [vmem:[%s4681_s11 + $0x1f8] sm:$0xff] }
  0xbe   : > { %3898 = vmatprep.mubr.f32.mxu0 %v287_v19  ;;  %3994 = vmatprep.mubr.f32.mxu1 %v351_v20  ;;  %v382_v18 = vld [vmem:[%s4681_s11 + $0x3f8] sm:$0xff] }
  0xc1   : > { %3899 = vmatmul.mubr.f32.gmra.mxu0 %v288_v21  ;;  %3995 = vmatmul.mubr.f32.gmra.mxu1 %v352_v22 }
  0xc2   : > { %3901 = vmatprep.mubr.f32.mxu0 %v289_v23  ;;  %3997 = vmatprep.mubr.f32.mxu1 %v353_v24 }
  0xc5   : > { %3902 = vmatmul.mubr.f32.gmra.mxu0 %v290_v25  ;;  %3998 = vmatmul.mubr.f32.gmra.mxu1 %v354_v26 }
  0xc6   : > { %4000 = vmatprep.mubr.f32.mxu1 %v355_v27  ;;  %3904 = vmatprep.mubr.f32.mxu0 %v291_v28 }
  0xc9   : > { %4001 = vmatmul.mubr.f32.gmra.mxu1 %v356_v29  ;;  %3905 = vmatmul.mubr.f32.gmra.mxu0 %v292_v30 }
  0xca   : > { %3907 = vmatprep.mubr.f32.mxu0 %v293_v31  ;;  %4003 = vmatprep.mubr.f32.mxu1 %v357_v32 }
  0xcd   : > { %3908 = vmatmul.mubr.f32.gmra.mxu0 %v294_v33  ;;  %4004 = vmatmul.mubr.f32.gmra.mxu1 %v358_v34 }
  0xce   : > { %3910 = vmatprep.mubr.f32.mxu0 %v295_v35  ;;  %4006 = vmatprep.mubr.f32.mxu1 %v359_v36 }
  0xd1   : > { %3911 = vmatmul.mubr.f32.gmra.mxu0 %v296_v37  ;;  %4007 = vmatmul.mubr.f32.gmra.mxu1 %v360_v38 }
  0xd2   : > { %3913 = vmatprep.mubr.f32.mxu0 %v297_v39  ;;  %4009 = vmatprep.mubr.f32.mxu1 %v361_v40 }
  0xd5   : > { %3914 = vmatmul.mubr.f32.gmra.mxu0 %v298_v41  ;;  %4010 = vmatmul.mubr.f32.gmra.mxu1 %v362_v42 }
  0xd6   : > { %4012 = vmatprep.mubr.f32.mxu1 %v363_v43  ;;  %3916 = vmatprep.mubr.f32.mxu0 %v299_v44 }
  0xd9   : > { %4013 = vmatmul.mubr.f32.gmra.mxu1 %v364_v45  ;;  %3917 = vmatmul.mubr.f32.gmra.mxu0 %v300_v46 }
  0xda   : > { %3919 = vmatprep.mubr.f32.mxu0 %v301_v47  ;;  %4015 = vmatprep.mubr.f32.mxu1 %v365_v48 }
  0xdd   : > { %3920 = vmatmul.mubr.f32.gmra.mxu0 %v302_v49  ;;  %4016 = vmatmul.mubr.f32.gmra.mxu1 %v366_v50 }
  0xde   : > { %3922 = vmatprep.mubr.f32.mxu0 %v303_v51  ;;  %4018 = vmatprep.mubr.f32.mxu1 %v367_v52 }
  0xe1   : > { %3923 = vmatmul.mubr.f32.gmra.mxu0 %v304_v53  ;;  %4019 = vmatmul.mubr.f32.gmra.mxu1 %v368_v54 }
  0xe2   : > { %3925 = vmatprep.mubr.f32.mxu0 %v305_v55  ;;  %4021 = vmatprep.mubr.f32.mxu1 %v369_v56 }
  0xe5   : > { %3926 = vmatmul.mubr.f32.gmra.mxu0 %v306_v57  ;;  %4022 = vmatmul.mubr.f32.gmra.mxu1 %v370_v58 }
  0xe6   : > { %4024 = vmatprep.mubr.f32.mxu1 %v371_v59  ;;  %3928 = vmatprep.mubr.f32.mxu0 %v307_v60 }
  0xe9   : > { %4025 = vmatmul.mubr.f32.gmra.mxu1 %v372_v61  ;;  %3929 = vmatmul.mubr.f32.gmra.mxu0 %v308_v62 }
  0xea   : > { %3931 = vmatprep.mubr.f32.mxu0 %v309_v63  ;;  %4027 = vmatprep.mubr.f32.mxu1 %v373_v0 }
  0xed   : > { %3932 = vmatmul.mubr.f32.gmra.mxu0 %v310_v1  ;;  %4028 = vmatmul.mubr.f32.gmra.mxu1 %v374_v2 }
  0xee   : > { %3934 = vmatprep.mubr.f32.mxu0 %v311_v3  ;;  %4030 = vmatprep.mubr.f32.mxu1 %v375_v4 }
  0xf1   : > { %3935 = vmatmul.mubr.f32.gmra.mxu0 %v312_v5  ;;  %4031 = vmatmul.mubr.f32.gmra.mxu1 %v376_v6 }
  0xf2   : > { %3937 = vmatprep.mubr.f32.mxu0 %v313_v7  ;;  %4033 = vmatprep.mubr.f32.mxu1 %v377_v8 }
  0xf5   : > { %3938 = vmatmul.mubr.f32.gmra.mxu0 %v314_v9  ;;  %4034 = vmatmul.mubr.f32.gmra.mxu1 %v378_v10 }
  0xf6   : > { %3940 = vmatprep.mubr.f32.mxu0 %v315_v11  ;;  %4036 = vmatprep.mubr.f32.mxu1 %v379_v12 }
  0xf9   : > { %3941 = vmatmul.mubr.f32.gmra.mxu0 %v316_v13  ;;  %4037 = vmatmul.mubr.f32.gmra.mxu1 %v380_v14 }
  0xfa   : > { %3943 = vmatprep.mubr.f32.mxu0 %v317_v15  ;;  %4039 = vmatprep.mubr.f32.mxu1 %v381_v16 }
  0xfd   : > { %3944 = vmatmul.mubr.f32.gmra.mxu0 %v318_v17  ;;  %4040 = vmatmul.mubr.f32.gmra.mxu1 %v382_v18 }
 0x141   : > { %v3852_v19 = vpop.f32.mrf.mxu0  ;;  %v3948_v20 = vpop.f32.mrf.mxu1 }
 0x142   : > { %1428 = vperm.xlu1 %4190, %v3948_v20   ;;  %1236 = vperm.xlu0 %4189, %v3852_v19  }
 0x143   : > { %v465_v21 = vpop.f32.mrf.mxu0  ;;  %v785_v22 = vpop.f32.mrf.mxu1 }
 0x145   : > { %v3855_v23 = vpop.f32.mrf.mxu0  ;;  %v3951_v24 = vpop.f32.mrf.mxu1 }
 0x146   : > { %1233 = vperm.xlu0 %4189, %v465_v21   ;;  %1242 = vperm.xlu1 %4190, %v3855_v23  }
 0x147   : > { %v475_v25 = vpop.f32.mrf.mxu0  ;;  %v795_v26 = vpop.f32.mrf.mxu1 }
 0x149   : > { %v3858_v27 = vpop.f32.mrf.mxu0  ;;  %v3954_v29 = vpop.f32.mrf.mxu1 }
 0x14a   : > { %1425 = vperm.xlu0 %4189, %v785_v22   ;;  %1434 = vperm.xlu1 %4190, %v3951_v24  }
 0x14b   : > { %v485_v28 = vpop.f32.mrf.mxu0  ;;  %v805_v30 = vpop.f32.mrf.mxu1 }
 0x14d   : > { %v3861_v31 = vpop.f32.mrf.mxu0  ;;  %v3957_v33 = vpop.f32.mrf.mxu1 }
 0x14e   : > { %1431 = vperm.xlu0 %4189, %v795_v26   ;;  %1239 = vperm.xlu1 %4190, %v475_v25  }
 0x14f   : > { %v495_v32 = vpop.f32.mrf.mxu0  ;;  %v815_v34 = vpop.f32.mrf.mxu1 }
 0x151   : > { %v3864_v35 = vpop.f32.mrf.mxu0  ;;  %v3960_v37 = vpop.f32.mrf.mxu1 }
 0x152   : > { %1248 = vperm.xlu1 %4190, %v3858_v27   ;;  %1245 = vperm.xlu0 %4189, %v485_v28  }
 0x153   : > { %v505_v36 = vpop.f32.mrf.mxu0  ;;  %v825_v38 = vpop.f32.mrf.mxu1 }
 0x155   : > { %v3867_v39 = vpop.f32.mrf.mxu0  ;;  %v3963_v41 = vpop.f32.mrf.mxu1 }
 0x156   : > { %1440 = vperm.xlu1 %4190, %v3954_v29   ;;  %1437 = vperm.xlu0 %4189, %v805_v30  }
 0x157   : > { %v515_v40 = vpop.f32.mrf.mxu0  ;;  %v835_v42 = vpop.f32.mrf.mxu1 }
 0x159   : > { %v3870_v43 = vpop.f32.mrf.mxu0  ;;  %v3966_v45 = vpop.f32.mrf.mxu1 }
 0x15a   : > { %1254 = vperm.xlu1 %4190, %v3861_v31   ;;  %1251 = vperm.xlu0 %4189, %v495_v32  }
 0x15b   : > { %v525_v44 = vpop.f32.mrf.mxu0  ;;  %v845_v46 = vpop.f32.mrf.mxu1 }
 0x15d   : > { %v3873_v47 = vpop.f32.mrf.mxu0  ;;  %v3969_v49 = vpop.f32.mrf.mxu1 }
 0x15e   : > { %1446 = vperm.xlu1 %4190, %v3957_v33   ;;  %1443 = vperm.xlu0 %4189, %v815_v34  }
 0x15f   : > { %v535_v48 = vpop.f32.mrf.mxu0  ;;  %v855_v50 = vpop.f32.mrf.mxu1 }
 0x161   : > { %v3876_v51 = vpop.f32.mrf.mxu0  ;;  %v3972_v53 = vpop.f32.mrf.mxu1 }
 0x162   : > { %1260 = vperm.xlu1 %4190, %v3864_v35   ;;  %1257 = vperm.xlu0 %4189, %v505_v36  }
 0x163   : > { %v545_v52 = vpop.f32.mrf.mxu0  ;;  %v865_v54 = vpop.f32.mrf.mxu1 }
 0x165   : > { %v3879_v55 = vpop.f32.mrf.mxu0  ;;  %v3975_v57 = vpop.f32.mrf.mxu1 }
 0x166   : > { %1452 = vperm.xlu1 %4190, %v3960_v37   ;;  %1449 = vperm.xlu0 %4189, %v825_v38  }
 0x167   : > { %v555_v56 = vpop.f32.mrf.mxu0  ;;  %v875_v59 = vpop.f32.mrf.mxu1 }
 0x169   : > { %v3882_v58 = vpop.f32.mrf.mxu0  ;;  %v3978_v61 = vpop.f32.mrf.mxu1 }
 0x16a   : > { %1266 = vperm.xlu1 %4190, %v3867_v39   ;;  %1263 = vperm.xlu0 %4189, %v515_v40  }
 0x16b   : > { %v565_v60 = vpop.f32.mrf.mxu0  ;;  %v885_v63 = vpop.f32.mrf.mxu1 }
 0x16d   : > { %v3885_v62 = vpop.f32.mrf.mxu0  ;;  %v3981_v0 = vpop.f32.mrf.mxu1 }
 0x16e   : > { %1458 = vperm.xlu1 %4190, %v3963_v41   ;;  %1455 = vperm.xlu0 %4189, %v835_v42  }
 0x16f   : > { %v575_v1 = vpop.f32.mrf.mxu0  ;;  %v895_v3 = vpop.f32.mrf.mxu1 }
 0x171   : > { %v3888_v2 = vpop.f32.mrf.mxu0  ;;  %v3984_v4 = vpop.f32.mrf.mxu1 }
 0x172   : > { %1272 = vperm.xlu1 %4190, %v3870_v43   ;;  %1269 = vperm.xlu0 %4189, %v525_v44  }
 0x173   : > { %v585_v5 = vpop.f32.mrf.mxu0  ;;  %v905_v7 = vpop.f32.mrf.mxu1 }
 0x175   : > { %v3891_v6 = vpop.f32.mrf.mxu0  ;;  %v3987_v8 = vpop.f32.mrf.mxu1 }
 0x176   : > { %1464 = vperm.xlu1 %4190, %v3966_v45   ;;  %1461 = vperm.xlu0 %4189, %v845_v46  }
 0x177   : > { %v595_v9 = vpop.f32.mrf.mxu0  ;;  %v915_v10 = vpop.f32.mrf.mxu1 }
 0x179   : > { %v3894_v11 = vpop.f32.mrf.mxu0  ;;  %v3990_v12 = vpop.f32.mrf.mxu1 }
 0x17a   : > { %1278 = vperm.xlu1 %4190, %v3873_v47   ;;  %1275 = vperm.xlu0 %4189, %v535_v48  }
 0x17b   : > { %v605_v13 = vpop.f32.mrf.mxu0  ;;  %v925_v14 = vpop.f32.mrf.mxu1 }
 0x17d   : > { %v3897_v15 = vpop.f32.mrf.mxu0  ;;  %v3993_v16 = vpop.f32.mrf.mxu1 }
 0x17e   : > { %1470 = vperm.xlu1 %4190, %v3969_v49   ;;  %1467 = vperm.xlu0 %4189, %v855_v50  }
 0x17f   : > { %v615_v17 = vpop.f32.mrf.mxu0  ;;  %v935_v18 = vpop.f32.mrf.mxu1 }
 0x181   : > { %v3900_v19 = vpop.f32.mrf.mxu0  ;;  %v3996_v23 = vpop.f32.mrf.mxu1 }
 0x182   : > { %1284 = vperm.xlu1 %4190, %v3876_v51   ;;  %1281 = vperm.xlu0 %4189, %v545_v52  }
 0x183   : > { %v625_v22 = vpop.f32.mrf.mxu0  ;;  %v945_v26 = vpop.f32.mrf.mxu1 }
 0x185   : > { %v3903_v27 = vpop.f32.mrf.mxu0  ;;  %v3999_v31 = vpop.f32.mrf.mxu1 }
 0x186   : > { %1476 = vperm.xlu1 %4190, %v3972_v53   ;;  %1473 = vperm.xlu0 %4189, %v865_v54  }
 0x187   : > { %v635_v30 = vpop.f32.mrf.mxu0  ;;  %v955_v34 = vpop.f32.mrf.mxu1 }
 0x189   : > { %v3906_v35 = vpop.f32.mrf.mxu0  ;;  %v4002_v38 = vpop.f32.mrf.mxu1 }
 0x18a   : > { %1290 = vperm.xlu1 %4190, %v3879_v55   ;;  %1287 = vperm.xlu0 %4189, %v555_v56  }
 0x18b   : > { %v645_v39 = vpop.f32.mrf.mxu0  ;;  %v965_v42 = vpop.f32.mrf.mxu1 }
 0x18d   : > { %v3909_v43 = vpop.f32.mrf.mxu0  ;;  %v4005_v47 = vpop.f32.mrf.mxu1 }
 0x18e   : > { %1482 = vperm.xlu1 %4190, %v3975_v57   ;;  %1479 = vperm.xlu0 %4189, %v875_v59  }
 0x18f   : > { %v655_v46 = vpop.f32.mrf.mxu0  ;;  %v975_v50 = vpop.f32.mrf.mxu1 }
 0x191   : > { %v3912_v51 = vpop.f32.mrf.mxu0  ;;  %v4008_v55 = vpop.f32.mrf.mxu1 }
 0x192   : > { %1488 = vperm.xlu0 %4189, %v3978_v61   ;;  %1296 = vperm.xlu1 %4190, %v3882_v58  }
 0x193   : > { %v665_v54 = vpop.f32.mrf.mxu0  ;;  %v985_v58 = vpop.f32.mrf.mxu1 }
 0x195   : > { %v3915_v59 = vpop.f32.mrf.mxu0 }
 0x196   : > { %1293 = vperm.xlu0 %4189, %v565_v60   ;;  %1302 = vperm.xlu1 %4190, %v3885_v62  }
 0x197   : > { %v675_v62 = vpop.f32.mrf.mxu0 }
 0x19a   : > { %1485 = vperm.xlu0 %4189, %v885_v63   ;;  %1494 = vperm.xlu1 %4190, %v3981_v0   ;;  %v4011_v63 = vpop.f32.mrf.mxu1 }
 0x19e   : > { %1299 = vperm.xlu0 %4189, %v575_v1   ;;  %1308 = vperm.xlu1 %4190, %v3888_v2   ;;  %v995_v2 = vpop.f32.mrf.mxu1 }
 0x1a2   : > { %1491 = vperm.xlu0 %4189, %v895_v3   ;;  %1500 = vperm.xlu1 %4190, %v3984_v4   ;;  %v3918_v3 = vpop.f32.mrf.mxu0 }
 0x1a6   : > { %1305 = vperm.xlu0 %4189, %v585_v5   ;;  %1314 = vperm.xlu1 %4190, %v3891_v6   ;;  %v4014_v6 = vpop.f32.mrf.mxu1 }
 0x1aa   : > { %1497 = vperm.xlu0 %4189, %v905_v7   ;;  %1506 = vperm.xlu1 %4190, %v3987_v8   ;;  %v685_v7 = vpop.f32.mrf.mxu0 }
 0x1ae   : > { %1503 = vperm.xlu1 %4190, %v915_v10   ;;  %1311 = vperm.xlu0 %4189, %v595_v9   ;;  %v1005_v10 = vpop.f32.mrf.mxu1 }
 0x1b2   : > { %1512 = vperm.xlu0 %4189, %v3990_v12   ;;  %1320 = vperm.xlu1 %4190, %v3894_v11   ;;  %v3921_v11 = vpop.f32.mrf.mxu0 }
 0x1b6   : > { %1509 = vperm.xlu1 %4190, %v925_v14   ;;  %1317 = vperm.xlu0 %4189, %v605_v13   ;;  %v695_v14 = vpop.f32.mrf.mxu0 }
 0x1ba   : > { %1326 = vperm.xlu1 %4190, %v3897_v15   ;;  %1323 = vperm.xlu0 %4189, %v615_v17   ;;  %v4017_v15 = vpop.f32.mrf.mxu1 }
 0x1bd   : > { %v4876_v20 = vpop.permute.xlu1 %1428  ;;  %v4878_v21 = vpop.permute.xlu0 %1236 }
 0x1be   : > { %1518 = vperm.xlu1 %4190, %v3993_v16   ;;  %1515 = vperm.xlu0 %4189, %v935_v18   ;;  %v3924_v18 = vpop.f32.mrf.mxu0 }
 0x1c1   : > { %v4880_v24 = vpop.permute.xlu0 %1233  ;;  %v4882_v25 = vpop.permute.xlu1 %1242 }
 0x1c2   : > { %1332 = vperm.xlu1 %4190, %v3900_v19   ;;  %1329 = vperm.xlu0 %4189, %v625_v22   ;;  %v1015_v19 = vpop.f32.mrf.mxu1  ;;  %v1616_v22 = vlaneseq }
 0x1c5   : > { %v4884_v28 = vpop.permute.xlu0 %1425  ;;  %v4886_v29 = vpop.permute.xlu1 %1434 }
 0x1c6   : > { %1524 = vperm.xlu1 %4190, %v3996_v23   ;;  %1521 = vperm.xlu0 %4189, %v945_v26  }
 0x1c9   : > { %v4888_v32 = vpop.permute.xlu0 %1431  ;;  %v4890_v33 = vpop.permute.xlu1 %1239 }
 0x1ca   : > { %1338 = vperm.xlu1 %4190, %v3903_v27   ;;  %1335 = vperm.xlu0 %4189, %v635_v30   ;;  %v705_v27 = vpop.f32.mrf.mxu0  ;;  %v4020_v30 = vpop.f32.mrf.mxu1 }
 0x1cd   : > { %v4892_v36 = vpop.permute.xlu1 %1248  ;;  %v4894_v37 = vpop.permute.xlu0 %1245 }
 0x1ce   : > { %1530 = vperm.xlu1 %4190, %v3999_v31   ;;  %1527 = vperm.xlu0 %4189, %v955_v34   ;;  %v3927_v31 = vpop.f32.mrf.mxu0  ;;  %v1617_v34 = vand.u32 127, %v1616_v22 }
 0x1d1   : > { %v4896_v40 = vpop.permute.xlu1 %1440  ;;  %v4898_v41 = vpop.permute.xlu0 %1437 }
 0x1d2   : > { %1536 = vperm.xlu0 %4189, %v4002_v38   ;;  %1344 = vperm.xlu1 %4190, %v3906_v35   ;;  %v4940_v35 = vshrl.u32 %v1616_v22, 7 }
 0x1d4   : > { %5965 = vst [vmem:[#allocation22_spill] sm:$0xff] %v4940_v35 }
 0x1d5   : > { %v4900_v44 = vpop.permute.xlu1 %1254  ;;  %v4902_v45 = vpop.permute.xlu0 %1251 }
 0x1d6   : > { %1533 = vperm.xlu1 %4190, %v965_v42   ;;  %1341 = vperm.xlu0 %4189, %v645_v39   ;;  %v1025_v42 = vpop.f32.mrf.mxu1 }
 0x1d9   : > { %v4904_v48 = vpop.permute.xlu1 %1446  ;;  %v4906_v49 = vpop.permute.xlu0 %1443 }
 0x1da   : > { %1350 = vperm.xlu1 %4190, %v3909_v43   ;;  %1347 = vperm.xlu0 %4189, %v655_v46   ;;  %v715_v43 = vpop.f32.mrf.mxu0  ;;  %v4943_v46 = vsub.s32 %v1617_v34, %v4940_v35 }
 0x1dd   : > { %v4908_v52 = vpop.permute.xlu1 %1260  ;;  %v4910_v53 = vpop.permute.xlu0 %1257 }
 0x1de   : > { %1542 = vperm.xlu1 %4190, %v4005_v47   ;;  %1539 = vperm.xlu0 %4189, %v975_v50  }
 0x1e1   : > { %v4912_v56 = vpop.permute.xlu1 %1452  ;;  %v4914_v57 = vpop.permute.xlu0 %1449 }
 0x1e2   : > { %1356 = vperm.xlu1 %4190, %v3912_v51   ;;  %1353 = vperm.xlu0 %4189, %v665_v54   ;;  %v3930_v51 = vpop.f32.mrf.mxu0 }
 0x1e5   : > { %v4916_v60 = vpop.permute.xlu1 %1266  ;;  %v4918_v61 = vpop.permute.xlu0 %1263 }
 0x1e6   : > { %1548 = vperm.xlu1 %4190, %v4008_v55   ;;  %1545 = vperm.xlu0 %4189, %v985_v58   ;;  %v4023_v58 = vpop.f32.mrf.mxu1 }
 0x1e9   : > { %v4920_v0 = vpop.permute.xlu1 %1458  ;;  %v4922_v1 = vpop.permute.xlu0 %1455 }
 0x1ea   : > { %1362 = vperm.xlu1 %4190, %v3915_v59   ;;  %1359 = vperm.xlu0 %4189, %v675_v62  }
 0x1ed   : > { %v4924_v4 = vpop.permute.xlu1 %1272  ;;  %v4926_v5 = vpop.permute.xlu0 %1269 }
 0x1ee   : > { %1554 = vperm.xlu1 %4190, %v4011_v63   ;;  %1551 = vperm.xlu0 %4189, %v995_v2  }
 0x1f1   : > { %v4928_v8 = vpop.permute.xlu1 %1464  ;;  %v4930_v9 = vpop.permute.xlu0 %1461 }
 0x1f2   : > { %1560 = vperm.xlu0 %4189, %v4014_v6   ;;  %1368 = vperm.xlu1 %4190, %v3918_v3   ;;  %v725_v3 = vpop.f32.mrf.mxu0 }
 0x1f5   : > { %v4932_v12 = vpop.permute.xlu1 %1278  ;;  %v4934_v13 = vpop.permute.xlu0 %1275 }
 0x1f6   : > { %1557 = vperm.xlu1 %4190, %v1005_v10   ;;  %1365 = vperm.xlu0 %4189, %v685_v7  }
 0x1f9   : > { %v4936_v16 = vpop.permute.xlu1 %1470  ;;  %v4938_v17 = vpop.permute.xlu0 %1467 }
 0x1fa   : > { %1374 = vperm.xlu1 %4190, %v3921_v11   ;;  %1371 = vperm.xlu0 %4189, %v695_v14  }
 0x1fd   : > { %v1285_v23 = vpop.permute.xlu1 %1284  ;;  %v1282_v26 = vpop.permute.xlu0 %1281 }
 0x1fe   : > { %1566 = vperm.xlu1 %4190, %v4017_v15   ;;  %1563 = vperm.xlu0 %4189, %v1015_v19   ;;  %v1689_v6 = vrot.slane %v1285_v23, %v4943_v46  ;;  %v1685_v7 = vrot.slane %v1282_v26, %v4943_v46  ;;  %v1035_v15 = vpop.f32.mrf.mxu1 }
 0x200   : > { %v2151_v23 = vsel %vm2130_vm1, %v1689_v6, %v1685_v7 }
 0x201   : > { %v1477_v38 = vpop.permute.xlu1 %1476  ;;  %v1474_v39 = vpop.permute.xlu0 %1473 }
 0x202   : > { %1380 = vperm.xlu1 %4190, %v3924_v18   ;;  %1377 = vperm.xlu0 %4189, %v705_v27   ;;  %v1945_v54 = vrot.slane %v1477_v38, %v4943_v46  ;;  %v1941_v55 = vrot.slane %v1474_v39, %v4943_v46  ;;  %v4026_v27 = vpop.f32.mrf.mxu1 }
 0x204   : > { %v2207_v10 = vsel %vm2130_vm1, %v1945_v54, %v1941_v55  ;;  %v1045_v39 = vpop.f32.mrf.mxu1 }
 0x205   : > { %v1291_v47 = vpop.permute.xlu1 %1290  ;;  %v1288_v50 = vpop.permute.xlu0 %1287 }
 0x206   : > { %1572 = vperm.xlu1 %4190, %v4020_v30   ;;  %1569 = vperm.xlu0 %4189, %v1025_v42   ;;  %v1693_v11 = vrot.slane %v1288_v50, %v4943_v46  ;;  %v3933_v30 = vpop.f32.mrf.mxu0  ;;  %v1697_v26 = vrot.slane %v1291_v47, %v4943_v46 }
 0x209   : > { %v1483_v59 = vpop.permute.xlu1 %1482  ;;  %v1480_v62 = vpop.permute.xlu0 %1479 }
 0x20a   : > { %v1953_v63 = vrot.slane %v1483_v59, %v4943_v46  ;;  %v1949_v2 = vrot.slane %v1480_v62, %v4943_v46  ;;  %1386 = vperm.xlu1 %4190, %v3927_v31   ;;  %1383 = vperm.xlu0 %4189, %v715_v43   ;;  %v2152_v31 = vsel %vm2132_vm2, %v1693_v11, %v2151_v23  ;;  %v735_v43 = vpop.f32.mrf.mxu0 }
 0x20b   : > { %v2153_v54 = vsel %vm2134_vm3, %v1697_v26, %v2152_v31 }
 0x20c   : > { %v2208_v14 = vsel %vm2132_vm2, %v1949_v2, %v2207_v10 }
 0x20d   : > { %v1489_v18 = vpop.permute.xlu0 %1488  ;;  %v1297_v19 = vpop.permute.xlu1 %1296  ;;  %v2209_v22 = vsel %vm2134_vm3, %v1953_v63, %v2208_v14 }
 0x20e   : > { %1578 = vperm.xlu1 %4190, %v4023_v58   ;;  %1575 = vperm.xlu0 %4189, %v1035_v15   ;;  %v1705_v50 = vrot.slane %v1297_v19, %v4943_v46  ;;  %v4962_v58 = vpop.f32.mrf.mxu1  ;;  %v3936_v63 = vpop.f32.mrf.mxu0  ;;  %v1961_v23 = vrot.slane %v1489_v18, %v4943_v46 }
 0x210   : > { %v1055_v2 = vpop.f32.mrf.mxu1  ;;  %v745_v11 = vpop.f32.mrf.mxu0 }
 0x211   : > { %v1294_v34 = vpop.permute.xlu0 %1293  ;;  %v1303_v38 = vpop.permute.xlu1 %1302 }
 0x212   : > { %v1701_v42 = vrot.slane %v1294_v34, %v4943_v46  ;;  %1584 = vperm.xlu0 %4189, %v4026_v27   ;;  %1392 = vperm.xlu1 %4190, %v3930_v51   ;;  %v1713_v14 = vrot.slane %v1303_v38, %v4943_v46  ;;  %v4032_v19 = vpop.f32.mrf.mxu1  ;;  %v3939_v27 = vpop.f32.mrf.mxu0 }
 0x214   : > { %v2154_v55 = vsel %vm2136_vm4, %v1701_v42, %v2153_v54  ;;  %v755_v42 = vpop.f32.mrf.mxu0 }
 0x215   : > { %v1486_v47 = vpop.permute.xlu0 %1485  ;;  %v1495_v59 = vpop.permute.xlu1 %1494  ;;  %v2155_v62 = vsel %vm2138_vm5, %v1705_v50, %v2154_v55 }
 0x216   : > { %1581 = vperm.xlu1 %4190, %v1045_v39   ;;  %1389 = vperm.xlu0 %4189, %v725_v3   ;;  %v1957_v51 = vrot.slane %v1486_v47, %v4943_v46  ;;  %v1969_v38 = vrot.slane %v1495_v59, %v4943_v46  ;;  %v1065_v39 = vpop.f32.mrf.mxu1  ;;  %v3942_v55 = vpop.f32.mrf.mxu0 }
 0x218   : > { %v2210_v15 = vsel %vm2136_vm4, %v1957_v51, %v2209_v22  ;;  %v4035_v47 = vpop.f32.mrf.mxu1  ;;  %v765_v51 = vpop.f32.mrf.mxu0 }
 0x219   : > { %v1300_v6 = vpop.permute.xlu0 %1299  ;;  %v4966_v7 = vpop.permute.xlu1 %1308  ;;  %v2211_v22 = vsel %vm2138_vm5, %v1961_v23, %v2210_v15 }
 0x21a   : > { %v1709_v10 = vrot.slane %v1300_v6, %v4943_v46  ;;  %1398 = vperm.xlu1 %4190, %v3933_v30   ;;  %1395 = vperm.xlu0 %4189, %v735_v43   ;;  %v1075_v6 = vpop.f32.mrf.mxu1  ;;  %v3945_v23 = vpop.f32.mrf.mxu0 }
 0x21c   : > { %v2156_v3 = vsel %vm2140_vm6, %v1709_v10, %v2155_v62 }
 0x21d   : > { %v1492_v26 = vpop.permute.xlu0 %1491  ;;  %v1501_v31 = vpop.permute.xlu1 %1500  ;;  %v4974_v34 = vsel %vm2142_vm7, %v1713_v14, %v2156_v3 }
 0x21e   : > { %v1965_v30 = vrot.slane %v1492_v26, %v4943_v46  ;;  %1404 = vperm.xlu1 %4190, %v3936_v63   ;;  %1401 = vperm.xlu0 %4189, %v745_v11   ;;  %v1977_v10 = vrot.slane %v1501_v31, %v4943_v46  ;;  %v4038_v31 = vpop.f32.mrf.mxu1 }
 0x220   : > { %v2212_v43 = vsel %vm2140_vm6, %v1965_v30, %v2211_v22 }
 0x221   : > { %v4980_v50 = vpop.permute.xlu0 %1305  ;;  %v4982_v18 = vpop.permute.xlu1 %1314  ;;  %v4985_v54 = vsel %vm2142_vm7, %v1969_v38, %v2212_v43 }
 0x222   : > { %1596 = vperm.xlu1 %4190, %v4032_v19   ;;  %1593 = vperm.xlu0 %4189, %v1065_v39   ;;  %v1085_v43 = vpop.f32.mrf.mxu1 }
 0x225   : > { %v1498_v62 = vpop.permute.xlu0 %1497  ;;  %v1507_v63 = vpop.permute.xlu1 %1506 }
 0x226   : > { %1410 = vperm.xlu1 %4190, %v3939_v27   ;;  %1407 = vperm.xlu0 %4189, %v755_v42   ;;  %v1973_v59 = vrot.slane %v1498_v62, %v4943_v46  ;;  %v1985_v3 = vrot.slane %v1507_v63, %v4943_v46 }
 0x228   : > { %v2214_v19 = vsel %vm2130_vm1, %v1977_v10, %v1973_v59  ;;  %v4041_v59 = vpop.f32.mrf.mxu1 }
 0x229   : > { %v1504_v11 = vpop.permute.xlu1 %1503  ;;  %v4989_v14 = vpop.permute.xlu0 %1311 }
 0x22a   : > { %v1981_v15 = vrot.slane %v1504_v11, %v4943_v46  ;;  %1599 = vperm.xlu0 %4189, %v1075_v6   ;;  %1416 = vperm.xlu1 %4190, %v3942_v55  }
 0x22c   : > { %v2215_v27 = vsel %vm2132_vm2, %v1981_v15, %v2214_v19  ;;  %v1095_v19 = vpop.f32.mrf.mxu1 }
 0x22d   : > { %v1513_v26 = vpop.permute.xlu0 %1512  ;;  %v4995_v30 = vpop.permute.xlu1 %1320  ;;  %v2216_v38 = vsel %vm2134_vm3, %v1985_v3, %v2215_v27 }
 0x22e   : > { %1413 = vperm.xlu0 %4189, %v765_v51   ;;  %1422 = vperm.xlu1 %4190, %v3945_v23   ;;  %v775_v51 = vpop.f32.mrf.mxu0  ;;  %v1993_v6 = vrot.slane %v1513_v26, %v4943_v46 }
 0x231   : > { %v1510_v22 = vpop.permute.xlu1 %1509  ;;  %v4998_v39 = vpop.permute.xlu0 %1317 }
 0x232   : > { %v1989_v42 = vrot.slane %v1510_v22, %v4943_v46  ;;  %1587 = vperm.xlu0 %4189, %v1055_v2   ;;  %1602 = vperm.xlu1 %4190, %v4035_v47  }
 0x234   : > { %v2217_v55 = vsel %vm2136_vm4, %v1989_v42, %v2216_v38 }
 0x235   : > { %v5002_v62 = vpop.permute.xlu1 %1326  ;;  %v5004_v63 = vpop.permute.xlu0 %1323  ;;  %v2218_v47 = vsel %vm2138_vm5, %v1993_v6, %v2217_v55  ;;  %v1621_v55 = vrot.slane %v4880_v24, %v4943_v46 }
 0x236   : > { %1590 = vperm.xlu0 %4189, %v4962_v58   ;;  %1605 = vperm.xlu1 %4190, %v1085_v43  }
 0x239   : > { %v1519_v10 = vpop.permute.xlu1 %1518  ;;  %v1516_v11 = vpop.permute.xlu0 %1515 }
 0x23a   : > { %v2001_v15 = vrot.slane %v1519_v10, %v4943_v46  ;;  %v1997_v2 = vrot.slane %v1516_v11, %v4943_v46  ;;  %1608 = vperm.xlu1 %4190, %v4038_v31   ;;  %1419 = vperm.xlu0 %4189, %v775_v51   ;;  %v1629_v51 = vrot.slane %v4890_v33, %v4943_v46 }
 0x23b   : > { %v1637_v33 = vrot.slane %v4894_v37, %v4943_v46 }
 0x23c   : > { %v2219_v3 = vsel %vm2140_vm6, %v1997_v2, %v2218_v47  ;;  %v1653_v2 = vrot.slane %v4910_v53, %v4943_v46  ;;  %v1633_v47 = vrot.slane %v4882_v25, %v4943_v46 }
 0x23d   : > { %v5012_v23 = vpop.permute.xlu1 %1332  ;;  %v5014_v58 = vpop.permute.xlu0 %1329  ;;  %v5017_v27 = vsel %vm2142_vm7, %v2001_v15, %v2219_v3  ;;  %v1657_v15 = vrot.slane %v4908_v52, %v4943_v46  ;;  %v1641_v52 = vrot.slane %v4892_v36, %v4943_v46  ;;  %v1649_v36 = vrot.slane %v4900_v44, %v4943_v46 }
 0x23e   : > { %1614 = vperm.xlu1 %4190, %v4041_v59   ;;  %1611 = vperm.xlu0 %4189, %v1095_v19   ;;  %v1625_v59 = vrot.slane %v4878_v21, %v4943_v46  ;;  %v1661_v21 = vrot.slane %v4918_v61, %v4943_v46  ;;  %v1645_v61 = vrot.slane %v4902_v45, %v4943_v46 }
 0x23f   : > { %v2144_v53 = vsel %vm2130_vm1, %v1657_v15, %v1653_v2  ;;  %v1673_v15 = vrot.slane %v4924_v4, %v4943_v46  ;;  %v1717_v45 = vrot.slane %v4980_v50, %v4943_v46  ;;  %v1725_v44 = vrot.slane %v4989_v14, %v4943_v46 }
 0x240   : > { %v2131_v11 = vsel %vm2130_vm1, %v1625_v59, %v1621_v55  ;;  %v2145_v25 = vsel %vm2132_vm2, %v1661_v21, %v2144_v53  ;;  %v1669_v59 = vrot.slane %v4926_v5, %v4943_v46  ;;  %v1677_v5 = vrot.slane %v4934_v13, %v4943_v46 }
 0x241   : > { %v5019_v26 = vpop.permute.xlu1 %1524  ;;  %v5021_v38 = vpop.permute.xlu0 %1521  ;;  %v2133_v24 = vsel %vm2132_vm2, %v1629_v51, %v2131_v11  ;;  %v1665_v51 = vrot.slane %v4916_v60, %v4943_v46  ;;  %v1721_v4 = vrot.slane %v4966_v7, %v4943_v46  ;;  %v1681_v50 = vrot.slane %v4932_v12, %v4943_v46 }
 0x242   : > { %v2135_v55 = vsel %vm2134_vm3, %v1633_v47, %v2133_v24  ;;  %v1753_v13 = vrot.slane %v5012_v23, %v4943_v46  ;;  %v1749_v14 = vrot.slane %v5014_v58, %v4943_v46  ;;  %v1729_v12 = vrot.slane %v4982_v18, %v4943_v46 }
 0x243   : > { %v2137_v37 = vsel %vm2136_vm4, %v1637_v33, %v2135_v55  ;;  %v2146_v60 = vsel %vm2134_vm3, %v1665_v51, %v2145_v25  ;;  %v2158_v53 = vsel %vm2130_vm1, %v1721_v4, %v1717_v45  ;;  %v1733_v51 = vrot.slane %v4998_v39, %v4943_v46 }
 0x244   : > { %v2139_v2 = vsel %vm2138_vm5, %v1641_v52, %v2137_v37  ;;  %v2147_v24 = vsel %vm2136_vm4, %v1669_v59, %v2146_v60  ;;  %v2159_v7 = vsel %vm2132_vm2, %v1725_v44, %v2158_v53 }
 0x245   : > { %v5023_v31 = vpop.permute.xlu1 %1338  ;;  %v1336_v22 = vpop.permute.xlu0 %1335  ;;  %v2141_v33 = vsel %vm2140_vm6, %v1645_v61, %v2139_v2  ;;  %v2148_v55 = vsel %vm2138_vm5, %v1673_v15, %v2147_v24  ;;  %v2160_v23 = vsel %vm2134_vm3, %v1729_v12, %v2159_v7  ;;  %v1737_v2 = vrot.slane %v4995_v30, %v4943_v46 }
 0x246   : > { %v2143_v52 = vsel %vm2142_vm7, %v1649_v36, %v2141_v33  ;;  %v1757_v37 = vrot.slane %v1336_v22, %v4943_v46  ;;  %v2149_v61 = vsel %vm2140_vm6, %v1677_v5, %v2148_v55  ;;  %v2165_v36 = vsel %vm2130_vm1, %v1753_v13, %v1749_v14 }
 0x247   : > { %v1761_v58 = vrot.slane %v5023_v31, %v4943_v46  ;;  %v2150_v15 = vsel %vm2142_vm7, %v1681_v50, %v2149_v61  ;;  %v2161_v39 = vsel %vm2136_vm4, %v1733_v51, %v2160_v23  ;;  %v1741_v22 = vrot.slane %v5004_v63, %v4943_v46 }
 0x248   : > { %v2166_v60 = vsel %vm2132_vm2, %v1757_v37, %v2165_v36  ;;  %v1745_v31 = vrot.slane %v5002_v62, %v4943_v46  ;;  %v2162_v5 = vsel %vm2138_vm5, %v1737_v2, %v2161_v39 }
 0x249   : > { %v5025_v42 = vpop.permute.xlu1 %1530  ;;  %v5027_v43 = vpop.permute.xlu0 %1527  ;;  %v2167_v33 = vsel %vm2134_vm3, %v1761_v58, %v2166_v60 }
 0x24d   : > { %v5035_v6 = vpop.permute.xlu0 %1536  ;;  %v5037_v10 = vpop.permute.xlu1 %1344 }
 0x24e   : > { %v1769_v30 = vrot.slane %v5037_v10, %v4943_v46 }
 0x251   : > { %v5051_v19 = vpop.permute.xlu1 %1533  ;;  %v1342_v3 = vpop.permute.xlu0 %1341 }
 0x252   : > { %v1765_v18 = vrot.slane %v1342_v3, %v4943_v46  ;;  %v2163_v3 = vsel %vm2140_vm6, %v1741_v22, %v2162_v5 }
 0x253   : > { %v2164_v62 = vsel %vm2142_vm7, %v1745_v31, %v2163_v3 }
 0x254   : > { %v2168_v63 = vsel %vm2136_vm4, %v1765_v18, %v2167_v33 }
 0x255   : > { %v1351_v11 = vpop.permute.xlu1 %1350  ;;  %v1348_v35 = vpop.permute.xlu0 %1347  ;;  %v2169_v50 = vsel %vm2138_vm5, %v1769_v30, %v2168_v63 }
 0x256   : > { %v1773_v44 = vrot.slane %v1348_v35, %v4943_v46  ;;  %v1777_v55 = vrot.slane %v1351_v11, %v4943_v46 }
 0x258   : > { %v2170_v53 = vsel %vm2140_vm6, %v1773_v44, %v2169_v50 }
 0x259   : > { %v5081_v21 = vpop.permute.xlu1 %1542  ;;  %v5083_v47 = vpop.permute.xlu0 %1539  ;;  %v2171_v10 = vsel %vm2142_vm7, %v1777_v55, %v2170_v53 }
 0x25c   : > { %2265 = vxpose.xlu0.b32.start [1/16] (narrow) %v2143_v52, 8 }
 0x25d   : > { %v1357_v25 = vpop.permute.xlu1 %1356  ;;  %v1354_v59 = vpop.permute.xlu0 %1353 }
 0x25e   : > { %v1781_v14 = vrot.slane %v1354_v59, %v4943_v46 }
 0x260   : > { %2266 = vxpose.xlu0.b32.cont [2/16] (narrow) %v2150_v15, 8 }
 0x261   : > { %v5113_v24 = vpop.permute.xlu1 %1548  ;;  %v5115_v45 = vpop.permute.xlu0 %1545 }
 0x264   : > { %2267 = vxpose.xlu0.b32.cont [3/16] (narrow) %v4974_v34, 8  ;;  %v1785_v34 = vrot.slane %v1357_v25, %v4943_v46 }
 0x265   : > { %v1363_v4 = vpop.permute.xlu1 %1362  ;;  %v1360_v52 = vpop.permute.xlu0 %1359 }
 0x266   : > { %v1789_v7 = vrot.slane %v1360_v52, %v4943_v46  ;;  %v2172_v37 = vsel %vm2130_vm1, %v1785_v34, %v1781_v14  ;;  %v1793_v61 = vrot.slane %v1363_v4, %v4943_v46 }
 0x268   : > { %2268 = vxpose.xlu0.b32.cont [4/16] (narrow) %v2164_v62, 8  ;;  %v2173_v12 = vsel %vm2132_vm2, %v1789_v7, %v2172_v37 }
 0x269   : > { %v5131_v13 = vpop.permute.xlu1 %1554  ;;  %v5133_v35 = vpop.permute.xlu0 %1551  ;;  %v2174_v59 = vsel %vm2134_vm3, %v1793_v61, %v2173_v12 }
 0x26c   : > { %2269 = vxpose.xlu0.b32.cont [5/16] (narrow) %v2171_v10, 8 }
 0x26d   : > { %v5139_v11 = vpop.permute.xlu0 %1560  ;;  %v1369_v51 = vpop.permute.xlu1 %1368 }
 0x26e   : > { %v1801_v15 = vrot.slane %v1369_v51, %v4943_v46 }
 0x271   : > { %v5144_v23 = vpop.permute.xlu1 %1557  ;;  %v1366_v36 = vpop.permute.xlu0 %1365 }
 0x272   : > { %v1797_v25 = vrot.slane %v1366_v36, %v4943_v46 }
 0x274   : > { %v2175_v58 = vsel %vm2136_vm4, %v1797_v25, %v2174_v59 }
 0x275   : > { %v1375_v39 = vpop.permute.xlu1 %1374  ;;  %v1372_v22 = vpop.permute.xlu0 %1371  ;;  %v2176_v2 = vsel %vm2138_vm5, %v1801_v15, %v2175_v58 }
 0x276   : > { %v1809_v60 = vrot.slane %v1375_v39, %v4943_v46  ;;  %v1805_v18 = vrot.slane %v1372_v22, %v4943_v46 }
 0x278   : > { %v2177_v31 = vsel %vm2140_vm6, %v1805_v18, %v2176_v2 }
 0x279   : > { %v5154_v33 = vpop.permute.xlu1 %1566  ;;  %v5156_v5 = vpop.permute.xlu0 %1563  ;;  %v2178_v63 = vsel %vm2142_vm7, %v1809_v60, %v2177_v31 }
 0x27a   : > { %2270 = vxpose.xlu0.b32.cont [6/16] (narrow) %v2178_v63, 8 }
 0x27d   : > { %v1381_v44 = vpop.permute.xlu1 %1380  ;;  %v1378_v3 = vpop.permute.xlu0 %1377 }
 0x27e   : > { %v1817_v53 = vrot.slane %v1381_v44, %v4943_v46  ;;  %v1813_v34 = vrot.slane %v1378_v3, %v4943_v46 }
 0x280   : > { %v2179_v51 = vsel %vm2130_vm1, %v1817_v53, %v1813_v34 }
 0x281   : > { %v5159_v30 = vpop.permute.xlu1 %1572  ;;  %v5161_v4 = vpop.permute.xlu0 %1569 }
 0x285   : > { %v1387_v52 = vpop.permute.xlu1 %1386  ;;  %v1384_v55 = vpop.permute.xlu0 %1383 }
 0x286   : > { %v1821_v14 = vrot.slane %v1384_v55, %v4943_v46  ;;  %v1825_v37 = vrot.slane %v1387_v52, %v4943_v46 }
 0x288   : > { %v2180_v61 = vsel %vm2132_vm2, %v1821_v14, %v2179_v51  ;;  %v1877_v51 = vrot.slane %v4884_v28, %v4943_v46 }
 0x289   : > { %v5163_v62 = vpop.permute.xlu1 %1578  ;;  %v5165_v50 = vpop.permute.xlu0 %1575  ;;  %v2181_v59 = vsel %vm2134_vm3, %v1825_v37, %v2180_v61 }
 0x28d   : > { %v5170_v10 = vpop.permute.xlu0 %1584  ;;  %v1393_v7 = vpop.permute.xlu1 %1392 }
 0x28e   : > { %v1833_v15 = vrot.slane %v1393_v7, %v4943_v46 }
 0x291   : > { %v5175_v12 = vpop.permute.xlu1 %1581  ;;  %v1390_v36 = vpop.permute.xlu0 %1389 }
 0x292   : > { %v1829_v25 = vrot.slane %v1390_v36, %v4943_v46  ;;  %v1885_v36 = vrot.slane %v4888_v32, %v4943_v46 }
 0x294   : > { %v2182_v58 = vsel %vm2136_vm4, %v1829_v25, %v2181_v59  ;;  %v1881_v59 = vrot.slane %v4876_v20, %v4943_v46  ;;  %v1889_v20 = vrot.slane %v4886_v29, %v4943_v46 }
 0x295   : > { %v1399_v39 = vpop.permute.xlu1 %1398  ;;  %v1396_v22 = vpop.permute.xlu0 %1395  ;;  %v2183_v2 = vsel %vm2138_vm5, %v1833_v15, %v2182_v58 }
 0x296   : > { %v1841_v60 = vrot.slane %v1399_v39, %v4943_v46  ;;  %v1837_v18 = vrot.slane %v1396_v22, %v4943_v46  ;;  %v2193_v39 = vsel %vm2130_vm1, %v1881_v59, %v1877_v51 }
 0x298   : > { %v2184_v31 = vsel %vm2140_vm6, %v1837_v18, %v2183_v2  ;;  %v1893_v18 = vrot.slane %v4898_v41, %v4943_v46 }
 0x299   : > { %v1402_v63 = vpop.permute.xlu0 %1401  ;;  %v2185_v44 = vsel %vm2142_vm7, %v1841_v60, %v2184_v31  ;;  %v1405_v3 = vpop.permute.xlu1 %1404  ;;  %v2194_v60 = vsel %vm2132_vm2, %v1885_v36, %v2193_v39  ;;  %v1913_v31 = vrot.slane %v4912_v56, %v4943_v46 }
 0x29a   : > { %2271 = vxpose.xlu0.b32.cont [7/16] (narrow) %v2185_v44, 8  ;;  %v1849_v37 = vrot.slane %v1405_v3, %v4943_v46  ;;  %v1845_v61 = vrot.slane %v1402_v63, %v4943_v46  ;;  %v1909_v63 = vrot.slane %v4914_v57, %v4943_v46  ;;  %v1917_v3 = vrot.slane %v4922_v1, %v4943_v46 }
 0x29b   : > { %v2195_v41 = vsel %vm2134_vm3, %v1889_v20, %v2194_v60  ;;  %v1901_v57 = vrot.slane %v4906_v49, %v4943_v46  ;;  %v1921_v1 = vrot.slane %v4920_v0, %v4943_v46  ;;  %v1905_v49 = vrot.slane %v4904_v48, %v4943_v46 }
 0x29c   : > { %v2186_v22 = vsel %vm2130_vm1, %v1849_v37, %v1845_v61  ;;  %v2196_v29 = vsel %vm2136_vm4, %v1893_v18, %v2195_v41  ;;  %v2200_v51 = vsel %vm2130_vm1, %v1913_v31, %v1909_v63  ;;  %v2005_v20 = vrot.slane %v5021_v38, %v4943_v46 }
 0x29d   : > { %v5186_v52 = vpop.permute.xlu0 %1593  ;;  %v5188_v53 = vpop.permute.xlu1 %1596  ;;  %v2201_v36 = vsel %vm2132_vm2, %v1917_v3, %v2200_v51  ;;  %v2013_v63 = vrot.slane %v5027_v43, %v4943_v46  ;;  %v2041_v3 = vrot.slane %v5113_v24, %v4943_v46  ;;  %v2017_v38 = vrot.slane %v5025_v42, %v4943_v46 }
 0x2a1   : > { %v1408_v55 = vpop.permute.xlu0 %1407  ;;  %v1411_v14 = vpop.permute.xlu1 %1410 }
 0x2a2   : > { %v1853_v25 = vrot.slane %v1408_v55, %v4943_v46  ;;  %v1857_v28 = vrot.slane %v1411_v14, %v4943_v46  ;;  %v1897_v14 = vrot.slane %v4896_v40, %v4943_v46  ;;  %v1925_v40 = vrot.slane %v4930_v9, %v4943_v46 }
 0x2a4   : > { %v2187_v32 = vsel %vm2132_vm2, %v1853_v25, %v2186_v22  ;;  %v2197_v0 = vsel %vm2138_vm5, %v1897_v14, %v2196_v29  ;;  %v2021_v29 = vrot.slane %v5051_v19, %v4943_v46  ;;  %v2025_v19 = vrot.slane %v5035_v6, %v4943_v46 }
 0x2a5   : > { %v5190_v34 = vpop.permute.xlu0 %1599  ;;  %v1417_v15 = vpop.permute.xlu1 %1416  ;;  %v2188_v55 = vsel %vm2134_vm3, %v1857_v28, %v2187_v32  ;;  %v2202_v28 = vsel %vm2134_vm3, %v1921_v1, %v2201_v36  ;;  %v2198_v60 = vsel %vm2140_vm6, %v1901_v57, %v2197_v0  ;;  %v1933_v32 = vrot.slane %v4938_v17, %v4943_v46 }
 0x2a6   : > { %v1865_v37 = vrot.slane %v1417_v15, %v4943_v46  ;;  %v1929_v15 = vrot.slane %v4928_v8, %v4943_v46  ;;  %v2203_v18 = vsel %vm2136_vm4, %v1925_v40, %v2202_v28  ;;  %v2199_v48 = vsel %vm2142_vm7, %v1905_v49, %v2198_v60 }
 0x2a7   : > { %v2009_v8 = vrot.slane %v5019_v26, %v4943_v46  ;;  %v2029_v57 = vrot.slane %v5083_v47, %v4943_v46  ;;  %v2069_v1 = vrot.slane %v5161_v4, %v4943_v46  ;;  %v2033_v47 = vrot.slane %v5081_v21, %v4943_v46 }
 0x2a8   : > { %v2204_v31 = vsel %vm2138_vm5, %v1929_v15, %v2203_v18  ;;  %v2065_v21 = vrot.slane %v5154_v33, %v4943_v46  ;;  %v2109_v33 = vrot.slane %v5190_v34, %v4943_v46  ;;  %v2089_v28 = vrot.slane %v5170_v10, %v4943_v46 }
 0x2a9   : > { %v1414_v7 = vpop.permute.xlu0 %1413  ;;  %v1423_v56 = vpop.permute.xlu1 %1422  ;;  %v2205_v17 = vsel %vm2140_vm6, %v1933_v32, %v2204_v31  ;;  %v2221_v26 = vsel %vm2130_vm1, %v2009_v8, %v2005_v20 }
 0x2aa   : > { %v1861_v2 = vrot.slane %v1414_v7, %v4943_v46  ;;  %v1873_v59 = vrot.slane %v1423_v56, %v4943_v46  ;;  %v2222_v14 = vsel %vm2132_vm2, %v2013_v63, %v2221_v26  ;;  %v2299_v26 = vld [vmem:[#allocation2] sm:$0xff] }
 0x2ac   : > { %v2189_v7 = vsel %vm2136_vm4, %v1861_v2, %v2188_v55  ;;  %v1937_v2 = vrot.slane %v4936_v16, %v4943_v46  ;;  %v2037_v16 = vrot.slane %v5115_v45, %v4943_v46  ;;  %v2045_v55 = vrot.slane %v5133_v35, %v4943_v46 }
 0x2ad   : > { %v5201_v58 = vpop.permute.xlu0 %1587  ;;  %v2190_v39 = vsel %vm2138_vm5, %v1865_v37, %v2189_v7  ;;  %v1603_v41 = vpop.permute.xlu1 %1602  ;;  %v2049_v45 = vrot.slane %v5131_v13, %v4943_v46  ;;  %v2223_v7 = vsel %vm2134_vm3, %v2017_v38, %v2222_v14  ;;  %v2053_v35 = vrot.slane %v5144_v23, %v4943_v46 }
 0x2ae   : > { %v2206_v43 = vsel %vm2142_vm7, %v1937_v2, %v2205_v17  ;;  %v2228_v24 = vsel %vm2130_vm1, %v2041_v3, %v2037_v16  ;;  %v2224_v56 = vsel %vm2136_vm4, %v2021_v29, %v2223_v7  ;;  %v2073_v13 = vrot.slane %v5159_v30, %v4943_v46  ;;  %v2297_v3 = vld [vmem:[%s4687_s25] sm:$0xff] }
 0x2af   : > { %v2229_v42 = vsel %vm2132_vm2, %v2045_v55, %v2228_v24  ;;  %v2077_v23 = vrot.slane %v5165_v50, %v4943_v46  ;;  %v2225_v6 = vsel %vm2138_vm5, %v2025_v19, %v2224_v56  ;;  %v2057_v30 = vrot.slane %v5139_v11, %v4943_v46 }
 0x2b0   : > { %v2230_v37 = vsel %vm2134_vm3, %v2049_v45, %v2229_v42  ;;  %v2226_v4 = vsel %vm2140_vm6, %v2029_v57, %v2225_v6  ;;  %v2235_v36 = vsel %vm2130_vm1, %v2073_v13, %v2069_v1  ;;  %v2081_v50 = vrot.slane %v5163_v62, %v4943_v46 }
 0x2b1   : > { %v5217_v44 = vpop.permute.xlu0 %1590  ;;  %v1606_v51 = vpop.permute.xlu1 %1605  ;;  %v2236_v40 = vsel %vm2132_vm2, %v2077_v23, %v2235_v36  ;;  %v2304_v45 = vmax.f32 %v2299_v26, -1e+30  ;;  %v2316_v36 = vld [vmem:[#allocation3] sm:$0xff] }
 0x2b2   : > { %v2237_v49 = vsel %vm2134_vm3, %v2081_v50, %v2236_v40 }
 0x2b5   : > { %v1420_v61 = vpop.permute.xlu0 %1419 }
 0x2b6   : > { %v1869_v25 = vrot.slane %v1420_v61, %v4943_v46  ;;  %v2231_v61 = vsel %vm2136_vm4, %v2053_v35, %v2230_v37  ;;  %v5966_v35 = vld [vmem:[#allocation22_spill] sm:$0xff] }
 0x2b7   : > { %v2232_v11 = vsel %vm2138_vm5, %v2057_v30, %v2231_v61  ;;  %v5349_v56 = vsub.s32 1, %v5966_v35  ;;  %v5352_v57 = vsub.s32 0, %v5966_v35  ;;  %v5357_v1 = vsub.s32 2, %v5966_v35 }
 0x2b8   : > { %v2191_v22 = vsel %vm2140_vm6, %v1869_v25, %v2190_v39  ;;  %v1609_v25 = vpop.permute.xlu1 %1608  ;;  %v2227_v39 = vsel %vm2142_vm7, %v2033_v47, %v2226_v4  ;;  %v5362_v61 = vsub.s32 3, %v5966_v35  ;;  %v5371_v50 = vsub.s32 4, %v5966_v35 }
 0x2b9   : > { %v2192_v9 = vsel %vm2142_vm7, %v1873_v59, %v2191_v22  ;;  %v2101_v59 = vrot.slane %v5186_v52, %v4943_v46  ;;  %v1612_v22 = vpop.permute.xlu0 %1611  ;;  %v2117_v52 = vrot.slane %v1606_v51, %v4943_v46  ;;  %v2121_v60 = vrot.slane %v1609_v25, %v4943_v46 }
 0x2ba   : > { %2272 = vxpose.xlu0.b32.cont [8/16] (narrow) %v2192_v9, 8  ;;  %v2097_v9 = vrot.slane %v5217_v44, %v4943_v46 }
 0x2bc   : > { %v1615_v32 = vpop.permute.xlu1 %1614 }
 0x2bd   : > { %v2129_v44 = vrot.slane %v1615_v32, %v4943_v46 }
 0x2be   : > { %2273 = vxpose.xlu0.b32.cont [9/16] (narrow) %v2199_v48, 8 }
 0x2c2   : > { %2274 = vxpose.xlu0.b32.cont [10/16] (narrow) %v2206_v43, 8 }
 0x2c6   : > { %2275 = vxpose.xlu0.b32.cont [11/16] (narrow) %v4985_v54, 8  ;;  %v2061_v54 = vrot.slane %v5156_v5, %v4943_v46  ;;  %v2085_v5 = vrot.slane %v5175_v12, %v4943_v46  ;;  %v2113_v12 = vrot.slane %v1603_v41, %v4943_v46 }
 0x2c8   : > { %v2233_v62 = vsel %vm2140_vm6, %v2061_v54, %v2232_v11  ;;  %v2238_v0 = vsel %vm2136_vm4, %v2085_v5, %v2237_v49 }
 0x2c9   : > { %v2234_v15 = vsel %vm2142_vm7, %v2065_v21, %v2233_v62  ;;  %v2239_v2 = vsel %vm2138_vm5, %v2089_v28, %v2238_v0  ;;  %v5374_v21 = vsub.s32 5, %v5966_v35 }
 0x2ca   : > { %2276 = vxpose.xlu0.b32.cont [12/16] (narrow) %v5017_v27, 8  ;;  %v2105_v27 = vrot.slane %v5188_v53, %v4943_v46  ;;  %v2093_v53 = vrot.slane %v5201_v58, %v4943_v46  ;;  %v2125_v58 = vrot.slane %v1612_v22, %v4943_v46 }
 0x2cc   : > { %v2242_v34 = vsel %vm2130_vm1, %v2105_v27, %v2101_v59  ;;  %v2240_v8 = vsel %vm2140_vm6, %v2093_v53, %v2239_v2  ;;  %v5382_v59 = vsub.s32 7, %v5966_v35 }
 0x2cd   : > { %v2243_v18 = vsel %vm2132_vm2, %v2109_v33, %v2242_v34  ;;  %v2241_v31 = vsel %vm2142_vm7, %v2097_v9, %v2240_v8 }
 0x2ce   : > { %2277 = vxpose.xlu0.b32.cont [13/16] (narrow) %v2227_v39, 8  ;;  %v2244_v48 = vsel %vm2134_vm3, %v2113_v12, %v2243_v18  ;;  %v5390_v12 = vsub.s32 6, %v5966_v35 }
 0x2cf   : > { %v2245_v10 = vsel %vm2136_vm4, %v2117_v52, %v2244_v48 }
 0x2d0   : > { %v2246_v20 = vsel %vm2138_vm5, %v2121_v60, %v2245_v10 }
 0x2d1   : > { %v2247_v63 = vsel %vm2140_vm6, %v2125_v58, %v2246_v20 }
 0x2d2   : > { %2278 = vxpose.xlu0.b32.cont [14/16] (narrow) %v2234_v15, 8  ;;  %v2248_v17 = vsel %vm2142_vm7, %v2129_v44, %v2247_v63 }
 0x2d6   : > { %2279 = vxpose.xlu0.b32.cont [15/16] (narrow) %v2241_v31, 8 }
 0x2da   : > { %2280 = vxpose.xlu0.b32.end [16/16] (narrow) %v2248_v17, 8 }
 0x31a   : > { %v2281_v16 = vpop.trf.xlu0 }
 0x31b   : > { %v2298_v41 = vadd.f32 %v2297_v3, %v2281_v16 }
 0x31d   : > { %2300 = vmax.xlane.f32.xlu1 %v2298_v41 }
 0x3a6   : > { %v2301_v38 = vpop.xlane.xlu1 %2300 }
 0x3a7   : > { %v2302_v55 = vmax.f32 %v2299_v26, %v2301_v38 }
 0x3a9   : > { %v2303_v43 = vmax.f32 %v2302_v55, -1e+30  ;;  %2323 = vst.msk [vmem:[#allocation2] sm:$0xff] %vm2321_vm8, %v2302_v55 }
 0x3ab   : > { %2310 = vperm.xlu1 %4190, %v2303_v43   ;;  %v2305_v7 = vsub.f32 %v2304_v45, %v2303_v43 }
 0x3ad   : > { %v2306_v42 = vmul.f32 1.442695, %v2305_v7 }
 0x426   : > { %v2311_v46 = vpop.permute.xlu1 %2310 }
 0x427   : > { %v2313_v14 = vsub.f32 %v2298_v41, %v2311_v46 }
 0x429   : > { %v2314_v29 = vmul.f32 1.442695, %v2313_v14 }
 0x42b   : > { %4191 = vpow2.f32 %v2314_v29 }
 0x42c   : > { %4193 = vpow2.f32 %v2306_v42 }
 0x438   : > { %v4192_v24 = vpop.eup %4191 }
 0x439   : > { %2318 = vadd.xlane.f32.xlu0 %v4192_v24  ;;  %2324 = vxpose.xlu1.b32.start.end [1/1] (short) %v4192_v24, 128  ;;  %v5367_v30 = vpop.eup %4193 }
 0x43a   : > { %v2317_v5 = vmul.f32 %v5367_v30, %v2316_v36 }
 0x4b5   : > { %v2340_v51 = vpop.trf.xlu1 }
 0x4b6   : > { %v2366_v19 = vrot.slane %v2340_v51, %v5349_v56  ;;  %v2359_v13 = vrot.slane %v2340_v51, %v5352_v57  ;;  %v2373_v23 = vrot.slane %v2340_v51, %v5357_v1  ;;  %v2380_v4 = vrot.slane %v2340_v51, %v5362_v61 }
 0x4b7   : > { %v2387_v27 = vrot.slane %v2340_v51, %v5371_v50  ;;  %v2394_v49 = vrot.slane %v2340_v51, %v5374_v21  ;;  %v2401_v53 = vrot.slane %v2340_v51, %v5390_v12  ;;  %v2408_v28 = vrot.slane %v2340_v51, %v5382_v59 }
 0x4b8   : > { %2368 = vbcast.lane.b32.xlu0 %v2366_v19, 256  ;;  %2361 = vbcast.lane.b32.xlu1 %v2359_v13, 256 }
 0x4b9   : > { %v2341_v37 = vpop.trf.xlu1 }
 0x4ba   : > { %v2422_v47 = vrot.slane %v2341_v37, %v5349_v56  ;;  %v2436_v54 = vrot.slane %v2341_v37, %v5362_v61  ;;  %v2450_v40 = vrot.slane %v2341_v37, %v5374_v21  ;;  %v2464_v62 = vrot.slane %v2341_v37, %v5382_v59 }
 0x4bb   : > { %v2415_v34 = vrot.slane %v2341_v37, %v5352_v57  ;;  %v2429_v58 = vrot.slane %v2341_v37, %v5357_v1  ;;  %v2443_v10 = vrot.slane %v2341_v37, %v5371_v50  ;;  %v2457_v20 = vrot.slane %v2341_v37, %v5390_v12 }
 0x4bc   : > { %2375 = vbcast.lane.b32.xlu0 %v2373_v23, 256  ;;  %2424 = vbcast.lane.b32.xlu1 %v2422_v47, 256 }
 0x4bd   : > { %v5365_v6 = vpop.trf.xlu1 }
 0x4be   : > { %v2478_v22 = vrot.slane %v5365_v6, %v5349_v56  ;;  %v2492_v52 = vrot.slane %v5365_v6, %v5362_v61  ;;  %v2506_v9 = vrot.slane %v5365_v6, %v5374_v21  ;;  %v2520_v18 = vrot.slane %v5365_v6, %v5382_v59 }
 0x4bf   : > { %v2471_v63 = vrot.slane %v5365_v6, %v5352_v57  ;;  %v2485_v16 = vrot.slane %v5365_v6, %v5357_v1  ;;  %v2499_v26 = vrot.slane %v5365_v6, %v5371_v50  ;;  %v2513_v55 = vrot.slane %v5365_v6, %v5390_v12 }
 0x4c0   : > { %2382 = vbcast.lane.b32.xlu0 %v2380_v4, 256  ;;  %2438 = vbcast.lane.b32.xlu1 %v2436_v54, 256 }
 0x4c1   : > { %v5378_v25 = vpop.trf.xlu1 }
 0x4c2   : > { %v2319_v11 = vpop.xlane.xlu0 %2318  ;;  %v2534_v48 = vrot.slane %v5378_v25, %v5349_v56  ;;  %v2548_v8 = vrot.slane %v5378_v25, %v5362_v61  ;;  %v2562_v17 = vrot.slane %v5378_v25, %v5374_v21  ;;  %v2576_v3 = vrot.slane %v5378_v25, %v5382_v59 }
 0x4c3   : > { %v2320_v39 = vadd.f32 %v2319_v11, %v2317_v5  ;;  %v2527_v43 = vrot.slane %v5378_v25, %v5352_v57  ;;  %v2541_v29 = vrot.slane %v5378_v25, %v5357_v1  ;;  %v2555_v45 = vrot.slane %v5378_v25, %v5371_v50 }
 0x4c4   : > { %2389 = vbcast.lane.b32.xlu0 %v2387_v27, 256  ;;  %2452 = vbcast.lane.b32.xlu1 %v2450_v40, 256  ;;  %v2569_v42 = vrot.slane %v5378_v25, %v5390_v12 }
 0x4c5   : > { %2322 = vst.msk [vmem:[#allocation3] sm:$0xff] %vm2321_vm8, %v2320_v39  ;;  %v5386_v33 = vpop.trf.xlu1 }
 0x4c6   : > { %v2590_v41 = vrot.slane %v5386_v33, %v5349_v56  ;;  %v2604_v38 = vrot.slane %v5386_v33, %v5362_v61  ;;  %v2618_v46 = vrot.slane %v5386_v33, %v5374_v21  ;;  %v2632_v14 = vrot.slane %v5386_v33, %v5382_v59 }
 0x4c7   : > { %v2583_v35 = vrot.slane %v5386_v33, %v5352_v57  ;;  %v2597_v13 = vrot.slane %v5386_v33, %v5357_v1  ;;  %v2611_v23 = vrot.slane %v5386_v33, %v5371_v50  ;;  %v2625_v6 = vrot.slane %v5386_v33, %v5390_v12 }
 0x4c8   : > { %2396 = vbcast.lane.b32.xlu0 %v2394_v49, 256  ;;  %2466 = vbcast.lane.b32.xlu1 %v2464_v62, 256 }
 0x4c9   : > { %v5394_v0 = vpop.trf.xlu1 }
 0x4ca   : > { %v2646_v24 = vrot.slane %v5394_v0, %v5349_v56  ;;  %v2660_v7 = vrot.slane %v5394_v0, %v5362_v61  ;;  %v2674_v51 = vrot.slane %v5394_v0, %v5374_v21  ;;  %v2688_v19 = vrot.slane %v5394_v0, %v5382_v59 }
 0x4cb   : > { %v2639_v4 = vrot.slane %v5394_v0, %v5352_v57  ;;  %v2653_v25 = vrot.slane %v5394_v0, %v5357_v1  ;;  %v2667_v39 = vrot.slane %v5394_v0, %v5371_v50  ;;  %v2681_v33 = vrot.slane %v5394_v0, %v5390_v12 }
 0x4cc   : > { %2403 = vbcast.lane.b32.xlu0 %v2401_v53, 256  ;;  %2480 = vbcast.lane.b32.xlu1 %v2478_v22, 256 }
 0x4cd   : > { %v5399_v15 = vpop.trf.xlu1 }
 0x4ce   : > { %v2702_v37 = vrot.slane %v5399_v15, %v5349_v56  ;;  %v2716_v47 = vrot.slane %v5399_v15, %v5362_v61  ;;  %v2730_v36 = vrot.slane %v5399_v15, %v5374_v21  ;;  %v2744_v5 = vrot.slane %v5399_v15, %v5382_v59 }
 0x4cf   : > { %v2695_v22 = vrot.slane %v5399_v15, %v5352_v57 }
 0x4d0   : > { %2410 = vbcast.lane.b32.xlu0 %v2408_v28, 256  ;;  %2494 = vbcast.lane.b32.xlu1 %v2492_v52, 256  ;;  %v2709_v28 = vrot.slane %v5399_v15, %v5357_v1 }
 0x4d1   : > { %v5405_v60 = vpop.trf.xlu1 }
 0x4d2   : > { %v2758_v11 = vrot.slane %v5405_v60, %v5349_v56  ;;  %v2772_v62 = vrot.slane %v5405_v60, %v5362_v61  ;;  %v2786_v53 = vrot.slane %v5405_v60, %v5374_v21  ;;  %v2800_v0 = vrot.slane %v5405_v60, %v5382_v59 }
 0x4d4   : > { %2417 = vbcast.lane.b32.xlu0 %v2415_v34, 256  ;;  %2508 = vbcast.lane.b32.xlu1 %v2506_v9, 256 }
 0x4d5   : > { %v5409_v32 = vpop.trf.xlu1 }
 0x4d8   : > { %2431 = vbcast.lane.b32.xlu0 %v2429_v58, 256  ;;  %2522 = vbcast.lane.b32.xlu1 %v2520_v18, 256  ;;  %v2723_v18 = vrot.slane %v5399_v15, %v5371_v50  ;;  %v2814_v58 = vrot.slane %v5409_v32, %v5349_v56 }
 0x4d9   : > { %v5414_v2 = vpop.trf.xlu1 }
 0x4dc   : > { %2445 = vbcast.lane.b32.xlu0 %v2443_v10, 256  ;;  %2536 = vbcast.lane.b32.xlu1 %v2534_v48, 256 }
 0x4dd   : > { %v5420_v44 = vpop.trf.xlu1 }
 0x4de   : > { %v2961_v31 = vrot.slane %v5420_v44, %v5390_v12 }
 0x4e0   : > { %2459 = vbcast.lane.b32.xlu0 %v2457_v20, 256  ;;  %2550 = vbcast.lane.b32.xlu1 %v2548_v8, 256  ;;  %v2737_v8 = vrot.slane %v5399_v15, %v5390_v12  ;;  %v2828_v20 = vrot.slane %v5409_v32, %v5362_v61 }
 0x4e1   : > { %v5470_v54 = vpop.trf.xlu1 }
 0x4e4   : > { %2473 = vbcast.lane.b32.xlu0 %v2471_v63, 256  ;;  %2564 = vbcast.lane.b32.xlu1 %v2562_v17, 256 }
 0x4e5   : > { %v5478_v40 = vpop.trf.xlu1 }
 0x4e8   : > { %2487 = vbcast.lane.b32.xlu0 %v2485_v16, 256  ;;  %2578 = vbcast.lane.b32.xlu1 %v2576_v3, 256  ;;  %v2751_v3 = vrot.slane %v5405_v60, %v5352_v57  ;;  %v2842_v16 = vrot.slane %v5409_v32, %v5374_v21 }
 0x4e9   : > { %v5486_v27 = vpop.trf.xlu1 }
 0x4ec   : > { %2501 = vbcast.lane.b32.xlu0 %v2499_v26, 256  ;;  %2592 = vbcast.lane.b32.xlu1 %v2590_v41, 256  ;;  %v2765_v26 = vrot.slane %v5405_v60, %v5357_v1 }
 0x4ed   : > { %v5494_v49 = vpop.trf.xlu1 }
 0x4f0   : > { %2515 = vbcast.lane.b32.xlu0 %v2513_v55, 256  ;;  %2606 = vbcast.lane.b32.xlu1 %v2604_v38, 256  ;;  %v2856_v38 = vrot.slane %v5409_v32, %v5382_v59  ;;  %v4195_v55 = vld [vmem:[%s4681_s11 + $0x8] sm:$0xff] }
 0x4f1   : > { %v5500_v52 = vpop.trf.xlu1 }
 0x4f4   : > { %2529 = vbcast.lane.b32.xlu0 %v2527_v43, 256  ;;  %2620 = vbcast.lane.b32.xlu1 %v2618_v46, 256  ;;  %v4196_v46 = vld [vmem:[%s4681_s11] sm:$0xff] }
 0x4f8   : > { %2543 = vbcast.lane.b32.xlu0 %v2541_v29, 256  ;;  %2634 = vbcast.lane.b32.xlu1 %v2632_v14, 256  ;;  %v4197_v29 = vld [vmem:[%s4681_s11 + $0x10] sm:$0xff] }
 0x4fc   : > { %2557 = vbcast.lane.b32.xlu0 %v2555_v45, 256  ;;  %2648 = vbcast.lane.b32.xlu1 %v2646_v24, 256 }
 0x500   : > { %2571 = vbcast.lane.b32.xlu0 %v2569_v42, 256  ;;  %2662 = vbcast.lane.b32.xlu1 %v2660_v7, 256  ;;  %v2779_v42 = vrot.slane %v5405_v60, %v5371_v50 }
 0x504   : > { %2585 = vbcast.lane.b32.xlu0 %v2583_v35, 256  ;;  %2676 = vbcast.lane.b32.xlu1 %v2674_v51, 256  ;;  %v2870_v35 = vrot.slane %v5414_v2, %v5349_v56 }
 0x508   : > { %2599 = vbcast.lane.b32.xlu0 %v2597_v13, 256  ;;  %2690 = vbcast.lane.b32.xlu1 %v2688_v19, 256  ;;  %v4198_v19 = vld [vmem:[%s4681_s11 + $0x18] sm:$0xff] }
 0x50c   : > { %2613 = vbcast.lane.b32.xlu0 %v2611_v23, 256  ;;  %2704 = vbcast.lane.b32.xlu1 %v2702_v37, 256  ;;  %v4199_v23 = vld [vmem:[%s4681_s11 + $0x20] sm:$0xff] }
 0x510   : > { %2627 = vbcast.lane.b32.xlu0 %v2625_v6, 256  ;;  %2718 = vbcast.lane.b32.xlu1 %v2716_v47, 256 }
 0x514   : > { %2641 = vbcast.lane.b32.xlu0 %v2639_v4, 256  ;;  %2732 = vbcast.lane.b32.xlu1 %v2730_v36, 256  ;;  %v2793_v36 = vrot.slane %v5405_v60, %v5390_v12  ;;  %v2898_v60 = vrot.slane %v5414_v2, %v5374_v21 }
 0x518   : > { %2655 = vbcast.lane.b32.xlu0 %v2653_v25, 256  ;;  %2746 = vbcast.lane.b32.xlu1 %v2744_v5, 256  ;;  %v2884_v5 = vrot.slane %v5414_v2, %v5362_v61 }
 0x51c   : > { %2669 = vbcast.lane.b32.xlu0 %v2667_v39, 256  ;;  %2760 = vbcast.lane.b32.xlu1 %v2758_v11, 256  ;;  %v4200_v11 = vld [vmem:[%s4681_s11 + $0x28] sm:$0xff] }
 0x520   : > { %2683 = vbcast.lane.b32.xlu0 %v2681_v33, 256  ;;  %2774 = vbcast.lane.b32.xlu1 %v2772_v62, 256  ;;  %v4201_v33 = vld [vmem:[%s4681_s11 + $0x30] sm:$0xff] }
 0x524   : > { %2697 = vbcast.lane.b32.xlu0 %v2695_v22, 256  ;;  %2788 = vbcast.lane.b32.xlu1 %v2786_v53, 256 }
 0x528   : > { %2711 = vbcast.lane.b32.xlu0 %v2709_v28, 256  ;;  %2802 = vbcast.lane.b32.xlu1 %v2800_v0, 256  ;;  %v2807_v0 = vrot.slane %v5409_v32, %v5352_v57 }
 0x52a   : > { %v2369_v34 = vpop.permute.xlu0 %2368  ;;  %v2362_v9 = vpop.permute.xlu1 %2361 }
 0x52b   : > { %v3253_v43 = vmul.f32 %v4195_v55, %v2369_v34  ;;  %v3252_v14 = vmul.f32 %v4196_v46, %v2362_v9  ;;  %v4202_v9 = vld [vmem:[%s4681_s11 + $0x38] sm:$0xff] }
 0x52c   : > { %2725 = vbcast.lane.b32.xlu0 %v2723_v18, 256  ;;  %2816 = vbcast.lane.b32.xlu1 %v2814_v58, 256 }
 0x52d   : > { %v3380_v51 = vadd.f32 %v3253_v43, %v3252_v14  ;;  %v2835_v14 = vrot.slane %v5409_v32, %v5371_v50 }
 0x52e   : > { %v2376_v48 = vpop.permute.xlu0 %2375  ;;  %v5510_v10 = vpop.permute.xlu1 %2424 }
 0x52f   : > { %v3254_v24 = vmul.f32 %v4197_v29, %v2376_v48  ;;  %v2926_v29 = vrot.slane %v5420_v44, %v5349_v56 }
 0x530   : > { %2739 = vbcast.lane.b32.xlu0 %v2737_v8, 256  ;;  %2830 = vbcast.lane.b32.xlu1 %v2828_v20, 256  ;;  %v2821_v20 = vrot.slane %v5409_v32, %v5357_v1 }
 0x531   : > { %v3381_v37 = vadd.f32 %v3380_v51, %v3254_v24 }
 0x532   : > { %v2383_v63 = vpop.permute.xlu0 %2382  ;;  %v5516_v17 = vpop.permute.xlu1 %2438 }
 0x533   : > { %v3255_v13 = vmul.f32 %v4198_v19, %v2383_v63  ;;  %v2912_v63 = vrot.slane %v5414_v2, %v5382_v59 }
 0x534   : > { %2753 = vbcast.lane.b32.xlu0 %v2751_v3, 256  ;;  %2844 = vbcast.lane.b32.xlu1 %v2842_v16, 256  ;;  %v4203_v16 = vld [vmem:[%s4681_s11 + $0x40] sm:$0xff] }
 0x535   : > { %v3382_v25 = vadd.f32 %v3381_v37, %v3255_v13  ;;  %v2849_v37 = vrot.slane %v5409_v32, %v5390_v12  ;;  %v2863_v32 = vrot.slane %v5414_v2, %v5352_v57 }
 0x536   : > { %v2390_v41 = vpop.permute.xlu0 %2389  ;;  %v5522_v15 = vpop.permute.xlu1 %2452 }
 0x537   : > { %v3256_v47 = vmul.f32 %v4199_v23, %v2390_v41  ;;  %v2940_v23 = vrot.slane %v5420_v44, %v5362_v61 }
 0x538   : > { %2767 = vbcast.lane.b32.xlu0 %v2765_v26, 256  ;;  %2858 = vbcast.lane.b32.xlu1 %v2856_v38, 256  ;;  %v4204_v26 = vld [vmem:[%s4681_s11 + $0x48] sm:$0xff] }
 0x539   : > { %v3383_v62 = vadd.f32 %v3382_v25, %v3256_v47  ;;  %v3261_v38 = vmul.f32 %v4204_v26, %v5510_v10 }
 0x53a   : > { %v2397_v45 = vpop.permute.xlu0 %2396  ;;  %v5531_v7 = vpop.permute.xlu1 %2466 }
 0x53b   : > { %v3257_v39 = vmul.f32 %v4200_v11, %v2397_v45  ;;  %v4205_v45 = vld [vmem:[%s4681_s11 + $0x50] sm:$0xff] }
 0x53c   : > { %2781 = vbcast.lane.b32.xlu0 %v2779_v42, 256  ;;  %2872 = vbcast.lane.b32.xlu1 %v2870_v35, 256  ;;  %v4206_v35 = vld [vmem:[%s4681_s11 + $0x58] sm:$0xff] }
 0x53d   : > { %v3384_v34 = vadd.f32 %v3383_v62, %v3257_v39  ;;  %v3263_v10 = vmul.f32 %v4206_v35, %v5516_v17  ;;  %v2954_v62 = vrot.slane %v5420_v44, %v5374_v21 }
 0x53e   : > { %v2404_v6 = vpop.permute.xlu0 %2403  ;;  %v5539_v4 = vpop.permute.xlu1 %2480 }
 0x53f   : > { %v3258_v22 = vmul.f32 %v4201_v33, %v2404_v6  ;;  %v4207_v6 = vld [vmem:[%s4681_s11 + $0x60] sm:$0xff] }
 0x540   : > { %2795 = vbcast.lane.b32.xlu0 %v2793_v36, 256  ;;  %2886 = vbcast.lane.b32.xlu1 %v2884_v5, 256  ;;  %v4208_v5 = vld [vmem:[%s4681_s11 + $0x68] sm:$0xff] }
 0x541   : > { %v3385_v58 = vadd.f32 %v3384_v34, %v3258_v22  ;;  %v3265_v17 = vmul.f32 %v4208_v5, %v5522_v15  ;;  %v4209_v22 = vld [vmem:[%s4681_s11 + $0x70] sm:$0xff] }
 0x542   : > { %v2411_v53 = vpop.permute.xlu0 %2410  ;;  %v5547_v28 = vpop.permute.xlu1 %2494 }
 0x543   : > { %v3259_v18 = vmul.f32 %v4202_v9, %v2411_v53 }
 0x544   : > { %2809 = vbcast.lane.b32.xlu0 %v2807_v0, 256  ;;  %2900 = vbcast.lane.b32.xlu1 %v2898_v60, 256  ;;  %v4210_v0 = vld [vmem:[%s4681_s11 + $0x78] sm:$0xff] }
 0x545   : > { %v3386_v3 = vadd.f32 %v3385_v58, %v3259_v18  ;;  %v3267_v15 = vmul.f32 %v4210_v0, %v5531_v7  ;;  %v2877_v18 = vrot.slane %v5414_v2, %v5357_v1  ;;  %v2968_v58 = vrot.slane %v5420_v44, %v5382_v59 }
 0x546   : > { %v2418_v48 = vpop.permute.xlu0 %2417  ;;  %v5554_v8 = vpop.permute.xlu1 %2508  ;;  %v2933_v0 = vrot.slane %v5420_v44, %v5357_v1 }
 0x547   : > { %v3260_v41 = vmul.f32 %v4203_v16, %v2418_v48 }
 0x548   : > { %2823 = vbcast.lane.b32.xlu0 %v2821_v20, 256  ;;  %2914 = vbcast.lane.b32.xlu1 %v2912_v63, 256  ;;  %v4211_v20 = vld [vmem:[%s4681_s11 + $0x80] sm:$0xff] }
 0x549   : > { %v3387_v55 = vadd.f32 %v3386_v3, %v3260_v41  ;;  %v4212_v3 = vld [vmem:[%s4681_s11 + $0x88] sm:$0xff] }
 0x54a   : > { %v2432_v43 = vpop.permute.xlu0 %2431  ;;  %v5563_v46 = vpop.permute.xlu1 %2522  ;;  %v3269_v7 = vmul.f32 %v4212_v3, %v5539_v4  ;;  %v2947_v3 = vrot.slane %v5420_v44, %v5371_v50 }
 0x54b   : > { %v3388_v24 = vadd.f32 %v3387_v55, %v3261_v38  ;;  %v3262_v42 = vmul.f32 %v4205_v45, %v2432_v43  ;;  %v2891_v38 = vrot.slane %v5414_v2, %v5371_v50  ;;  %v2982_v55 = vrot.slane %v5470_v54, %v5349_v56 }
 0x54c   : > { %2837 = vbcast.lane.b32.xlu0 %v2835_v14, 256  ;;  %2928 = vbcast.lane.b32.xlu1 %v2926_v29, 256  ;;  %v4213_v14 = vld [vmem:[%s4681_s11 + $0x90] sm:$0xff] }
 0x54d   : > { %v3389_v51 = vadd.f32 %v3388_v24, %v3262_v42  ;;  %v4214_v24 = vld [vmem:[%s4681_s11 + $0x98] sm:$0xff] }
 0x54e   : > { %v2446_v19 = vpop.permute.xlu0 %2445  ;;  %v5572_v13 = vpop.permute.xlu1 %2536  ;;  %v3271_v4 = vmul.f32 %v4214_v24, %v5547_v28  ;;  %v3052_v24 = vrot.slane %v5478_v40, %v5362_v61 }
 0x54f   : > { %v3390_v47 = vadd.f32 %v3389_v51, %v3263_v10  ;;  %v3264_v36 = vmul.f32 %v4207_v6, %v2446_v19  ;;  %v2905_v10 = vrot.slane %v5414_v2, %v5390_v12  ;;  %v2996_v51 = vrot.slane %v5470_v54, %v5362_v61 }
 0x550   : > { %2851 = vbcast.lane.b32.xlu0 %v2849_v37, 256  ;;  %2942 = vbcast.lane.b32.xlu1 %v2940_v23, 256  ;;  %v4215_v37 = vld [vmem:[%s4681_s11 + $0xa0] sm:$0xff]  ;;  %v2919_v2 = vrot.slane %v5420_v44, %v5352_v57 }
 0x551   : > { %v3391_v25 = vadd.f32 %v3390_v47, %v3264_v36  ;;  %v4216_v47 = vld [vmem:[%s4681_s11 + $0xa8] sm:$0xff] }
 0x552   : > { %v2460_v11 = vpop.permute.xlu0 %2459  ;;  %v5581_v39 = vpop.permute.xlu1 %2550  ;;  %v3273_v28 = vmul.f32 %v4216_v47, %v5554_v8  ;;  %v3066_v47 = vrot.slane %v5478_v40, %v5374_v21 }
 0x553   : > { %v3392_v33 = vadd.f32 %v3391_v25, %v3265_v17  ;;  %v3266_v53 = vmul.f32 %v4209_v22, %v2460_v11  ;;  %v3010_v17 = vrot.slane %v5470_v54, %v5374_v21  ;;  %v4217_v11 = vld [vmem:[%s4681_s11 + $0xb0] sm:$0xff] }
 0x554   : > { %2865 = vbcast.lane.b32.xlu0 %v2863_v32, 256  ;;  %2956 = vbcast.lane.b32.xlu1 %v2954_v62, 256  ;;  %v4218_v62 = vld [vmem:[%s4681_s11 + $0xb8] sm:$0xff] }
 0x555   : > { %v3393_v60 = vadd.f32 %v3392_v33, %v3266_v53  ;;  %v3275_v8 = vmul.f32 %v4218_v62, %v5563_v46  ;;  %v4227_v62 = vld [vmem:[%s4681_s11 + $0x100] sm:$0xff] }
 0x556   : > { %v2474_v34 = vpop.permute.xlu0 %2473  ;;  %v5590_v9 = vpop.permute.xlu1 %2564 }
 0x557   : > { %v3394_v48 = vadd.f32 %v3393_v60, %v3267_v15  ;;  %v3268_v63 = vmul.f32 %v4211_v20, %v2474_v34  ;;  %v3024_v15 = vrot.slane %v5470_v54, %v5382_v59  ;;  %v4219_v34 = vld [vmem:[%s4681_s11 + $0xc0] sm:$0xff] }
 0x558   : > { %2879 = vbcast.lane.b32.xlu0 %v2877_v18, 256  ;;  %2970 = vbcast.lane.b32.xlu1 %v2968_v58, 256  ;;  %v4220_v58 = vld [vmem:[%s4681_s11 + $0xc8] sm:$0xff] }
 0x559   : > { %v3395_v16 = vadd.f32 %v3394_v48, %v3268_v63  ;;  %v3277_v46 = vmul.f32 %v4220_v58, %v5572_v13  ;;  %v4229_v58 = vld [vmem:[%s4681_s11 + $0x110] sm:$0xff] }
 0x55a   : > { %v2488_v41 = vpop.permute.xlu0 %2487  ;;  %v5599_v26 = vpop.permute.xlu1 %2578 }
 0x55b   : > { %v3396_v43 = vadd.f32 %v3395_v16, %v3269_v7  ;;  %v3270_v29 = vmul.f32 %v4213_v14, %v2488_v41  ;;  %v3038_v7 = vrot.slane %v5478_v40, %v5349_v56  ;;  %v4221_v41 = vld [vmem:[%s4681_s11 + $0xd0] sm:$0xff] }
 0x55c   : > { %2893 = vbcast.lane.b32.xlu0 %v2891_v38, 256  ;;  %2984 = vbcast.lane.b32.xlu1 %v2982_v55, 256  ;;  %v4222_v55 = vld [vmem:[%s4681_s11 + $0xd8] sm:$0xff] }
 0x55d   : > { %v3397_v45 = vadd.f32 %v3396_v43, %v3270_v29  ;;  %v3279_v13 = vmul.f32 %v4222_v55, %v5581_v39  ;;  %v4231_v55 = vld [vmem:[%s4681_s11 + $0x120] sm:$0xff] }
 0x55e   : > { %v2502_v42 = vpop.permute.xlu0 %2501  ;;  %v5608_v35 = vpop.permute.xlu1 %2592 }
 0x55f   : > { %v3398_v19 = vadd.f32 %v3397_v45, %v3271_v4  ;;  %v3272_v23 = vmul.f32 %v4215_v37, %v2502_v42  ;;  %v4223_v45 = vld [vmem:[%s4681_s11 + $0xe0] sm:$0xff] }
 0x560   : > { %2907 = vbcast.lane.b32.xlu0 %v2905_v10, 256  ;;  %2998 = vbcast.lane.b32.xlu1 %v2996_v51, 256  ;;  %v4224_v10 = vld [vmem:[%s4681_s11 + $0xe8] sm:$0xff] }
 0x561   : > { %v3399_v6 = vadd.f32 %v3398_v19, %v3272_v23  ;;  %v3281_v39 = vmul.f32 %v4224_v10, %v5590_v9  ;;  %v2975_v23 = vrot.slane %v5470_v54, %v5352_v57  ;;  %v4233_v10 = vld [vmem:[%s4681_s11 + $0x130] sm:$0xff] }
 0x562   : > { %v2516_v36 = vpop.permute.xlu0 %2515  ;;  %v5617_v5 = vpop.permute.xlu1 %2606 }
 0x563   : > { %v3400_v25 = vadd.f32 %v3399_v6, %v3273_v28  ;;  %v3274_v32 = vmul.f32 %v4217_v11, %v2516_v36  ;;  %v4225_v6 = vld [vmem:[%s4681_s11 + $0xf0] sm:$0xff]  ;;  %v3080_v11 = vrot.slane %v5478_v40, %v5382_v59 }
 0x564   : > { %2921 = vbcast.lane.b32.xlu0 %v2919_v2, 256  ;;  %3012 = vbcast.lane.b32.xlu1 %v3010_v17, 256 }
 0x565   : > { %v3401_v33 = vadd.f32 %v3400_v25, %v3274_v32  ;;  %v2989_v25 = vrot.slane %v5470_v54, %v5357_v1 }
 0x566   : > { %v2530_v22 = vpop.permute.xlu0 %2529  ;;  %v5626_v53 = vpop.permute.xlu1 %2620 }
 0x567   : > { %v3402_v60 = vadd.f32 %v3401_v33, %v3275_v8  ;;  %v3276_v18 = vmul.f32 %v4219_v34, %v2530_v22  ;;  %v4228_v33 = vld [vmem:[%s4681_s11 + $0x108] sm:$0xff]  ;;  %v3094_v34 = vrot.slane %v5486_v27, %v5349_v56 }
 0x568   : > { %2935 = vbcast.lane.b32.xlu0 %v2933_v0, 256  ;;  %3026 = vbcast.lane.b32.xlu1 %v3024_v15, 256 }
 0x569   : > { %v3403_v48 = vadd.f32 %v3402_v60, %v3276_v18  ;;  %v3003_v60 = vrot.slane %v5470_v54, %v5371_v50 }
 0x56a   : > { %v2544_v20 = vpop.permute.xlu0 %2543  ;;  %v5635_v63 = vpop.permute.xlu1 %2634 }
 0x56b   : > { %v3404_v16 = vadd.f32 %v3403_v48, %v3277_v46  ;;  %v3278_v38 = vmul.f32 %v4221_v41, %v2544_v20  ;;  %v4230_v48 = vld [vmem:[%s4681_s11 + $0x118] sm:$0xff]  ;;  %v3108_v41 = vrot.slane %v5486_v27, %v5362_v61 }
 0x56c   : > { %2949 = vbcast.lane.b32.xlu0 %v2947_v3, 256  ;;  %3040 = vbcast.lane.b32.xlu1 %v3038_v7, 256 }
 0x56d   : > { %v3405_v43 = vadd.f32 %v3404_v16, %v3278_v38  ;;  %v3017_v16 = vrot.slane %v5470_v54, %v5390_v12  ;;  %v3031_v54 = vrot.slane %v5478_v40, %v5352_v57 }
 0x56e   : > { %v2558_v14 = vpop.permute.xlu0 %2557  ;;  %v5644_v29 = vpop.permute.xlu1 %2648 }
 0x56f   : > { %v3406_v4 = vadd.f32 %v3405_v43, %v3279_v13  ;;  %v3280_v42 = vmul.f32 %v4223_v45, %v2558_v14  ;;  %v4232_v43 = vld [vmem:[%s4681_s11 + $0x128] sm:$0xff]  ;;  %v3122_v45 = vrot.slane %v5486_v27, %v5374_v21 }
 0x570   : > { %2963 = vbcast.lane.b32.xlu0 %v2961_v31, 256  ;;  %3054 = vbcast.lane.b32.xlu1 %v3052_v24, 256  ;;  %v4226_v31 = vld [vmem:[%s4681_s11 + $0xf8] sm:$0xff] }
 0x571   : > { %v3407_v51 = vadd.f32 %v3406_v4, %v3280_v42  ;;  %v3283_v9 = vmul.f32 %v4226_v31, %v5599_v26  ;;  %v3285_v26 = vmul.f32 %v4228_v33, %v5608_v35  ;;  %v3287_v35 = vmul.f32 %v4230_v48, %v5617_v5  ;;  %v4235_v31 = vld [vmem:[%s4681_s11 + $0x140] sm:$0xff]  ;;  %v4237_v33 = vld [vmem:[%s4681_s11 + $0x150] sm:$0xff] }
 0x572   : > { %v2572_v19 = vpop.permute.xlu0 %2571  ;;  %v5654_v37 = vpop.permute.xlu1 %2662  ;;  %v3289_v5 = vmul.f32 %v4232_v43, %v5626_v53  ;;  %v4239_v48 = vld [vmem:[%s4681_s11 + $0x160] sm:$0xff] }
 0x573   : > { %v3408_v28 = vadd.f32 %v3407_v51, %v3281_v39  ;;  %v3282_v44 = vmul.f32 %v4225_v6, %v2572_v19  ;;  %v4234_v51 = vld [vmem:[%s4681_s11 + $0x138] sm:$0xff]  ;;  %v3136_v6 = vrot.slane %v5486_v27, %v5382_v59 }
 0x574   : > { %2977 = vbcast.lane.b32.xlu0 %v2975_v23, 256  ;;  %3068 = vbcast.lane.b32.xlu1 %v3066_v47, 256  ;;  %v3291_v53 = vmul.f32 %v4234_v51, %v5635_v63 }
 0x575   : > { %v3409_v36 = vadd.f32 %v3408_v28, %v3282_v44  ;;  %v3045_v28 = vrot.slane %v5478_v40, %v5357_v1 }
 0x576   : > { %v2586_v2 = vpop.permute.xlu0 %2585  ;;  %v5663_v17 = vpop.permute.xlu1 %2676 }
 0x577   : > { %v3410_v32 = vadd.f32 %v3409_v36, %v3283_v9  ;;  %v3284_v8 = vmul.f32 %v4227_v62, %v2586_v2  ;;  %v4236_v36 = vld [vmem:[%s4681_s11 + $0x148] sm:$0xff]  ;;  %v3150_v62 = vrot.slane %v5494_v49, %v5349_v56 }
 0x578   : > { %2991 = vbcast.lane.b32.xlu0 %v2989_v25, 256  ;;  %3082 = vbcast.lane.b32.xlu1 %v3080_v11, 256  ;;  %v3293_v63 = vmul.f32 %v4236_v36, %v5644_v29 }
 0x579   : > { %v3411_v22 = vadd.f32 %v3410_v32, %v3284_v8  ;;  %v3059_v32 = vrot.slane %v5478_v40, %v5371_v50 }
 0x57a   : > { %v2600_v0 = vpop.permute.xlu0 %2599  ;;  %v5672_v15 = vpop.permute.xlu1 %2690 }
 0x57b   : > { %v3412_v18 = vadd.f32 %v3411_v22, %v3285_v26  ;;  %v3286_v46 = vmul.f32 %v4229_v58, %v2600_v0  ;;  %v4238_v22 = vld [vmem:[%s4681_s11 + $0x158] sm:$0xff]  ;;  %v3164_v58 = vrot.slane %v5494_v49, %v5362_v61 }
 0x57c   : > { %3005 = vbcast.lane.b32.xlu0 %v3003_v60, 256  ;;  %3096 = vbcast.lane.b32.xlu1 %v3094_v34, 256  ;;  %v3295_v29 = vmul.f32 %v4238_v22, %v5654_v37  ;;  %v4248_v22 = vld [vmem:[%s4681_s11 + $0x1a8] sm:$0xff] }
 0x57d   : > { %v3413_v20 = vadd.f32 %v3412_v18, %v3286_v46  ;;  %v3073_v18 = vrot.slane %v5478_v40, %v5390_v12  ;;  %v3087_v40 = vrot.slane %v5486_v27, %v5352_v57 }
 0x57e   : > { %v2614_v3 = vpop.permute.xlu0 %2613  ;;  %v5681_v7 = vpop.permute.xlu1 %2704 }
 0x57f   : > { %v3414_v38 = vadd.f32 %v3413_v20, %v3287_v35  ;;  %v3288_v13 = vmul.f32 %v4231_v55, %v2614_v3  ;;  %v4240_v20 = vld [vmem:[%s4681_s11 + $0x168] sm:$0xff] }
 0x580   : > { %3019 = vbcast.lane.b32.xlu0 %v3017_v16, 256  ;;  %3110 = vbcast.lane.b32.xlu1 %v3108_v41, 256  ;;  %v3297_v37 = vmul.f32 %v4240_v20, %v5663_v17 }
 0x581   : > { %v3415_v14 = vadd.f32 %v3414_v38, %v3288_v13  ;;  %v3178_v38 = vrot.slane %v5494_v49, %v5374_v21  ;;  %v4241_v13 = vld [vmem:[%s4681_s11 + $0x170] sm:$0xff] }
 0x582   : > { %v2628_v24 = vpop.permute.xlu0 %2627  ;;  %v5690_v4 = vpop.permute.xlu1 %2718 }
 0x583   : > { %v3416_v42 = vadd.f32 %v3415_v14, %v3289_v5  ;;  %v3290_v39 = vmul.f32 %v4233_v10, %v2628_v24  ;;  %v4242_v5 = vld [vmem:[%s4681_s11 + $0x178] sm:$0xff] }
 0x584   : > { %3033 = vbcast.lane.b32.xlu0 %v3031_v54, 256  ;;  %3124 = vbcast.lane.b32.xlu1 %v3122_v45, 256  ;;  %v3299_v17 = vmul.f32 %v4242_v5, %v5672_v15  ;;  %v3101_v45 = vrot.slane %v5486_v27, %v5357_v1 }
 0x585   : > { %v3417_v19 = vadd.f32 %v3416_v42, %v3290_v39  ;;  %v3192_v42 = vrot.slane %v5494_v49, %v5382_v59  ;;  %v4243_v39 = vld [vmem:[%s4681_s11 + $0x180] sm:$0xff] }
 0x586   : > { %v2642_v23 = vpop.permute.xlu0 %2641  ;;  %v5699_v47 = vpop.permute.xlu1 %2732 }
 0x587   : > { %v3418_v44 = vadd.f32 %v3417_v19, %v3291_v53  ;;  %v3292_v9 = vmul.f32 %v4235_v31, %v2642_v23  ;;  %v4244_v53 = vld [vmem:[%s4681_s11 + $0x188] sm:$0xff] }
 0x588   : > { %3047 = vbcast.lane.b32.xlu0 %v3045_v28, 256  ;;  %3138 = vbcast.lane.b32.xlu1 %v3136_v6, 256  ;;  %v3301_v15 = vmul.f32 %v4244_v53, %v5681_v7  ;;  %v3115_v6 = vrot.slane %v5486_v27, %v5371_v50  ;;  %v3185_v53 = vrot.slane %v5494_v49, %v5390_v12 }
 0x589   : > { %v3419_v2 = vadd.f32 %v3418_v44, %v3292_v9  ;;  %v3206_v44 = vrot.slane %v5500_v52, %v5349_v56  ;;  %v4245_v9 = vld [vmem:[%s4681_s11 + $0x190] sm:$0xff]  ;;  %v3220_v56 = vrot.slane %v5500_v52, %v5362_v61  ;;  %v3234_v61 = vrot.slane %v5500_v52, %v5374_v21 }
 0x58a   : > { %v2656_v25 = vpop.permute.xlu0 %2655  ;;  %v5708_v11 = vpop.permute.xlu1 %2746  ;;  %v3241_v21 = vrot.slane %v5500_v52, %v5390_v12 }
 0x58b   : > { %v3420_v8 = vadd.f32 %v3419_v2, %v3293_v63  ;;  %v3294_v26 = vmul.f32 %v4237_v33, %v2656_v25  ;;  %v4246_v63 = vld [vmem:[%s4681_s11 + $0x198] sm:$0xff]  ;;  %v4247_v33 = vld [vmem:[%s4681_s11 + $0x1a0] sm:$0xff] }
 0x58c   : > { %3061 = vbcast.lane.b32.xlu0 %v3059_v32, 256  ;;  %3152 = vbcast.lane.b32.xlu1 %v3150_v62, 256  ;;  %v3303_v7 = vmul.f32 %v4246_v63, %v5690_v4  ;;  %v3129_v62 = vrot.slane %v5486_v27, %v5390_v12  ;;  %v3305_v4 = vmul.f32 %v4248_v22, %v5699_v47  ;;  %v4258_v12 = vld [vmem:[%s4681_s11 + $0x1f8] sm:$0xff] }
 0x58d   : > { %v3421_v0 = vadd.f32 %v3420_v8, %v3294_v26  ;;  %v3143_v27 = vrot.slane %v5494_v49, %v5352_v57 }
 0x58e   : > { %v2670_v60 = vpop.permute.xlu0 %2669  ;;  %v5717_v34 = vpop.permute.xlu1 %2760 }
 0x58f   : > { %v3422_v46 = vadd.f32 %v3421_v0, %v3295_v29  ;;  %v3296_v35 = vmul.f32 %v4239_v48, %v2670_v60  ;;  %v4250_v48 = vld [vmem:[%s4681_s11 + $0x1b8] sm:$0xff] }
 0x590   : > { %3075 = vbcast.lane.b32.xlu0 %v3073_v18, 256  ;;  %3166 = vbcast.lane.b32.xlu1 %v3164_v58, 256  ;;  %v4249_v58 = vld [vmem:[%s4681_s11 + $0x1b0] sm:$0xff]  ;;  %v3307_v47 = vmul.f32 %v4250_v48, %v5708_v11 }
 0x591   : > { %v3423_v3 = vadd.f32 %v3422_v46, %v3296_v35 }
 0x592   : > { %v2684_v16 = vpop.permute.xlu0 %2683  ;;  %v5726_v41 = vpop.permute.xlu1 %2774 }
 0x593   : > { %v3424_v55 = vadd.f32 %v3423_v3, %v3297_v37  ;;  %v3298_v43 = vmul.f32 %v4241_v13, %v2684_v16  ;;  %v3157_v3 = vrot.slane %v5494_v49, %v5357_v1 }
 0x594   : > { %3089 = vbcast.lane.b32.xlu0 %v3087_v40, 256  ;;  %3180 = vbcast.lane.b32.xlu1 %v3178_v38, 256  ;;  %v4251_v40 = vld [vmem:[%s4681_s11 + $0x1c0] sm:$0xff] }
 0x595   : > { %v3425_v14 = vadd.f32 %v3424_v55, %v3298_v43  ;;  %v4252_v55 = vld [vmem:[%s4681_s11 + $0x1c8] sm:$0xff] }
 0x596   : > { %v2698_v24 = vpop.permute.xlu0 %2697  ;;  %v5735_v54 = vpop.permute.xlu1 %2788  ;;  %v3309_v11 = vmul.f32 %v4252_v55, %v5717_v34 }
 0x597   : > { %v3426_v10 = vadd.f32 %v3425_v14, %v3299_v17  ;;  %v3300_v51 = vmul.f32 %v4243_v39, %v2698_v24  ;;  %v3171_v17 = vrot.slane %v5494_v49, %v5371_v50  ;;  %v4253_v24 = vld [vmem:[%s4681_s11 + $0x1d0] sm:$0xff] }
 0x598   : > { %3103 = vbcast.lane.b32.xlu0 %v3101_v45, 256  ;;  %3194 = vbcast.lane.b32.xlu1 %v3192_v42, 256  ;;  %v4254_v42 = vld [vmem:[%s4681_s11 + $0x1d8] sm:$0xff] }
 0x599   : > { %v3427_v19 = vadd.f32 %v3426_v10, %v3300_v51  ;;  %v3311_v10 = vmul.f32 %v4254_v42, %v5726_v41  ;;  %v4268_v42 = vld [vmem:[%s4681_s11 + $0x248] sm:$0xff] }
 0x59a   : > { %v2712_v23 = vpop.permute.xlu0 %2711  ;;  %v5744_v28 = vpop.permute.xlu1 %2802 }
 0x59b   : > { %v3428_v31 = vadd.f32 %v3427_v19, %v3301_v15  ;;  %v3302_v36 = vmul.f32 %v4245_v9, %v2712_v23  ;;  %v4255_v19 = vld [vmem:[%s4681_s11 + $0x1e0] sm:$0xff]  ;;  %v3315_v49 = vmul.f32 %v4258_v12, %v5744_v28 }
 0x59c   : > { %3117 = vbcast.lane.b32.xlu0 %v3115_v6, 256  ;;  %3208 = vbcast.lane.b32.xlu1 %v3206_v44, 256  ;;  %v4256_v6 = vld [vmem:[%s4681_s11 + $0x1e8] sm:$0xff] }
 0x59d   : > { %v3429_v2 = vadd.f32 %v3428_v31, %v3302_v36  ;;  %v3313_v44 = vmul.f32 %v4256_v6, %v5735_v54  ;;  %v3199_v36 = vrot.slane %v5500_v52, %v5352_v57  ;;  %v3213_v54 = vrot.slane %v5500_v52, %v5357_v1  ;;  %v4260_v57 = vld [vmem:[%s4681_s11 + $0x208] sm:$0xff]  ;;  %v4262_v1 = vld [vmem:[%s4681_s11 + $0x218] sm:$0xff] }
 0x59e   : > { %v2726_v25 = vpop.permute.xlu0 %2725  ;;  %v5753_v32 = vpop.permute.xlu1 %2816 }
 0x59f   : > { %v3430_v8 = vadd.f32 %v3429_v2, %v3303_v7  ;;  %v3304_v26 = vmul.f32 %v4247_v33, %v2726_v25  ;;  %v4257_v7 = vld [vmem:[%s4681_s11 + $0x1f0] sm:$0xff]  ;;  %v4259_v33 = vld [vmem:[%s4681_s11 + $0x200] sm:$0xff]  ;;  %v3317_v22 = vmul.f32 %v4260_v57, %v5753_v32 }
 0x5a0   : > { %3131 = vbcast.lane.b32.xlu0 %v3129_v62, 256  ;;  %3222 = vbcast.lane.b32.xlu1 %v3220_v56, 256  ;;  %v4263_v32 = vld [vmem:[%s4681_s11 + $0x220] sm:$0xff] }
 0x5a1   : > { %v3431_v29 = vadd.f32 %v3430_v8, %v3304_v26  ;;  %v4275_v57 = vld [vmem:[%s4681_s11 + $0x280] sm:$0xff] }
 0x5a2   : > { %v2740_v0 = vpop.permute.xlu0 %2739  ;;  %v5762_v60 = vpop.permute.xlu1 %2830 }
 0x5a3   : > { %v3432_v18 = vadd.f32 %v3431_v29, %v3305_v4  ;;  %v3306_v46 = vmul.f32 %v4249_v58, %v2740_v0  ;;  %v3227_v0 = vrot.slane %v5500_v52, %v5371_v50  ;;  %v3319_v58 = vmul.f32 %v4262_v1, %v5762_v60 }
 0x5a4   : > { %3145 = vbcast.lane.b32.xlu0 %v3143_v27, 256  ;;  %3236 = vbcast.lane.b32.xlu1 %v3234_v61, 256  ;;  %v4261_v61 = vld [vmem:[%s4681_s11 + $0x210] sm:$0xff]  ;;  %v3248_v60 = vrot.slane %v5500_v52, %v5382_v59 }
 0x5a5   : > { %v3433_v35 = vadd.f32 %v3432_v18, %v3306_v46 }
 0x5a6   : > { %v2754_v20 = vpop.permute.xlu0 %2753  ;;  %v5771_v37 = vpop.permute.xlu1 %2844 }
 0x5a7   : > { %v3434_v16 = vadd.f32 %v3433_v35, %v3307_v47  ;;  %v3308_v38 = vmul.f32 %v4251_v40, %v2754_v20 }
 0x5a8   : > { %3159 = vbcast.lane.b32.xlu0 %v3157_v3, 256  ;;  %3243 = vbcast.lane.b32.xlu1 %v3241_v21, 256  ;;  %v4264_v3 = vld [vmem:[%s4681_s11 + $0x228] sm:$0xff] }
 0x5a9   : > { %v3435_v13 = vadd.f32 %v3434_v16, %v3308_v38  ;;  %v3321_v50 = vmul.f32 %v4264_v3, %v5771_v37  ;;  %v4265_v38 = vld [vmem:[%s4681_s11 + $0x230] sm:$0xff]  ;;  %v4267_v37 = vld [vmem:[%s4681_s11 + $0x240] sm:$0xff] }
 0x5aa   : > { %v2768_v43 = vpop.permute.xlu0 %2767  ;;  %v5780_v5 = vpop.permute.xlu1 %2858 }
 0x5ab   : > { %v3436_v14 = vadd.f32 %v3435_v13, %v3309_v11  ;;  %v3310_v45 = vmul.f32 %v4253_v24, %v2768_v43  ;;  %v4266_v13 = vld [vmem:[%s4681_s11 + $0x238] sm:$0xff] }
 0x5ac   : > { %3173 = vbcast.lane.b32.xlu0 %v3171_v17, 256 }
 0x5ad   : > { %v3437_v39 = vadd.f32 %v3436_v14, %v3310_v45 }
 0x5ae   : > { %v2782_v51 = vpop.permute.xlu0 %2781  ;;  %v5787_v34 = vpop.permute.xlu1 %2872 }
 0x5af   : > { %v3438_v15 = vadd.f32 %v3437_v39, %v3311_v10  ;;  %v3312_v23 = vmul.f32 %v4255_v19, %v2782_v51  ;;  %v3325_v59 = vmul.f32 %v4268_v42, %v5787_v34  ;;  %v4269_v51 = vld [vmem:[%s4681_s11 + $0x250] sm:$0xff]  ;;  %v4270_v19 = vld [vmem:[%s4681_s11 + $0x258] sm:$0xff]  ;;  %v4284_v42 = vld [vmem:[%s4681_s11 + $0x2c8] sm:$0xff] }
 0x5b0   : > { %3187 = vbcast.lane.b32.xlu0 %v3185_v53, 256 }
 0x5b1   : > { %v3439_v31 = vadd.f32 %v3438_v15, %v3312_v23 }
 0x5b2   : > { %v2796_v9 = vpop.permute.xlu0 %2795  ;;  %v2887_v41 = vpop.permute.xlu1 %2886 }
 0x5b3   : > { %v3440_v63 = vadd.f32 %v3439_v31, %v3313_v44  ;;  %v3314_v2 = vmul.f32 %v4257_v7, %v2796_v9  ;;  %v4271_v31 = vld [vmem:[%s4681_s11 + $0x260] sm:$0xff] }
 0x5b4   : > { %3201 = vbcast.lane.b32.xlu0 %v3199_v36, 256 }
 0x5b5   : > { %v3441_v25 = vadd.f32 %v3440_v63, %v3314_v2  ;;  %v4272_v63 = vld [vmem:[%s4681_s11 + $0x268] sm:$0xff] }
 0x5b6   : > { %v2810_v62 = vpop.permute.xlu0 %2809  ;;  %v2901_v56 = vpop.permute.xlu1 %2900 }
 0x5b7   : > { %v3442_v8 = vadd.f32 %v3441_v25, %v3315_v49  ;;  %v3316_v26 = vmul.f32 %v4259_v33, %v2810_v62  ;;  %v3329_v34 = vmul.f32 %v4272_v63, %v2901_v56  ;;  %v4273_v49 = vld [vmem:[%s4681_s11 + $0x270] sm:$0xff] }
 0x5b8   : > { %3215 = vbcast.lane.b32.xlu0 %v3213_v54, 256  ;;  %v4274_v54 = vld [vmem:[%s4681_s11 + $0x278] sm:$0xff] }
 0x5b9   : > { %v3443_v4 = vadd.f32 %v3442_v8, %v3316_v26 }
 0x5ba   : > { %v2824_v29 = vpop.permute.xlu0 %2823  ;;  %v2915_v28 = vpop.permute.xlu1 %2914 }
 0x5bb   : > { %v3444_v27 = vadd.f32 %v3443_v4, %v3317_v22  ;;  %v3318_v18 = vmul.f32 %v4261_v61, %v2824_v29  ;;  %v4276_v29 = vld [vmem:[%s4681_s11 + $0x288] sm:$0xff] }
 0x5bc   : > { %3229 = vbcast.lane.b32.xlu0 %v3227_v0, 256 }
 0x5bd   : > { %v3445_v46 = vadd.f32 %v3444_v27, %v3318_v18  ;;  %v4277_v18 = vld [vmem:[%s4681_s11 + $0x290] sm:$0xff] }
 0x5be   : > { %v2838_v48 = vpop.permute.xlu0 %2837  ;;  %v2929_v47 = vpop.permute.xlu1 %2928 }
 0x5bf   : > { %v3320_v35 = vmul.f32 %v4263_v32, %v2838_v48  ;;  %v3446_v20 = vadd.f32 %v3445_v46, %v3319_v58  ;;  %v3333_v56 = vmul.f32 %v4276_v29, %v2929_v47  ;;  %v4278_v46 = vld [vmem:[%s4681_s11 + $0x298] sm:$0xff] }
 0x5c0   : > { %3510 = vperm.xlu0 %4189, %v5367_v30   ;;  %v3323_v30 = vmul.f32 %v4266_v13, %v5780_v5  ;;  %v3327_v5 = vmul.f32 %v4270_v19, %v2887_v41  ;;  %v3331_v41 = vmul.f32 %v4274_v54, %v2915_v28  ;;  %v4282_v13 = vld [vmem:[%s4681_s11 + $0x2b8] sm:$0xff] }
 0x5c1   : > { %v3447_v21 = vadd.f32 %v3446_v20, %v3320_v35  ;;  %v4279_v35 = vld [vmem:[%s4681_s11 + $0x2a0] sm:$0xff]  ;;  %v4286_v19 = vld [vmem:[%s4681_s11 + $0x2d8] sm:$0xff] }
 0x5c2   : > { %v2852_v16 = vpop.permute.xlu0 %2851  ;;  %v2943_v40 = vpop.permute.xlu1 %2942 }
 0x5c3   : > { %v3322_v55 = vmul.f32 %v4265_v38, %v2852_v16  ;;  %v3448_v11 = vadd.f32 %v3447_v21, %v3321_v50  ;;  %v3335_v28 = vmul.f32 %v4278_v46, %v2943_v40  ;;  %v4280_v21 = vld [vmem:[%s4681_s11 + $0x2a8] sm:$0xff]  ;;  %v4281_v38 = vld [vmem:[%s4681_s11 + $0x2b0] sm:$0xff] }
 0x5c4   : > { %3250 = vbcast.lane.b32.xlu0 %v3248_v60, 256 }
 0x5c5   : > { %v3449_v43 = vadd.f32 %v3448_v11, %v3322_v55 }
 0x5c6   : > { %v2866_v17 = vpop.permute.xlu0 %2865  ;;  %v2957_v14 = vpop.permute.xlu1 %2956 }
 0x5c7   : > { %v3324_v24 = vmul.f32 %v4267_v37, %v2866_v17  ;;  %v3450_v45 = vadd.f32 %v3449_v43, %v3323_v30  ;;  %v3337_v47 = vmul.f32 %v4280_v21, %v2957_v14  ;;  %v4283_v37 = vld [vmem:[%s4681_s11 + $0x2c0] sm:$0xff] }
 0x5c9   : > { %v3451_v52 = vadd.f32 %v3450_v45, %v3324_v24 }
 0x5ca   : > { %v2880_v10 = vpop.permute.xlu0 %2879  ;;  %v2971_v39 = vpop.permute.xlu1 %2970 }
 0x5cb   : > { %v3326_v53 = vmul.f32 %v4269_v51, %v2880_v10  ;;  %v3452_v15 = vadd.f32 %v3451_v52, %v3325_v59  ;;  %v3339_v30 = vmul.f32 %v4282_v13, %v2971_v39  ;;  %v4285_v51 = vld [vmem:[%s4681_s11 + $0x2d0] sm:$0xff] }
 0x5cd   : > { %v3453_v23 = vadd.f32 %v3452_v15, %v3326_v53 }
 0x5ce   : > { %v2894_v6 = vpop.permute.xlu0 %2893  ;;  %v2985_v44 = vpop.permute.xlu1 %2984 }
 0x5cf   : > { %v3328_v9 = vmul.f32 %v4271_v31, %v2894_v6  ;;  %v3454_v36 = vadd.f32 %v3453_v23, %v3327_v5  ;;  %v3341_v59 = vmul.f32 %v4284_v42, %v2985_v44  ;;  %v4287_v6 = vld [vmem:[%s4681_s11 + $0x2e0] sm:$0xff] }
 0x5d1   : > { %v3455_v7 = vadd.f32 %v3454_v36, %v3328_v9  ;;  %v4288_v36 = vld [vmem:[%s4681_s11 + $0x2e8] sm:$0xff] }
 0x5d2   : > { %v2908_v2 = vpop.permute.xlu0 %2907  ;;  %v2999_v12 = vpop.permute.xlu1 %2998 }
 0x5d3   : > { %v3330_v25 = vmul.f32 %v4273_v49, %v2908_v2  ;;  %v3456_v62 = vadd.f32 %v3455_v7, %v3329_v34  ;;  %v3343_v39 = vmul.f32 %v4286_v19, %v2999_v12  ;;  %v4289_v2 = vld [vmem:[%s4681_s11 + $0x2f0] sm:$0xff] }
 0x5d5   : > { %v3457_v8 = vadd.f32 %v3456_v62, %v3330_v25  ;;  %v4290_v62 = vld [vmem:[%s4681_s11 + $0x2f8] sm:$0xff] }
 0x5d6   : > { %v2922_v33 = vpop.permute.xlu0 %2921  ;;  %v3013_v26 = vpop.permute.xlu1 %3012 }
 0x5d7   : > { %v3332_v22 = vmul.f32 %v4275_v57, %v2922_v33  ;;  %v3458_v4 = vadd.f32 %v3457_v8, %v3331_v41  ;;  %v3345_v63 = vmul.f32 %v4288_v36, %v3013_v26  ;;  %v4291_v33 = vld [vmem:[%s4681_s11 + $0x300] sm:$0xff] }
 0x5d9   : > { %v3459_v0 = vadd.f32 %v3458_v4, %v3332_v22  ;;  %v4292_v4 = vld [vmem:[%s4681_s11 + $0x308] sm:$0xff] }
 0x5da   : > { %v2936_v27 = vpop.permute.xlu0 %2935  ;;  %v3027_v61 = vpop.permute.xlu1 %3026 }
 0x5db   : > { %v3334_v1 = vmul.f32 %v4277_v18, %v2936_v27  ;;  %v3460_v58 = vadd.f32 %v3459_v0, %v3333_v56  ;;  %v3347_v54 = vmul.f32 %v4290_v62, %v3027_v61  ;;  %v4293_v0 = vld [vmem:[%s4681_s11 + $0x310] sm:$0xff] }
 0x5dd   : > { %v3461_v48 = vadd.f32 %v3460_v58, %v3334_v1  ;;  %v4294_v1 = vld [vmem:[%s4681_s11 + $0x318] sm:$0xff] }
 0x5de   : > { %v2950_v32 = vpop.permute.xlu0 %2949  ;;  %v3041_v50 = vpop.permute.xlu1 %3040 }
 0x5df   : > { %v3336_v20 = vmul.f32 %v4279_v35, %v2950_v32  ;;  %v3462_v3 = vadd.f32 %v3461_v48, %v3335_v28  ;;  %v3349_v26 = vmul.f32 %v4292_v4, %v3041_v50  ;;  %v4295_v48 = vld [vmem:[%s4681_s11 + $0x320] sm:$0xff] }
 0x5e1   : > { %v3463_v16 = vadd.f32 %v3462_v3, %v3336_v20  ;;  %v4296_v20 = vld [vmem:[%s4681_s11 + $0x328] sm:$0xff] }
 0x5e2   : > { %v2964_v60 = vpop.permute.xlu0 %2963  ;;  %v3055_v43 = vpop.permute.xlu1 %3054 }
 0x5e3   : > { %v3338_v55 = vmul.f32 %v4281_v38, %v2964_v60  ;;  %v3464_v11 = vadd.f32 %v3463_v16, %v3337_v47  ;;  %v3351_v58 = vmul.f32 %v4294_v1, %v3055_v43  ;;  %v4297_v16 = vld [vmem:[%s4681_s11 + $0x330] sm:$0xff] }
 0x5e5   : > { %v3465_v40 = vadd.f32 %v3464_v11, %v3338_v55  ;;  %v4298_v55 = vld [vmem:[%s4681_s11 + $0x338] sm:$0xff] }
 0x5e6   : > { %v2978_v17 = vpop.permute.xlu0 %2977  ;;  %v3069_v10 = vpop.permute.xlu1 %3068 }
 0x5e7   : > { %v3340_v24 = vmul.f32 %v4283_v37, %v2978_v17  ;;  %v3466_v45 = vadd.f32 %v3465_v40, %v3339_v30  ;;  %v3353_v3 = vmul.f32 %v4296_v20, %v3069_v10  ;;  %v4299_v40 = vld [vmem:[%s4681_s11 + $0x340] sm:$0xff]  ;;  %v4300_v37 = vld [vmem:[%s4681_s11 + $0x348] sm:$0xff] }
 0x5e9   : > { %v3467_v14 = vadd.f32 %v3466_v45, %v3340_v24 }
 0x5ea   : > { %v2992_v52 = vpop.permute.xlu0 %2991  ;;  %v3083_v44 = vpop.permute.xlu1 %3082 }
 0x5eb   : > { %v3342_v53 = vmul.f32 %v4285_v51, %v2992_v52  ;;  %v3468_v15 = vadd.f32 %v3467_v14, %v3341_v59  ;;  %v3355_v11 = vmul.f32 %v4298_v55, %v3083_v44  ;;  %v4301_v14 = vld [vmem:[%s4681_s11 + $0x350] sm:$0xff]  ;;  %v4302_v51 = vld [vmem:[%s4681_s11 + $0x358] sm:$0xff] }
 0x5ec   : > { %v4305_v44 = vld [vmem:[%s4681_s11 + $0x370] sm:$0xff] }
 0x5ed   : > { %v3469_v5 = vadd.f32 %v3468_v15, %v3342_v53 }
 0x5ee   : > { %v3006_v23 = vpop.permute.xlu0 %3005  ;;  %v3097_v8 = vpop.permute.xlu1 %3096 }
 0x5ef   : > { %v3344_v31 = vmul.f32 %v4287_v6, %v3006_v23  ;;  %v3470_v9 = vadd.f32 %v3469_v5, %v3343_v39  ;;  %v3357_v24 = vmul.f32 %v4300_v37, %v3097_v8  ;;  %v4303_v5 = vld [vmem:[%s4681_s11 + $0x360] sm:$0xff] }
 0x5f1   : > { %v3471_v34 = vadd.f32 %v3470_v9, %v3344_v31  ;;  %v4304_v31 = vld [vmem:[%s4681_s11 + $0x368] sm:$0xff] }
 0x5f2   : > { %v3020_v7 = vpop.permute.xlu0 %3019  ;;  %v3111_v61 = vpop.permute.xlu1 %3110 }
 0x5f3   : > { %v3346_v49 = vmul.f32 %v4289_v2, %v3020_v7  ;;  %v3472_v25 = vadd.f32 %v3471_v34, %v3345_v63  ;;  %v3359_v53 = vmul.f32 %v4302_v51, %v3111_v61  ;;  %v4306_v2 = vld [vmem:[%s4681_s11 + $0x378] sm:$0xff]  ;;  %v4311_v61 = vld [vmem:[%s4681_s11 + $0x3a0] sm:$0xff] }
 0x5f4   : > { %v4318_v51 = vld [vmem:[%s4681_s11 + $0x3d8] sm:$0xff] }
 0x5f5   : > { %v3473_v12 = vadd.f32 %v3472_v25, %v3346_v49 }
 0x5f6   : > { %v3034_v41 = vpop.permute.xlu0 %3033  ;;  %v3125_v47 = vpop.permute.xlu1 %3124 }
 0x5f7   : > { %v3348_v57 = vmul.f32 %v4291_v33, %v3034_v41  ;;  %v3474_v22 = vadd.f32 %v3473_v12, %v3347_v54  ;;  %v3361_v9 = vmul.f32 %v4304_v31, %v3125_v47  ;;  %v4307_v12 = vld [vmem:[%s4681_s11 + $0x380] sm:$0xff]  ;;  %v4308_v33 = vld [vmem:[%s4681_s11 + $0x388] sm:$0xff] }
 0x5f9   : > { %v3475_v29 = vadd.f32 %v3474_v22, %v3348_v57 }
 0x5fa   : > { %v3048_v56 = vpop.permute.xlu0 %3047  ;;  %v3139_v45 = vpop.permute.xlu1 %3138 }
 0x5fb   : > { %v3350_v27 = vmul.f32 %v4293_v0, %v3048_v56  ;;  %v3476_v18 = vadd.f32 %v3475_v29, %v3349_v26  ;;  %v3363_v49 = vmul.f32 %v4306_v2, %v3139_v45  ;;  %v4309_v29 = vld [vmem:[%s4681_s11 + $0x390] sm:$0xff] }
 0x5fc   : > { %v4317_v45 = vld [vmem:[%s4681_s11 + $0x3d0] sm:$0xff] }
 0x5fd   : > { %v3477_v46 = vadd.f32 %v3476_v18, %v3350_v27  ;;  %v4310_v27 = vld [vmem:[%s4681_s11 + $0x398] sm:$0xff] }
 0x5fe   : > { %v3062_v28 = vpop.permute.xlu0 %3061  ;;  %v3153_v39 = vpop.permute.xlu1 %3152 }
 0x5ff   : > { %v3352_v32 = vmul.f32 %v4295_v48, %v3062_v28  ;;  %v3478_v35 = vadd.f32 %v3477_v46, %v3351_v58  ;;  %v3365_v57 = vmul.f32 %v4308_v33, %v3153_v39  ;;  %v4312_v48 = vld [vmem:[%s4681_s11 + $0x3a8] sm:$0xff] }
 0x601   : > { %v3479_v50 = vadd.f32 %v3478_v35, %v3352_v32 }
 0x602   : > { %v3076_v21 = vpop.permute.xlu0 %3075  ;;  %v3167_v25 = vpop.permute.xlu1 %3166 }
 0x603   : > { %v3354_v60 = vmul.f32 %v4297_v16, %v3076_v21  ;;  %v3480_v38 = vadd.f32 %v3479_v50, %v3353_v3  ;;  %v3367_v18 = vmul.f32 %v4310_v27, %v3167_v25  ;;  %v4313_v50 = vld [vmem:[%s4681_s11 + $0x3b0] sm:$0xff]  ;;  %v4314_v16 = vld [vmem:[%s4681_s11 + $0x3b8] sm:$0xff] }
 0x604   : > { %v4322_v25 = vld [vmem:[%s4681_s11 + $0x3f8] sm:$0xff] }
 0x605   : > { %v3481_v13 = vadd.f32 %v3480_v38, %v3354_v60 }
 0x606   : > { %v3090_v30 = vpop.permute.xlu0 %3089  ;;  %v3181_v26 = vpop.permute.xlu1 %3180 }
 0x607   : > { %v3356_v43 = vmul.f32 %v4299_v40, %v3090_v30  ;;  %v3482_v17 = vadd.f32 %v3481_v13, %v3355_v11  ;;  %v3369_v32 = vmul.f32 %v4312_v48, %v3181_v26  ;;  %v4315_v13 = vld [vmem:[%s4681_s11 + $0x3c0] sm:$0xff] }
 0x609   : > { %v3483_v42 = vadd.f32 %v3482_v17, %v3356_v43  ;;  %v4316_v17 = vld [vmem:[%s4681_s11 + $0x3c8] sm:$0xff] }
 0x60a   : > { %v3104_v59 = vpop.permute.xlu0 %3103  ;;  %v3195_v35 = vpop.permute.xlu1 %3194 }
 0x60b   : > { %v3358_v52 = vmul.f32 %v4301_v14, %v3104_v59  ;;  %v3484_v10 = vadd.f32 %v3483_v42, %v3357_v24  ;;  %v3371_v60 = vmul.f32 %v4314_v16, %v3195_v35 }
 0x60d   : > { %v3485_v15 = vadd.f32 %v3484_v10, %v3358_v52 }
 0x60e   : > { %v3118_v19 = vpop.permute.xlu0 %3117  ;;  %v3209_v11 = vpop.permute.xlu1 %3208 }
 0x60f   : > { %v3360_v23 = vmul.f32 %v4303_v5, %v3118_v19  ;;  %v3486_v6 = vadd.f32 %v3485_v15, %v3359_v53  ;;  %v3373_v37 = vmul.f32 %v4316_v17, %v3209_v11  ;;  %v4319_v15 = vld [vmem:[%s4681_s11 + $0x3e0] sm:$0xff] }
 0x611   : > { %v3487_v36 = vadd.f32 %v3486_v6, %v3360_v23  ;;  %v4320_v6 = vld [vmem:[%s4681_s11 + $0x3e8] sm:$0xff] }
 0x612   : > { %v3132_v63 = vpop.permute.xlu0 %3131  ;;  %v3223_v14 = vpop.permute.xlu1 %3222 }
 0x613   : > { %v3362_v34 = vmul.f32 %v4305_v44, %v3132_v63  ;;  %v3488_v7 = vadd.f32 %v3487_v36, %v3361_v9  ;;  %v3375_v53 = vmul.f32 %v4318_v51, %v3223_v14  ;;  %v4321_v44 = vld [vmem:[%s4681_s11 + $0x3f0] sm:$0xff] }
 0x615   : > { %v3489_v62 = vadd.f32 %v3488_v7, %v3362_v34  ;;  %v3507_v7 = vld [vmem:[#allocation4] sm:$0xff] }
 0x616   : > { %v3146_v54 = vpop.permute.xlu0 %3145  ;;  %v3237_v5 = vpop.permute.xlu1 %3236 }
 0x617   : > { %v3364_v41 = vmul.f32 %v4307_v12, %v3146_v54  ;;  %v3490_v8 = vadd.f32 %v3489_v62, %v3363_v49  ;;  %v3377_v31 = vmul.f32 %v4320_v6, %v3237_v5 }
 0x619   : > { %v3491_v22 = vadd.f32 %v3490_v8, %v3364_v41 }
 0x61a   : > { %v3160_v4 = vpop.permute.xlu0 %3159  ;;  %v3244_v9 = vpop.permute.xlu1 %3243 }
 0x61b   : > { %v3366_v56 = vmul.f32 %v4309_v29, %v3160_v4  ;;  %v3492_v0 = vadd.f32 %v3491_v22, %v3365_v57  ;;  %v3378_v34 = vmul.f32 %v4321_v44, %v3244_v9 }
 0x61d   : > { %v3493_v1 = vadd.f32 %v3492_v0, %v3366_v56 }
 0x61e   : > { %v3174_v58 = vpop.permute.xlu0 %3173 }
 0x61f   : > { %v3368_v46 = vmul.f32 %v4311_v61, %v3174_v58  ;;  %v3494_v28 = vadd.f32 %v3493_v1, %v3367_v18 }
 0x621   : > { %v3495_v20 = vadd.f32 %v3494_v28, %v3368_v46 }
 0x622   : > { %v3188_v3 = vpop.permute.xlu0 %3187 }
 0x623   : > { %v3370_v21 = vmul.f32 %v4313_v50, %v3188_v3  ;;  %v3496_v47 = vadd.f32 %v3495_v20, %v3369_v32 }
 0x625   : > { %v3497_v38 = vadd.f32 %v3496_v47, %v3370_v21 }
 0x626   : > { %v3202_v55 = vpop.permute.xlu0 %3201 }
 0x627   : > { %v3372_v30 = vmul.f32 %v4315_v13, %v3202_v55  ;;  %v3498_v40 = vadd.f32 %v3497_v38, %v3371_v60 }
 0x629   : > { %v3499_v43 = vadd.f32 %v3498_v40, %v3372_v30 }
 0x62a   : > { %v3216_v24 = vpop.permute.xlu0 %3215 }
 0x62b   : > { %v3374_v42 = vmul.f32 %v4317_v45, %v3216_v24  ;;  %v3500_v59 = vadd.f32 %v3499_v43, %v3373_v37 }
 0x62d   : > { %v3501_v52 = vadd.f32 %v3500_v59, %v3374_v42 }
 0x62e   : > { %v3230_v10 = vpop.permute.xlu0 %3229 }
 0x62f   : > { %v3376_v19 = vmul.f32 %v4319_v15, %v3230_v10  ;;  %v3502_v39 = vadd.f32 %v3501_v52, %v3375_v53 }
 0x631   : > { %v3503_v23 = vadd.f32 %v3502_v39, %v3376_v19 }
 0x633   : > { %v3504_v63 = vadd.f32 %v3503_v23, %v3377_v31 }
 0x635   : > { %v3505_v49 = vadd.f32 %v3504_v63, %v3378_v34 }
 0x63b   : > { %v3511_v36 = vpop.permute.xlu0 %3510 }
 0x63c   : > { %v3513_v54 = vmul.f32 %v3511_v36, %v3507_v7 }
 0x63f   : > { %v3251_v2 = vpop.permute.xlu0 %3250 }
 0x640   : > { %v3379_v62 = vmul.f32 %v4322_v25, %v3251_v2 }
 0x642   : > { %v3506_v12 = vadd.f32 %v3505_v49, %v3379_v62  ;;  %3519 = sbr.rel (%p3668_p7) target bundleno = 1750 (0x6d6), region = 48 }
 0x644   : > { %v3514_v41 = vadd.f32 %v3513_v54, %v3506_v12 }
 0x646   : > { %3515 = vst [vmem:[#allocation4] sm:$0xff] %v3514_v41 }
 0x647   : > { %v3521_v8 = vld [vmem:[#allocation3] sm:$0xff]  ;;  %v4516_v33 = vmov 0  }
 0x648   : > { %4323 = vset.pattern.permute.xlu0 %v4516_v33 }
 0x649   : > { %3524 = vperm.xlu0 %4323, %v3521_v8  }
 0x64d   : > { %v3520_v22 = vld [vmem:[#allocation4] sm:$0xff] }
 0x6c4   : > { %v3525_v57 = vpop.permute.xlu0 %3524 }
 0x6c5   : > { %4324 = vrcp.f32 %v3525_v57 }
 0x6d2   : > { %v4325_v4 = vpop.eup %4324 }
 0x6d3   : > { %v3528_v26 = vmul.f32 %v4325_v4, %v3520_v22 }
 0x6d5   : > { %3529 = vst [vmem:[%s245_s28] sm:$0xff] %v3528_v26 }
 0x6d6 PF: > { %s3670_s11 = sshll.u32 %s4494_s19, 7  ;;  %s5967_s4 = sld [smem:[#allocation24_spill]] }
 0x6d7   : > { %s3544_s30 = sshll.u32 %s245_s28, 4  ;;  %s3531_s17 = scalar_lea.sflag [#allocation7], %s243_s12  ;;  %s3545_s30 = int_to_ptr.vmem [resolvable:$true] %s3544_s30 }
 0x6d8   : > { %s4382_s27 = scalar_lea.vmem %s3545_s30, 128  ;;  %s4517_s15 = smov [#allocation10]  }
 0x6d9   : > { %p4383_p5 = scmp.ne.s32.totalorder %s3545_s30, %s4382_s27  ;;  %s4386_s23 = sshll.u32 %s4517_s15, 4  ;;  %s4387_s23 = int_to_ptr.vmem [resolvable:$false] %s4386_s23 }
 0x6da   : > { %s4388_s26 = scalar_lea.vmem %s4387_s23, 256  ;;  %p4389_p8 = scmp.lt.s32.totalorder %s3545_s30, %s4387_s23 }
 0x6db   : > { %p4384_p1 = pnand %p4383_p5, %p4620_p12  ;;  %p4390_p9 = scmp.lt.s32.totalorder %s4388_s26, %s4382_s27 }
 0x6dc   : > { %s3542_s5 = scalar_lea.hbm %s5967_s4, %s3670_s11 }
 0x6dd   : > { %p4385_p6 = pneg %p4384_p1  ;;  %p4391_p10 = por %p4390_p9, %p4389_p8 }
 0x6df   : > { %p4392_p3 = pnand %p4391_p10, %p4385_p6 }
 0x6e1   : > { %4395 = shalt.err (!%p4392_p3)
}
 0x6e2   : > { %s4396_s19 = scalar_lea.hbm %s3542_s5, 128  ;;  %s4400_s28 = scalar_lea.hbm %s5967_s4, 256 }
 0x6e3   : > { %p4397_p11 = scmp.ne.s32.totalorder %s3542_s5, %s4396_s19  ;;  %p4401_p4 = scmp.lt.s32.totalorder %s3542_s5, %s5967_s4 }
 0x6e4   : > { %p4402_p7 = scmp.lt.s32.totalorder %s4400_s28, %s4396_s19 }
 0x6e5   : > { %p4398_p13 = pnand %p4397_p11, %p4620_p12 }
 0x6e6   : > { %p4403_p5 = por %p4402_p7, %p4401_p4 }
 0x6e7   : > { %p4399_p0 = pneg %p4398_p13 }
 0x6e9   : > { %p4404_p1 = pnand %p4403_p5, %p4399_p0 }
 0x6eb   : > { %4407 = shalt.err (!%p4404_p1)
}
 0x6ec   : > { %4078 = dma.vmem_to_hbm [thread:$0]  (%p4620_p12), %s3545_s30, 128, %s3542_s5, %s3531_s17  }
 0x6ed PF: > { %s5968_s24 = sld [smem:[#allocation14_spill]]  ;;  %p4092_p6 = scmp.ge.s32.totalorder %s4506_s22, 2 }
 0x6ef   : > { %p4088_p8 = pnand %p4092_p6, %p4633_p2 }
 0x6f1   : > { %p4089_p9 = pneg %p4088_p8 }
 0x6f3   : > { %s3556_s14 = sand.u32 1, %s5968_s24  }
 0x6f4   : > { %s3557_s8 = scalar_lea.sflag [#allocation7], %s3556_s14 }
 0x6f5   : > { %4461 = dma.done.wait (%p4089_p9), %s3557_s8, 128  }
 0x6f6   : > { %4463 = vsyncadd (%p4089_p9), %s3557_s8, 4294967168  ;;  %s22_s22 = sadd.s32 1, %s4506_s22   ;;  %s5970_s3 = sld [smem:[#allocation15_spill]] }
 0x6f7   : > { %p19_p10 = scmp.ge.s32.totalorder %s22_s22, 6   ;;  %s5971_s14 = sld [smem:[#allocation19_spill]] }
 0x6f8   : > { %s5972_s7 = sld [smem:[#allocation16_spill]]  ;;  %s5976_s12 = smov %s4470_s13 }
 0x6f9   : > { %s5973_s17 = sld [smem:[#allocation20_spill]]  ;;  %s5978_s15 = smov %s4482_s16 }
 0x6fa   : > { %s5974_s29 = sld [smem:[#allocation17_spill]]  ;;  %s5980_s18 = smov %s4498_s20 }
 0x6fb   : > { %s5975_s11 = sld [smem:[#allocation18_spill]]  ;;  %s5981_s19 = smov %s4502_s21 }
 0x6fc   : > { %s5977_s13 = smov %s5970_s3 }
 0x6fd   :  { %21 = sbr.rel (!%p19_p10) target bundleno = 14 (0xe), region = 98 }
 0x6fe   : > { %s5979_s16 = smov %s5972_s7 }
 0x700   : > { %s5982_s20 = smov %s5974_s29 }
 0x701   : > { %s5983_s21 = smov %s5975_s11 }
 0x702   :  { %3562 = vsyncpa [#allocation6], 1 }
 0x703   :  { %3564 = vsyncpa [#allocation6 + $0x1], 1 }
 0x704   :  { %3565 = vsyncpa [#allocation9], 1 }
 0x705   :  { %3567 = vsyncpa [#allocation9 + $0x1], 1 }
 0x706   :  { %3568 = vsyncpa [#allocation7], 1 }
 0x707   :  { %3570 = vsyncpa [#allocation7 + $0x1], 1 }

</bundles_post_ra>
